<compile_context>
chip_gen: v6e
topology: v6e:2x2x1
jax: 0.10.0
libtpu: 0.0.40
codegen_flags: <defaults>
</compile_context>

<pallas_src>
import functools

import jax
import jax.numpy as jnp
from jax import lax
from jax.experimental import pallas as pl
from jax.experimental.pallas import tpu as pltpu


# ---------------------------------------------------------------------------
# Fused kernel: 3x conv3x3+ReLU  ->  fused 1x1 heads  ->  fc + softmax / tanh.
# ---------------------------------------------------------------------------
def _fused_kernel(xpad_ref, w1_ref, b1_ref, w2_ref, b2_ref, w3_ref, b3_ref,
                  whead_ref, bhead_ref, wa_ref, wb_ref, wc_ref, bfc_ref,
                  gt_ref, p_out_ref, v_out_ref, pad_ref, col_ref):
    B, Hp, Wp, C = pad_ref.shape
    H, W = Hp - 2, Wp - 2
    N = B * H * W

    # Layer-1 input arrives already embedded (channel 0) in a zero-padded
    # (B, H+2, W+2, C) slab.  Copy it once; the 1-pixel zero border persists
    # across all three layers because each layer only rewrites the interior.
    pad_ref[...] = xpad_ref[...]

    def conv3x3_relu(w_ref, b_ref):
        # im2col: gather the 9 shifted windows into one (N, 9*C) tile, then a
        # single K=9*C MXU matmul (instead of 9 K=C matmuls + VALU add chain).
        for dh in range(3):
            for dw in range(3):
                tap = dh * 3 + dw
                col_ref[:, tap * C:(tap + 1) * C] = (
                    pad_ref[:, dh:dh + H, dw:dw + W, :].reshape(N, C))
        y = jnp.dot(col_ref[...], w_ref[...],
                    preferred_element_type=jnp.float32)
        return jnp.maximum(y + b_ref[...], 0.0)          # bias + ReLU

    a = conv3x3_relu(w1_ref, b1_ref)
    pad_ref[:, 1:H + 1, 1:W + 1, :] = a.reshape(B, H, W, C)
    a = conv3x3_relu(w2_ref, b2_ref)
    pad_ref[:, 1:H + 1, 1:W + 1, :] = a.reshape(B, H, W, C)
    a3 = conv3x3_relu(w3_ref, b3_ref)

    # Both 1x1 heads fused into a single (N, C) @ (C, 3) matmul:
    # columns 0:2 = policy_head channels, column 2 = value_head channel.
    heads = (jnp.dot(a3, whead_ref[...], preferred_element_type=jnp.float32)
             + bhead_ref[...])

    # fc_policy / fc_value with no lane-crossing flatten: per-row weight
    # products followed by a per-batch row reduction expressed as a
    # (B, N) @ (N, 3) matmul with a 0/1 batch-selector matrix.
    t = (heads[:, 0:1] * wa_ref[...]
         + heads[:, 1:2] * wb_ref[...]
         + heads[:, 2:3] * wc_ref[...])
    bv = (jnp.dot(gt_ref[...], t, preferred_element_type=jnp.float32)
          + bfc_ref[...])

    logits = bv[:, 0:2]
    m = jnp.max(logits, axis=-1, keepdims=True)
    e = jnp.exp(logits - m)
    p_out_ref[...] = e / jnp.sum(e, axis=-1, keepdims=True)   # softmax
    v_out_ref[...] = jnp.tanh(bv[:, 2:3])                     # tanh


# ---------------------------------------------------------------------------
# Wrapper: parameter / input re-layout is plain-JAX glue.
# ---------------------------------------------------------------------------
def policy_value_forward(x_nchw, params, board_size, num_channels):
    B = x_nchw.shape[0]
    H = W = board_size
    C = num_channels
    HW = H * W
    N = B * HW

    # Input: NCHW -> NHWC, embedded in a zero-padded C-channel slab (ch 0).
    x_nhwc = jnp.transpose(x_nchw, (0, 2, 3, 1)).astype(jnp.float32)
    x_pad = jnp.zeros((B, H + 2, W + 2, C), jnp.float32)
    x_pad = x_pad.at[:, 1:H + 1, 1:W + 1, 0:1].set(x_nhwc)

    def conv_taps(w):  # (Cout, Cin, 3, 3) -> (3, 3, Cin, Cout), tap-major
        return jnp.transpose(w, (2, 3, 1, 0))

    # conv1 has Cin=1: zero-pad its weight to 9*C rows so all three conv
    # layers share one im2col matmul shape.
    w1 = jnp.zeros((3, 3, C, C), jnp.float32)
    w1 = w1.at[:, :, 0, :].set(conv_taps(params['conv1_w'])[:, :, 0, :])
    w1 = w1.reshape(9 * C, C)
    w2 = conv_taps(params['conv2_w']).reshape(9 * C, C)
    w3 = conv_taps(params['conv3_w']).reshape(9 * C, C)
    b1 = params['conv1_b'].reshape(1, C)
    b2 = params['conv2_b'].reshape(1, C)
    b3 = params['conv3_b'].reshape(1, C)

    # Fused 1x1 heads: (C, 3) = [policy(2) | value(1)].
    whead = jnp.concatenate([params['ph_w'].reshape(2, C).T,
                             params['vh_w'].reshape(1, C).T], axis=1)
    bhead = jnp.concatenate([params['ph_b'], params['vh_b']]).reshape(1, 3)

    # fc_policy: PyTorch flattens (c, h, w); our rows are (b, h, w) with the
    # head channel kept separate, so permute the weight to [hw, c, out] and
    # tile it across the batch rows.
    wfp = jnp.transpose(params['fc_p_w'].reshape(2, 2, H, W),
                        (2, 3, 1, 0)).reshape(HW, 2, 2)       # [hw, c, out]
    wfp_t = jnp.tile(wfp, (B, 1, 1))                          # (N, 2, 2)
    wfv_t = jnp.tile(params['fc_v_w'].reshape(HW), (B,))      # (N,)
    zcol = jnp.zeros((N, 1), jnp.float32)
    wa = jnp.concatenate([wfp_t[:, 0, :], zcol], axis=1)      # (N, 3)
    wb = jnp.concatenate([wfp_t[:, 1, :], zcol], axis=1)      # (N, 3)
    wc = jnp.concatenate([jnp.zeros((N, 2), jnp.float32),
                          wfv_t[:, None]], axis=1)            # (N, 3)
    bfc = jnp.concatenate([params['fc_p_b'], params['fc_v_b']]).reshape(1, 3)

    # Batch-selector: gt[b, n] = 1 iff flattened row n belongs to batch b.
    gt = (jnp.arange(N, dtype=jnp.int32)[None, :] // HW
          == jnp.arange(B, dtype=jnp.int32)[:, None]).astype(jnp.float32)

    vmem = pl.BlockSpec(memory_space=pltpu.MemorySpace.VMEM)

    policy, value = pl.pallas_call(
        _fused_kernel,
        out_shape=(jax.ShapeDtypeStruct((B, 2), jnp.float32),
                   jax.ShapeDtypeStruct((B, 1), jnp.float32)),
        in_specs=[vmem] * 14,
        out_specs=(vmem, vmem),
        scratch_shapes=[pltpu.VMEM((B, H + 2, W + 2, C), jnp.float32),
                        pltpu.VMEM((N, 9 * C), jnp.float32)],
    )(x_pad, w1, b1, w2, b2, w3, b3, whead, bhead, wa, wb, wc, bfc, gt)
    return policy, value


# ---------------------------------------------------------------------------
# Deterministic parameter init (PyTorch-convention shapes).
# ---------------------------------------------------------------------------
def init_params(key, board_size, num_channels):
    C, H = num_channels, board_size
    ks = jax.random.split(key, 14)

    def w(k, shape, scale=0.1):
        return scale * jax.random.normal(k, shape, jnp.float32)

    return dict(
        conv1_w=w(ks[0], (C, 1, 3, 3)), conv1_b=w(ks[1], (C,)),
        conv2_w=w(ks[2], (C, C, 3, 3)), conv2_b=w(ks[3], (C,)),
        conv3_w=w(ks[4], (C, C, 3, 3)), conv3_b=w(ks[5], (C,)),
        ph_w=w(ks[6], (2, C, 1, 1)), ph_b=w(ks[7], (2,)),
        vh_w=w(ks[8], (1, C, 1, 1)), vh_b=w(ks[9], (1,)),
        fc_p_w=w(ks[10], (2, H * H * 2)), fc_p_b=w(ks[11], (2,)),
        fc_v_w=w(ks[12], (1, H * H)), fc_v_b=w(ks[13], (1,)),
    )


# Pure-JAX reference mirroring the PyTorch forward (NCHW) for validation.
def reference_forward(x, p):
    dn = ('NCHW', 'OIHW', 'NCHW')

    def conv(x, w, b, pad):
        y = lax.conv_general_dilated(x, w, (1, 1), ((pad, pad), (pad, pad)),
                                     dimension_numbers=dn)
        return y + b[None, :, None, None]

    x = jax.nn.relu(conv(x, p['conv1_w'], p['conv1_b'], 1))
    x = jax.nn.relu(conv(x, p['conv2_w'], p['conv2_b'], 1))
    x = jax.nn.relu(conv(x, p['conv3_w'], p['conv3_b'], 1))
    pol = conv(x, p['ph_w'], p['ph_b'], 0).reshape(x.shape[0], -1)
    pol = jax.nn.softmax(pol @ p['fc_p_w'].T + p['fc_p_b'], axis=1)
    val = conv(x, p['vh_w'], p['vh_b'], 0).reshape(x.shape[0], -1)
    val = jnp.tanh(val @ p['fc_v_w'].T + p['fc_v_b'])
    return pol, val


if __name__ == "__main__":
    board_size = 8
    num_channels = 8
    batch = 2

    key = jax.random.PRNGKey(0)
    k_x, k_p = jax.random.split(key)
    params = init_params(k_p, board_size, num_channels)
    x = jax.random.normal(k_x, (batch, 1, board_size, board_size), jnp.float32)

    fwd = jax.jit(functools.partial(policy_value_forward,
                                    board_size=board_size,
                                    num_channels=num_channels))
    policy, value = fwd(x, params)
    jax.block_until_ready((policy, value))

    pol_ref, val_ref = reference_forward(x, params)
    assert policy.shape == (batch, 2) and value.shape == (batch, 1)
    assert jnp.allclose(policy, pol_ref, atol=1e-4, rtol=1e-4)
    assert jnp.allclose(value, val_ref, atol=1e-4, rtol=1e-4)

    print("KERNEL_OK")
</pallas_src>

<mosaic_0001>
module attributes {stable_mosaic.version = 11 : i64} {
  func.func @_fused_kernel(%arg0: memref<2x10x10x8xf32, #tpu.memory_space<vmem>>, %arg1: memref<72x8xf32, #tpu.memory_space<vmem>>, %arg2: memref<1x8xf32, #tpu.memory_space<vmem>>, %arg3: memref<72x8xf32, #tpu.memory_space<vmem>>, %arg4: memref<1x8xf32, #tpu.memory_space<vmem>>, %arg5: memref<72x8xf32, #tpu.memory_space<vmem>>, %arg6: memref<1x8xf32, #tpu.memory_space<vmem>>, %arg7: memref<8x3xf32, #tpu.memory_space<vmem>>, %arg8: memref<1x3xf32, #tpu.memory_space<vmem>>, %arg9: memref<128x3xf32, #tpu.memory_space<vmem>>, %arg10: memref<128x3xf32, #tpu.memory_space<vmem>>, %arg11: memref<128x3xf32, #tpu.memory_space<vmem>>, %arg12: memref<1x3xf32, #tpu.memory_space<vmem>>, %arg13: memref<2x128xf32, #tpu.memory_space<vmem>>, %arg14: memref<2x2xf32, #tpu.memory_space<vmem>>, %arg15: memref<2x1xf32, #tpu.memory_space<vmem>>, %arg16: memref<2x10x10x8xf32, #tpu.memory_space<vmem>>, %arg17: memref<128x72xf32, #tpu.memory_space<vmem>>) attributes {dimension_semantics = [], scalar_prefetch = 0 : i64, scratch_operands = 2 : i64, tpu.core_type = #tpu.core_type<tc>} {
    %c0 = arith.constant 0 : index
    %c0_0 = arith.constant 0 : index
    %c0_1 = arith.constant 0 : index
    %c0_2 = arith.constant 0 : index
    %0 = vector.load %arg0[%c0, %c0_0, %c0_1, %c0_2] : memref<2x10x10x8xf32, #tpu.memory_space<vmem>>, vector<2x10x10x8xf32>
    %c0_3 = arith.constant 0 : index
    %c0_4 = arith.constant 0 : index
    %c0_5 = arith.constant 0 : index
    %c0_6 = arith.constant 0 : index
    %1 = vector.load %arg16[%c0_3, %c0_4, %c0_5, %c0_6] : memref<2x10x10x8xf32, #tpu.memory_space<vmem>>, vector<2x10x10x8xf32>
    tpu.vector_store %arg16[%c0_3, %c0_4, %c0_5, %c0_6], %0 {strides = array<i32>} : memref<2x10x10x8xf32, #tpu.memory_space<vmem>>, vector<2x10x10x8xf32>,
    %c0_7 = arith.constant 0 : index
    %c0_8 = arith.constant 0 : index
    %c0_9 = arith.constant 0 : index
    %c0_10 = arith.constant 0 : index
    %2 = vector.load %arg16[%c0_7, %c0_8, %c0_9, %c0_10] : memref<2x10x10x8xf32, #tpu.memory_space<vmem>>, vector<2x8x8x8xf32>
    %3 = vector.shape_cast %2 : vector<2x8x8x8xf32> to vector<128x8xf32>
    %c0_11 = arith.constant 0 : index
    %c0_12 = arith.constant 0 : index
    %4 = vector.load %arg17[%c0_11, %c0_12] : memref<128x72xf32, #tpu.memory_space<vmem>>, vector<128x8xf32>
    tpu.vector_store %arg17[%c0_11, %c0_12], %3 {strides = array<i32>} : memref<128x72xf32, #tpu.memory_space<vmem>>, vector<128x8xf32>,
    %c0_13 = arith.constant 0 : index
    %c0_14 = arith.constant 0 : index
    %c1 = arith.constant 1 : index
    %c0_15 = arith.constant 0 : index
    %5 = vector.load %arg16[%c0_13, %c0_14, %c1, %c0_15] : memref<2x10x10x8xf32, #tpu.memory_space<vmem>>, vector<2x8x8x8xf32>
    %6 = vector.shape_cast %5 : vector<2x8x8x8xf32> to vector<128x8xf32>
    %c0_16 = arith.constant 0 : index
    %c8 = arith.constant 8 : index
    %7 = vector.load %arg17[%c0_16, %c8] : memref<128x72xf32, #tpu.memory_space<vmem>>, vector<128x8xf32>
    tpu.vector_store %arg17[%c0_16, %c8], %6 {strides = array<i32>} : memref<128x72xf32, #tpu.memory_space<vmem>>, vector<128x8xf32>,
    %c0_17 = arith.constant 0 : index
    %c0_18 = arith.constant 0 : index
    %c2 = arith.constant 2 : index
    %c0_19 = arith.constant 0 : index
    %8 = vector.load %arg16[%c0_17, %c0_18, %c2, %c0_19] : memref<2x10x10x8xf32, #tpu.memory_space<vmem>>, vector<2x8x8x8xf32>
    %9 = vector.shape_cast %8 : vector<2x8x8x8xf32> to vector<128x8xf32>
    %c0_20 = arith.constant 0 : index
    %c16 = arith.constant 16 : index
    %10 = vector.load %arg17[%c0_20, %c16] : memref<128x72xf32, #tpu.memory_space<vmem>>, vector<128x8xf32>
    tpu.vector_store %arg17[%c0_20, %c16], %9 {strides = array<i32>} : memref<128x72xf32, #tpu.memory_space<vmem>>, vector<128x8xf32>,
    %c0_21 = arith.constant 0 : index
    %c1_22 = arith.constant 1 : index
    %c0_23 = arith.constant 0 : index
    %c0_24 = arith.constant 0 : index
    %11 = vector.load %arg16[%c0_21, %c1_22, %c0_23, %c0_24] : memref<2x10x10x8xf32, #tpu.memory_space<vmem>>, vector<2x8x8x8xf32>
    %12 = vector.shape_cast %11 : vector<2x8x8x8xf32> to vector<128x8xf32>
    %c0_25 = arith.constant 0 : index
    %c24 = arith.constant 24 : index
    %13 = vector.load %arg17[%c0_25, %c24] : memref<128x72xf32, #tpu.memory_space<vmem>>, vector<128x8xf32>
    tpu.vector_store %arg17[%c0_25, %c24], %12 {strides = array<i32>} : memref<128x72xf32, #tpu.memory_space<vmem>>, vector<128x8xf32>,
    %c0_26 = arith.constant 0 : index
    %c1_27 = arith.constant 1 : index
    %c1_28 = arith.constant 1 : index
    %c0_29 = arith.constant 0 : index
    %14 = vector.load %arg16[%c0_26, %c1_27, %c1_28, %c0_29] : memref<2x10x10x8xf32, #tpu.memory_space<vmem>>, vector<2x8x8x8xf32>
    %15 = vector.shape_cast %14 : vector<2x8x8x8xf32> to vector<128x8xf32>
    %c0_30 = arith.constant 0 : index
    %c32 = arith.constant 32 : index
    %16 = vector.load %arg17[%c0_30, %c32] : memref<128x72xf32, #tpu.memory_space<vmem>>, vector<128x8xf32>
    tpu.vector_store %arg17[%c0_30, %c32], %15 {strides = array<i32>} : memref<128x72xf32, #tpu.memory_space<vmem>>, vector<128x8xf32>,
    %c0_31 = arith.constant 0 : index
    %c1_32 = arith.constant 1 : index
    %c2_33 = arith.constant 2 : index
    %c0_34 = arith.constant 0 : index
    %17 = vector.load %arg16[%c0_31, %c1_32, %c2_33, %c0_34] : memref<2x10x10x8xf32, #tpu.memory_space<vmem>>, vector<2x8x8x8xf32>
    %18 = vector.shape_cast %17 : vector<2x8x8x8xf32> to vector<128x8xf32>
    %c0_35 = arith.constant 0 : index
    %c40 = arith.constant 40 : index
    %19 = vector.load %arg17[%c0_35, %c40] : memref<128x72xf32, #tpu.memory_space<vmem>>, vector<128x8xf32>
    tpu.vector_store %arg17[%c0_35, %c40], %18 {strides = array<i32>} : memref<128x72xf32, #tpu.memory_space<vmem>>, vector<128x8xf32>,
    %c0_36 = arith.constant 0 : index
    %c2_37 = arith.constant 2 : index
    %c0_38 = arith.constant 0 : index
    %c0_39 = arith.constant 0 : index
    %20 = vector.load %arg16[%c0_36, %c2_37, %c0_38, %c0_39] : memref<2x10x10x8xf32, #tpu.memory_space<vmem>>, vector<2x8x8x8xf32>
    %21 = vector.shape_cast %20 : vector<2x8x8x8xf32> to vector<128x8xf32>
    %c0_40 = arith.constant 0 : index
    %c48 = arith.constant 48 : index
    %22 = vector.load %arg17[%c0_40, %c48] : memref<128x72xf32, #tpu.memory_space<vmem>>, vector<128x8xf32>
    tpu.vector_store %arg17[%c0_40, %c48], %21 {strides = array<i32>} : memref<128x72xf32, #tpu.memory_space<vmem>>, vector<128x8xf32>,
    %c0_41 = arith.constant 0 : index
    %c2_42 = arith.constant 2 : index
    %c1_43 = arith.constant 1 : index
    %c0_44 = arith.constant 0 : index
    %23 = vector.load %arg16[%c0_41, %c2_42, %c1_43, %c0_44] : memref<2x10x10x8xf32, #tpu.memory_space<vmem>>, vector<2x8x8x8xf32>
    %24 = vector.shape_cast %23 : vector<2x8x8x8xf32> to vector<128x8xf32>
    %c0_45 = arith.constant 0 : index
    %c56 = arith.constant 56 : index
    %25 = vector.load %arg17[%c0_45, %c56] : memref<128x72xf32, #tpu.memory_space<vmem>>, vector<128x8xf32>
    tpu.vector_store %arg17[%c0_45, %c56], %24 {strides = array<i32>} : memref<128x72xf32, #tpu.memory_space<vmem>>, vector<128x8xf32>,
    %c0_46 = arith.constant 0 : index
    %c2_47 = arith.constant 2 : index
    %c2_48 = arith.constant 2 : index
    %c0_49 = arith.constant 0 : index
    %26 = vector.load %arg16[%c0_46, %c2_47, %c2_48, %c0_49] : memref<2x10x10x8xf32, #tpu.memory_space<vmem>>, vector<2x8x8x8xf32>
    %27 = vector.shape_cast %26 : vector<2x8x8x8xf32> to vector<128x8xf32>
    %c0_50 = arith.constant 0 : index
    %c64 = arith.constant 64 : index
    %28 = vector.load %arg17[%c0_50, %c64] : memref<128x72xf32, #tpu.memory_space<vmem>>, vector<128x8xf32>
    tpu.vector_store %arg17[%c0_50, %c64], %27 {strides = array<i32>} : memref<128x72xf32, #tpu.memory_space<vmem>>, vector<128x8xf32>,
    %c0_51 = arith.constant 0 : index
    %c0_52 = arith.constant 0 : index
    %29 = vector.load %arg17[%c0_51, %c0_52] : memref<128x72xf32, #tpu.memory_space<vmem>>, vector<128x72xf32>
    %c0_53 = arith.constant 0 : index
    %c0_54 = arith.constant 0 : index
    %30 = vector.load %arg1[%c0_53, %c0_54] : memref<72x8xf32, #tpu.memory_space<vmem>>, vector<72x8xf32>
    %cst = arith.constant dense<0.000000e+00> : vector<128x8xf32>
    %31 = tpu.matmul %29, %30, %cst {dimension_numbers = #tpu.dot_dimension_numbers<[1], [0], [0], [1], [0, 0, 1, 1], [], []>} : vector<128x72xf32>, vector<72x8xf32>, vector<128x8xf32> -> vector<128x8xf32>
    %c0_55 = arith.constant 0 : index
    %c0_56 = arith.constant 0 : index
    %32 = vector.load %arg2[%c0_55, %c0_56] : memref<1x8xf32, #tpu.memory_space<vmem>>, vector<1x8xf32>
    %33 = vector.broadcast %32 : vector<1x8xf32> to vector<128x8xf32>
    %34 = arith.addf %31, %33 : vector<128x8xf32>
    %cst_57 = arith.constant 0.000000e+00 : f32
    %35 = vector.broadcast %cst_57 : f32 to vector<128x8xf32>
    %36 = arith.maximumf %34, %35 : vector<128x8xf32>
    %37 = vector.shape_cast %36 : vector<128x8xf32> to vector<2x8x8x8xf32>
    %c0_58 = arith.constant 0 : index
    %c1_59 = arith.constant 1 : index
    %c1_60 = arith.constant 1 : index
    %c0_61 = arith.constant 0 : index
    %38 = vector.load %arg16[%c0_58, %c1_59, %c1_60, %c0_61] : memref<2x10x10x8xf32, #tpu.memory_space<vmem>>, vector<2x8x8x8xf32>
    tpu.vector_store %arg16[%c0_58, %c1_59, %c1_60, %c0_61], %37 {strides = array<i32>} : memref<2x10x10x8xf32, #tpu.memory_space<vmem>>, vector<2x8x8x8xf32>,
    %c0_62 = arith.constant 0 : index
    %c0_63 = arith.constant 0 : index
    %c0_64 = arith.constant 0 : index
    %c0_65 = arith.constant 0 : index
    %39 = vector.load %arg16[%c0_62, %c0_63, %c0_64, %c0_65] : memref<2x10x10x8xf32, #tpu.memory_space<vmem>>, vector<2x8x8x8xf32>
    %40 = vector.shape_cast %39 : vector<2x8x8x8xf32> to vector<128x8xf32>
    %c0_66 = arith.constant 0 : index
    %c0_67 = arith.constant 0 : index
    %41 = vector.load %arg17[%c0_66, %c0_67] : memref<128x72xf32, #tpu.memory_space<vmem>>, vector<128x8xf32>
    tpu.vector_store %arg17[%c0_66, %c0_67], %40 {strides = array<i32>} : memref<128x72xf32, #tpu.memory_space<vmem>>, vector<128x8xf32>,
    %c0_68 = arith.constant 0 : index
    %c0_69 = arith.constant 0 : index
    %c1_70 = arith.constant 1 : index
    %c0_71 = arith.constant 0 : index
    %42 = vector.load %arg16[%c0_68, %c0_69, %c1_70, %c0_71] : memref<2x10x10x8xf32, #tpu.memory_space<vmem>>, vector<2x8x8x8xf32>
    %43 = vector.shape_cast %42 : vector<2x8x8x8xf32> to vector<128x8xf32>
    %c0_72 = arith.constant 0 : index
    %c8_73 = arith.constant 8 : index
    %44 = vector.load %arg17[%c0_72, %c8_73] : memref<128x72xf32, #tpu.memory_space<vmem>>, vector<128x8xf32>
    tpu.vector_store %arg17[%c0_72, %c8_73], %43 {strides = array<i32>} : memref<128x72xf32, #tpu.memory_space<vmem>>, vector<128x8xf32>,
    %c0_74 = arith.constant 0 : index
    %c0_75 = arith.constant 0 : index
    %c2_76 = arith.constant 2 : index
    %c0_77 = arith.constant 0 : index
    %45 = vector.load %arg16[%c0_74, %c0_75, %c2_76, %c0_77] : memref<2x10x10x8xf32, #tpu.memory_space<vmem>>, vector<2x8x8x8xf32>
    %46 = vector.shape_cast %45 : vector<2x8x8x8xf32> to vector<128x8xf32>
    %c0_78 = arith.constant 0 : index
    %c16_79 = arith.constant 16 : index
    %47 = vector.load %arg17[%c0_78, %c16_79] : memref<128x72xf32, #tpu.memory_space<vmem>>, vector<128x8xf32>
    tpu.vector_store %arg17[%c0_78, %c16_79], %46 {strides = array<i32>} : memref<128x72xf32, #tpu.memory_space<vmem>>, vector<128x8xf32>,
    %c0_80 = arith.constant 0 : index
    %c1_81 = arith.constant 1 : index
    %c0_82 = arith.constant 0 : index
    %c0_83 = arith.constant 0 : index
    %48 = vector.load %arg16[%c0_80, %c1_81, %c0_82, %c0_83] : memref<2x10x10x8xf32, #tpu.memory_space<vmem>>, vector<2x8x8x8xf32>
    %49 = vector.shape_cast %48 : vector<2x8x8x8xf32> to vector<128x8xf32>
    %c0_84 = arith.constant 0 : index
    %c24_85 = arith.constant 24 : index
    %50 = vector.load %arg17[%c0_84, %c24_85] : memref<128x72xf32, #tpu.memory_space<vmem>>, vector<128x8xf32>
    tpu.vector_store %arg17[%c0_84, %c24_85], %49 {strides = array<i32>} : memref<128x72xf32, #tpu.memory_space<vmem>>, vector<128x8xf32>,
    %c0_86 = arith.constant 0 : index
    %c1_87 = arith.constant 1 : index
    %c1_88 = arith.constant 1 : index
    %c0_89 = arith.constant 0 : index
    %51 = vector.load %arg16[%c0_86, %c1_87, %c1_88, %c0_89] : memref<2x10x10x8xf32, #tpu.memory_space<vmem>>, vector<2x8x8x8xf32>
    %52 = vector.shape_cast %51 : vector<2x8x8x8xf32> to vector<128x8xf32>
    %c0_90 = arith.constant 0 : index
    %c32_91 = arith.constant 32 : index
    %53 = vector.load %arg17[%c0_90, %c32_91] : memref<128x72xf32, #tpu.memory_space<vmem>>, vector<128x8xf32>
    tpu.vector_store %arg17[%c0_90, %c32_91], %52 {strides = array<i32>} : memref<128x72xf32, #tpu.memory_space<vmem>>, vector<128x8xf32>,
    %c0_92 = arith.constant 0 : index
    %c1_93 = arith.constant 1 : index
    %c2_94 = arith.constant 2 : index
    %c0_95 = arith.constant 0 : index
    %54 = vector.load %arg16[%c0_92, %c1_93, %c2_94, %c0_95] : memref<2x10x10x8xf32, #tpu.memory_space<vmem>>, vector<2x8x8x8xf32>
    %55 = vector.shape_cast %54 : vector<2x8x8x8xf32> to vector<128x8xf32>
    %c0_96 = arith.constant 0 : index
    %c40_97 = arith.constant 40 : index
    %56 = vector.load %arg17[%c0_96, %c40_97] : memref<128x72xf32, #tpu.memory_space<vmem>>, vector<128x8xf32>
    tpu.vector_store %arg17[%c0_96, %c40_97], %55 {strides = array<i32>} : memref<128x72xf32, #tpu.memory_space<vmem>>, vector<128x8xf32>,
    %c0_98 = arith.constant 0 : index
    %c2_99 = arith.constant 2 : index
    %c0_100 = arith.constant 0 : index
    %c0_101 = arith.constant 0 : index
    %57 = vector.load %arg16[%c0_98, %c2_99, %c0_100, %c0_101] : memref<2x10x10x8xf32, #tpu.memory_space<vmem>>, vector<2x8x8x8xf32>
    %58 = vector.shape_cast %57 : vector<2x8x8x8xf32> to vector<128x8xf32>
    %c0_102 = arith.constant 0 : index
    %c48_103 = arith.constant 48 : index
    %59 = vector.load %arg17[%c0_102, %c48_103] : memref<128x72xf32, #tpu.memory_space<vmem>>, vector<128x8xf32>
    tpu.vector_store %arg17[%c0_102, %c48_103], %58 {strides = array<i32>} : memref<128x72xf32, #tpu.memory_space<vmem>>, vector<128x8xf32>,
    %c0_104 = arith.constant 0 : index
    %c2_105 = arith.constant 2 : index
    %c1_106 = arith.constant 1 : index
    %c0_107 = arith.constant 0 : index
    %60 = vector.load %arg16[%c0_104, %c2_105, %c1_106, %c0_107] : memref<2x10x10x8xf32, #tpu.memory_space<vmem>>, vector<2x8x8x8xf32>
    %61 = vector.shape_cast %60 : vector<2x8x8x8xf32> to vector<128x8xf32>
    %c0_108 = arith.constant 0 : index
    %c56_109 = arith.constant 56 : index
    %62 = vector.load %arg17[%c0_108, %c56_109] : memref<128x72xf32, #tpu.memory_space<vmem>>, vector<128x8xf32>
    tpu.vector_store %arg17[%c0_108, %c56_109], %61 {strides = array<i32>} : memref<128x72xf32, #tpu.memory_space<vmem>>, vector<128x8xf32>,
    %c0_110 = arith.constant 0 : index
    %c2_111 = arith.constant 2 : index
    %c2_112 = arith.constant 2 : index
    %c0_113 = arith.constant 0 : index
    %63 = vector.load %arg16[%c0_110, %c2_111, %c2_112, %c0_113] : memref<2x10x10x8xf32, #tpu.memory_space<vmem>>, vector<2x8x8x8xf32>
    %64 = vector.shape_cast %63 : vector<2x8x8x8xf32> to vector<128x8xf32>
    %c0_114 = arith.constant 0 : index
    %c64_115 = arith.constant 64 : index
    %65 = vector.load %arg17[%c0_114, %c64_115] : memref<128x72xf32, #tpu.memory_space<vmem>>, vector<128x8xf32>
    tpu.vector_store %arg17[%c0_114, %c64_115], %64 {strides = array<i32>} : memref<128x72xf32, #tpu.memory_space<vmem>>, vector<128x8xf32>,
    %c0_116 = arith.constant 0 : index
    %c0_117 = arith.constant 0 : index
    %66 = vector.load %arg17[%c0_116, %c0_117] : memref<128x72xf32, #tpu.memory_space<vmem>>, vector<128x72xf32>
    %c0_118 = arith.constant 0 : index
    %c0_119 = arith.constant 0 : index
    %67 = vector.load %arg3[%c0_118, %c0_119] : memref<72x8xf32, #tpu.memory_space<vmem>>, vector<72x8xf32>
    %cst_120 = arith.constant dense<0.000000e+00> : vector<128x8xf32>
    %68 = tpu.matmul %66, %67, %cst_120 {dimension_numbers = #tpu.dot_dimension_numbers<[1], [0], [0], [1], [0, 0, 1, 1], [], []>} : vector<128x72xf32>, vector<72x8xf32>, vector<128x8xf32> -> vector<128x8xf32>
    %c0_121 = arith.constant 0 : index
    %c0_122 = arith.constant 0 : index
    %69 = vector.load %arg4[%c0_121, %c0_122] : memref<1x8xf32, #tpu.memory_space<vmem>>, vector<1x8xf32>
    %70 = vector.broadcast %69 : vector<1x8xf32> to vector<128x8xf32>
    %71 = arith.addf %68, %70 : vector<128x8xf32>
    %cst_123 = arith.constant 0.000000e+00 : f32
    %72 = vector.broadcast %cst_123 : f32 to vector<128x8xf32>
    %73 = arith.maximumf %71, %72 : vector<128x8xf32>
    %74 = vector.shape_cast %73 : vector<128x8xf32> to vector<2x8x8x8xf32>
    %c0_124 = arith.constant 0 : index
    %c1_125 = arith.constant 1 : index
    %c1_126 = arith.constant 1 : index
    %c0_127 = arith.constant 0 : index
    %75 = vector.load %arg16[%c0_124, %c1_125, %c1_126, %c0_127] : memref<2x10x10x8xf32, #tpu.memory_space<vmem>>, vector<2x8x8x8xf32>
    tpu.vector_store %arg16[%c0_124, %c1_125, %c1_126, %c0_127], %74 {strides = array<i32>} : memref<2x10x10x8xf32, #tpu.memory_space<vmem>>, vector<2x8x8x8xf32>,
    %c0_128 = arith.constant 0 : index
    %c0_129 = arith.constant 0 : index
    %c0_130 = arith.constant 0 : index
    %c0_131 = arith.constant 0 : index
    %76 = vector.load %arg16[%c0_128, %c0_129, %c0_130, %c0_131] : memref<2x10x10x8xf32, #tpu.memory_space<vmem>>, vector<2x8x8x8xf32>
    %77 = vector.shape_cast %76 : vector<2x8x8x8xf32> to vector<128x8xf32>
    %c0_132 = arith.constant 0 : index
    %c0_133 = arith.constant 0 : index
    %78 = vector.load %arg17[%c0_132, %c0_133] : memref<128x72xf32, #tpu.memory_space<vmem>>, vector<128x8xf32>
    tpu.vector_store %arg17[%c0_132, %c0_133], %77 {strides = array<i32>} : memref<128x72xf32, #tpu.memory_space<vmem>>, vector<128x8xf32>,
    %c0_134 = arith.constant 0 : index
    %c0_135 = arith.constant 0 : index
    %c1_136 = arith.constant 1 : index
    %c0_137 = arith.constant 0 : index
    %79 = vector.load %arg16[%c0_134, %c0_135, %c1_136, %c0_137] : memref<2x10x10x8xf32, #tpu.memory_space<vmem>>, vector<2x8x8x8xf32>
    %80 = vector.shape_cast %79 : vector<2x8x8x8xf32> to vector<128x8xf32>
    %c0_138 = arith.constant 0 : index
    %c8_139 = arith.constant 8 : index
    %81 = vector.load %arg17[%c0_138, %c8_139] : memref<128x72xf32, #tpu.memory_space<vmem>>, vector<128x8xf32>
    tpu.vector_store %arg17[%c0_138, %c8_139], %80 {strides = array<i32>} : memref<128x72xf32, #tpu.memory_space<vmem>>, vector<128x8xf32>,
    %c0_140 = arith.constant 0 : index
    %c0_141 = arith.constant 0 : index
    %c2_142 = arith.constant 2 : index
    %c0_143 = arith.constant 0 : index
    %82 = vector.load %arg16[%c0_140, %c0_141, %c2_142, %c0_143] : memref<2x10x10x8xf32, #tpu.memory_space<vmem>>, vector<2x8x8x8xf32>
    %83 = vector.shape_cast %82 : vector<2x8x8x8xf32> to vector<128x8xf32>
    %c0_144 = arith.constant 0 : index
    %c16_145 = arith.constant 16 : index
    %84 = vector.load %arg17[%c0_144, %c16_145] : memref<128x72xf32, #tpu.memory_space<vmem>>, vector<128x8xf32>
    tpu.vector_store %arg17[%c0_144, %c16_145], %83 {strides = array<i32>} : memref<128x72xf32, #tpu.memory_space<vmem>>, vector<128x8xf32>,
    %c0_146 = arith.constant 0 : index
    %c1_147 = arith.constant 1 : index
    %c0_148 = arith.constant 0 : index
    %c0_149 = arith.constant 0 : index
    %85 = vector.load %arg16[%c0_146, %c1_147, %c0_148, %c0_149] : memref<2x10x10x8xf32, #tpu.memory_space<vmem>>, vector<2x8x8x8xf32>
    %86 = vector.shape_cast %85 : vector<2x8x8x8xf32> to vector<128x8xf32>
    %c0_150 = arith.constant 0 : index
    %c24_151 = arith.constant 24 : index
    %87 = vector.load %arg17[%c0_150, %c24_151] : memref<128x72xf32, #tpu.memory_space<vmem>>, vector<128x8xf32>
    tpu.vector_store %arg17[%c0_150, %c24_151], %86 {strides = array<i32>} : memref<128x72xf32, #tpu.memory_space<vmem>>, vector<128x8xf32>,
    %c0_152 = arith.constant 0 : index
    %c1_153 = arith.constant 1 : index
    %c1_154 = arith.constant 1 : index
    %c0_155 = arith.constant 0 : index
    %88 = vector.load %arg16[%c0_152, %c1_153, %c1_154, %c0_155] : memref<2x10x10x8xf32, #tpu.memory_space<vmem>>, vector<2x8x8x8xf32>
    %89 = vector.shape_cast %88 : vector<2x8x8x8xf32> to vector<128x8xf32>
    %c0_156 = arith.constant 0 : index
    %c32_157 = arith.constant 32 : index
    %90 = vector.load %arg17[%c0_156, %c32_157] : memref<128x72xf32, #tpu.memory_space<vmem>>, vector<128x8xf32>
    tpu.vector_store %arg17[%c0_156, %c32_157], %89 {strides = array<i32>} : memref<128x72xf32, #tpu.memory_space<vmem>>, vector<128x8xf32>,
    %c0_158 = arith.constant 0 : index
    %c1_159 = arith.constant 1 : index
    %c2_160 = arith.constant 2 : index
    %c0_161 = arith.constant 0 : index
    %91 = vector.load %arg16[%c0_158, %c1_159, %c2_160, %c0_161] : memref<2x10x10x8xf32, #tpu.memory_space<vmem>>, vector<2x8x8x8xf32>
    %92 = vector.shape_cast %91 : vector<2x8x8x8xf32> to vector<128x8xf32>
    %c0_162 = arith.constant 0 : index
    %c40_163 = arith.constant 40 : index
    %93 = vector.load %arg17[%c0_162, %c40_163] : memref<128x72xf32, #tpu.memory_space<vmem>>, vector<128x8xf32>
    tpu.vector_store %arg17[%c0_162, %c40_163], %92 {strides = array<i32>} : memref<128x72xf32, #tpu.memory_space<vmem>>, vector<128x8xf32>,
    %c0_164 = arith.constant 0 : index
    %c2_165 = arith.constant 2 : index
    %c0_166 = arith.constant 0 : index
    %c0_167 = arith.constant 0 : index
    %94 = vector.load %arg16[%c0_164, %c2_165, %c0_166, %c0_167] : memref<2x10x10x8xf32, #tpu.memory_space<vmem>>, vector<2x8x8x8xf32>
    %95 = vector.shape_cast %94 : vector<2x8x8x8xf32> to vector<128x8xf32>
    %c0_168 = arith.constant 0 : index
    %c48_169 = arith.constant 48 : index
    %96 = vector.load %arg17[%c0_168, %c48_169] : memref<128x72xf32, #tpu.memory_space<vmem>>, vector<128x8xf32>
    tpu.vector_store %arg17[%c0_168, %c48_169], %95 {strides = array<i32>} : memref<128x72xf32, #tpu.memory_space<vmem>>, vector<128x8xf32>,
    %c0_170 = arith.constant 0 : index
    %c2_171 = arith.constant 2 : index
    %c1_172 = arith.constant 1 : index
    %c0_173 = arith.constant 0 : index
    %97 = vector.load %arg16[%c0_170, %c2_171, %c1_172, %c0_173] : memref<2x10x10x8xf32, #tpu.memory_space<vmem>>, vector<2x8x8x8xf32>
    %98 = vector.shape_cast %97 : vector<2x8x8x8xf32> to vector<128x8xf32>
    %c0_174 = arith.constant 0 : index
    %c56_175 = arith.constant 56 : index
    %99 = vector.load %arg17[%c0_174, %c56_175] : memref<128x72xf32, #tpu.memory_space<vmem>>, vector<128x8xf32>
    tpu.vector_store %arg17[%c0_174, %c56_175], %98 {strides = array<i32>} : memref<128x72xf32, #tpu.memory_space<vmem>>, vector<128x8xf32>,
    %c0_176 = arith.constant 0 : index
    %c2_177 = arith.constant 2 : index
    %c2_178 = arith.constant 2 : index
    %c0_179 = arith.constant 0 : index
    %100 = vector.load %arg16[%c0_176, %c2_177, %c2_178, %c0_179] : memref<2x10x10x8xf32, #tpu.memory_space<vmem>>, vector<2x8x8x8xf32>
    %101 = vector.shape_cast %100 : vector<2x8x8x8xf32> to vector<128x8xf32>
    %c0_180 = arith.constant 0 : index
    %c64_181 = arith.constant 64 : index
    %102 = vector.load %arg17[%c0_180, %c64_181] : memref<128x72xf32, #tpu.memory_space<vmem>>, vector<128x8xf32>
    tpu.vector_store %arg17[%c0_180, %c64_181], %101 {strides = array<i32>} : memref<128x72xf32, #tpu.memory_space<vmem>>, vector<128x8xf32>,
    %c0_182 = arith.constant 0 : index
    %c0_183 = arith.constant 0 : index
    %103 = vector.load %arg17[%c0_182, %c0_183] : memref<128x72xf32, #tpu.memory_space<vmem>>, vector<128x72xf32>
    %c0_184 = arith.constant 0 : index
    %c0_185 = arith.constant 0 : index
    %104 = vector.load %arg5[%c0_184, %c0_185] : memref<72x8xf32, #tpu.memory_space<vmem>>, vector<72x8xf32>
    %cst_186 = arith.constant dense<0.000000e+00> : vector<128x8xf32>
    %105 = tpu.matmul %103, %104, %cst_186 {dimension_numbers = #tpu.dot_dimension_numbers<[1], [0], [0], [1], [0, 0, 1, 1], [], []>} : vector<128x72xf32>, vector<72x8xf32>, vector<128x8xf32> -> vector<128x8xf32>
    %c0_187 = arith.constant 0 : index
    %c0_188 = arith.constant 0 : index
    %106 = vector.load %arg6[%c0_187, %c0_188] : memref<1x8xf32, #tpu.memory_space<vmem>>, vector<1x8xf32>
    %107 = vector.broadcast %106 : vector<1x8xf32> to vector<128x8xf32>
    %108 = arith.addf %105, %107 : vector<128x8xf32>
    %cst_189 = arith.constant 0.000000e+00 : f32
    %109 = vector.broadcast %cst_189 : f32 to vector<128x8xf32>
    %110 = arith.maximumf %108, %109 : vector<128x8xf32>
    %c0_190 = arith.constant 0 : index
    %c0_191 = arith.constant 0 : index
    %111 = vector.load %arg7[%c0_190, %c0_191] : memref<8x3xf32, #tpu.memory_space<vmem>>, vector<8x3xf32>
    %cst_192 = arith.constant dense<0.000000e+00> : vector<128x3xf32>
    %112 = tpu.matmul %110, %111, %cst_192 {dimension_numbers = #tpu.dot_dimension_numbers<[1], [0], [0], [1], [0, 0, 1, 1], [], []>} : vector<128x8xf32>, vector<8x3xf32>, vector<128x3xf32> -> vector<128x3xf32>
    %c0_193 = arith.constant 0 : index
    %c0_194 = arith.constant 0 : index
    %113 = vector.load %arg8[%c0_193, %c0_194] : memref<1x3xf32, #tpu.memory_space<vmem>>, vector<1x3xf32>
    %114 = vector.broadcast %113 : vector<1x3xf32> to vector<128x3xf32>
    %115 = arith.addf %112, %114 : vector<128x3xf32>
    %116 = vector.extract_strided_slice %115 {offsets = [0, 0], sizes = [128, 1], strides = [1, 1]} : vector<128x3xf32> to vector<128x1xf32>
    %c0_195 = arith.constant 0 : index
    %c0_196 = arith.constant 0 : index
    %117 = vector.load %arg9[%c0_195, %c0_196] : memref<128x3xf32, #tpu.memory_space<vmem>>, vector<128x3xf32>
    %118 = vector.broadcast %116 : vector<128x1xf32> to vector<128x3xf32>
    %119 = arith.mulf %118, %117 : vector<128x3xf32>
    %120 = vector.extract_strided_slice %115 {offsets = [0, 1], sizes = [128, 1], strides = [1, 1]} : vector<128x3xf32> to vector<128x1xf32>
    %c0_197 = arith.constant 0 : index
    %c0_198 = arith.constant 0 : index
    %121 = vector.load %arg10[%c0_197, %c0_198] : memref<128x3xf32, #tpu.memory_space<vmem>>, vector<128x3xf32>
    %122 = vector.broadcast %120 : vector<128x1xf32> to vector<128x3xf32>
    %123 = arith.mulf %122, %121 : vector<128x3xf32>
    %124 = arith.addf %119, %123 : vector<128x3xf32>
    %125 = vector.extract_strided_slice %115 {offsets = [0, 2], sizes = [128, 1], strides = [1, 1]} : vector<128x3xf32> to vector<128x1xf32>
    %c0_199 = arith.constant 0 : index
    %c0_200 = arith.constant 0 : index
    %126 = vector.load %arg11[%c0_199, %c0_200] : memref<128x3xf32, #tpu.memory_space<vmem>>, vector<128x3xf32>
    %127 = vector.broadcast %125 : vector<128x1xf32> to vector<128x3xf32>
    %128 = arith.mulf %127, %126 : vector<128x3xf32>
    %129 = arith.addf %124, %128 : vector<128x3xf32>
    %c0_201 = arith.constant 0 : index
    %c0_202 = arith.constant 0 : index
    %130 = vector.load %arg13[%c0_201, %c0_202] : memref<2x128xf32, #tpu.memory_space<vmem>>, vector<2x128xf32>
    %cst_203 = arith.constant dense<0.000000e+00> : vector<2x3xf32>
    %131 = tpu.matmul %130, %129, %cst_203 {dimension_numbers = #tpu.dot_dimension_numbers<[1], [0], [0], [1], [0, 0, 1, 1], [], []>} : vector<2x128xf32>, vector<128x3xf32>, vector<2x3xf32> -> vector<2x3xf32>
    %c0_204 = arith.constant 0 : index
    %c0_205 = arith.constant 0 : index
    %132 = vector.load %arg12[%c0_204, %c0_205] : memref<1x3xf32, #tpu.memory_space<vmem>>, vector<1x3xf32>
    %133 = vector.broadcast %132 : vector<1x3xf32> to vector<2x3xf32>
    %134 = arith.addf %131, %133 : vector<2x3xf32>
    %135 = vector.extract_strided_slice %134 {offsets = [0, 0], sizes = [2, 2], strides = [1, 1]} : vector<2x3xf32> to vector<2x2xf32>
    %cst_206 = arith.constant dense<0xFF800000> : vector<2xf32>
    %136 = vector.multi_reduction <maximumf>, %135, %cst_206 [1] : vector<2x2xf32> to vector<2xf32>
    %137 = vector.shape_cast %136 : vector<2xf32> to vector<2x1xf32>
    %138 = vector.broadcast %137 : vector<2x1xf32> to vector<2x2xf32>
    %139 = arith.subf %135, %138 : vector<2x2xf32>
    %140 = math.exp %139 : vector<2x2xf32>
    %cst_207 = arith.constant dense<0.000000e+00> : vector<2xf32>
    %141 = vector.multi_reduction <add>, %140, %cst_207 [1] : vector<2x2xf32> to vector<2xf32>
    %142 = vector.shape_cast %141 : vector<2xf32> to vector<2x1xf32>
    %143 = vector.broadcast %142 : vector<2x1xf32> to vector<2x2xf32>
    %144 = arith.divf %140, %143 : vector<2x2xf32>
    %c0_208 = arith.constant 0 : index
    %c0_209 = arith.constant 0 : index
    %145 = vector.load %arg14[%c0_208, %c0_209] : memref<2x2xf32, #tpu.memory_space<vmem>>, vector<2x2xf32>
    tpu.vector_store %arg14[%c0_208, %c0_209], %144 {strides = array<i32>} : memref<2x2xf32, #tpu.memory_space<vmem>>, vector<2x2xf32>,
    %146 = vector.extract_strided_slice %134 {offsets = [0, 2], sizes = [2, 1], strides = [1, 1]} : vector<2x3xf32> to vector<2x1xf32>
    %147 = math.tanh %146 : vector<2x1xf32>
    %c0_210 = arith.constant 0 : index
    %c0_211 = arith.constant 0 : index
    %148 = vector.load %arg15[%c0_210, %c0_211] : memref<2x1xf32, #tpu.memory_space<vmem>>, vector<2x1xf32>
    tpu.vector_store %arg15[%c0_210, %c0_211], %147 {strides = array<i32>} : memref<2x1xf32, #tpu.memory_space<vmem>>, vector<2x1xf32>,
    return
  }
}

</mosaic_0001>

<bundles_post_ra>
// kernel: tile.14
= control target key start
LH: loop header
LB: loop body
LE: loop exit
PB: predicated region body
PF: predicated region fallthrough
CT: control target
= control target key end

     0   :  { %s22_s0 = inlined_call_operand.vmem [shape: f32[64], index: 0, kind: input, shape index: {}]   ;;  %s23_s1 = inlined_call_operand.vmem [shape: f32[2,64], index: 1, kind: output, shape index: {}]  }
   0x1   :  { %v4_v0 = vld [vmem:[%s22_s0] ss:$0 sm:$0xff] }
   0x2   :  { %5 = vst [vmem:[%s23_s1] sm:$0x3] %v4_v0 }

// kernel: tile.0
= control target key start
LH: loop header
LB: loop body
LE: loop exit
PB: predicated region body
PF: predicated region fallthrough
CT: control target
= control target key end

     0   :  { %s707_s8 = smov 125   ;;  %s708_s9 = smov 126   ;;  %vm8_vm0 = vcmask 7168   ;;  %s1294_s0 = inlined_call_operand.vmem [shape: f32[2,64], index: 0, kind: input, shape index: {}]   ;;  %s1295_s1 = inlined_call_operand.vmem [shape: f32[128,1], index: 1, kind: output, shape index: {}]  }
   0x1   :  { %v5_v0 = vld [vmem:[%s1294_s0] sm:$0x3]  ;;  %s706_s0 = smov 127   ;;  %s709_s10 = smov 124  }
   0x2   :  { %6 = vst [vmem:[#allocation0] sm:$0x3] %v5_v0  ;;  %s710_s11 = smov 123   ;;  %s711_s12 = smov 122  }
   0x3   :  { %s712_s13 = smov 121   ;;  %s713_s14 = smov 120  }
   0x4   :  { %s714_s15 = smov 119   ;;  %s715_s16 = smov 118  }
   0x5   :  { %s716_s17 = smov 117   ;;  %s717_s18 = smov 116  }
   0x6   :  { %s718_s19 = smov 115   ;;  %s719_s20 = smov 114  }
   0x7   :  { %s720_s21 = smov 113   ;;  %s721_s22 = smov 112  }
   0x8   :  { %s722_s23 = smov 111   ;;  %s723_s24 = smov 110  }
   0x9   :  { %v12_v1 = vld [vmem:[#allocation0] sm:$0x3]   ;;  %s724_s25 = smov 109   ;;  %s725_s26 = smov 108  }
   0xa   :  { %v28_v2 = vld [vmem:[#allocation0] sm:$0x3]   ;;  %13 = vrot.lane.b32.xlu0 %v12_v1, %s706_s0  ;;  %s726_s27 = smov 107   ;;  %s727_s28 = smov 106  }
   0xb   :  { %29 = vrot.lane.b32.xlu1 %v28_v2, %s707_s8  ;;  %v20_v3 = vld [vmem:[#allocation0] sm:$0x3]   ;;  %s728_s29 = smov 105   ;;  %s729_s30 = smov 104  }
   0xc   :  { %v36_v4 = vld [vmem:[#allocation0] sm:$0x3]   ;;  %s730_s2 = smov 103   ;;  %s731_s3 = smov 102  }
   0xd   :  { %v44_v5 = vld [vmem:[#allocation0] sm:$0x3]   ;;  %s732_s4 = smov 101   ;;  %s733_s5 = smov 100  }
   0xe   :  { %21 = vrot.lane.b32.xlu0 %v20_v3, %s708_s9  ;;  %v52_v6 = vld [vmem:[#allocation0] sm:$0x3]   ;;  %s734_s6 = smov 99   ;;  %s735_s7 = smov 98  }
   0xf   :  { %37 = vrot.lane.b32.xlu1 %v36_v4, %s709_s10  ;;  %v60_v7 = vld [vmem:[#allocation0] sm:$0x3]   ;;  %s736_s0 = smov 97   ;;  %s737_s8 = smov 96  }
  0x10   :  { %v68_v8 = vld [vmem:[#allocation0] sm:$0x3]   ;;  %s738_s9 = smov 95   ;;  %s739_s10 = smov 94  }
  0x11   :  { %v76_v9 = vld [vmem:[#allocation0] sm:$0x3]  }
  0x12   :  { %45 = vrot.lane.b32.xlu0 %v44_v5, %s710_s11  ;;  %v84_v10 = vld [vmem:[#allocation0] sm:$0x3]   ;;  %s740_s11 = smov 93  }
  0x13   :  { %53 = vrot.lane.b32.xlu1 %v52_v6, %s711_s12  ;;  %v92_v11 = vld [vmem:[#allocation0] sm:$0x3]   ;;  %s741_s12 = smov 92  }
  0x14   :  { %v100_v12 = vld [vmem:[#allocation0] sm:$0x3]  }
  0x15   :  { %v108_v13 = vld [vmem:[#allocation0] sm:$0x3]  }
  0x16   :  { %61 = vrot.lane.b32.xlu0 %v60_v7, %s712_s13  ;;  %v116_v14 = vld [vmem:[#allocation0] sm:$0x3]   ;;  %s742_s13 = smov 91  }
  0x17   :  { %69 = vrot.lane.b32.xlu1 %v68_v8, %s713_s14  ;;  %v124_v15 = vld [vmem:[#allocation0] sm:$0x3]   ;;  %s743_s14 = smov 90  }
  0x18   :  { %v132_v16 = vld [vmem:[#allocation0] sm:$0x3]  }
  0x19   :  { %v140_v17 = vld [vmem:[#allocation0] sm:$0x3]  }
  0x1a   :  { %77 = vrot.lane.b32.xlu0 %v76_v9, %s714_s15  ;;  %v148_v18 = vld [vmem:[#allocation0] sm:$0x3]   ;;  %s744_s15 = smov 89  }
  0x1b   :  { %85 = vrot.lane.b32.xlu1 %v84_v10, %s715_s16  ;;  %v156_v19 = vld [vmem:[#allocation0] sm:$0x3]   ;;  %s745_s16 = smov 88  }
  0x1c   :  { %v164_v20 = vld [vmem:[#allocation0] sm:$0x3]  }
  0x1d   :  { %v172_v21 = vld [vmem:[#allocation0] sm:$0x3]  }
  0x1e   :  { %93 = vrot.lane.b32.xlu0 %v92_v11, %s716_s17  ;;  %v180_v22 = vld [vmem:[#allocation0] sm:$0x3]   ;;  %s746_s17 = smov 87  }
  0x1f   :  { %101 = vrot.lane.b32.xlu1 %v100_v12, %s717_s18  ;;  %v188_v23 = vld [vmem:[#allocation0] sm:$0x3]   ;;  %s747_s18 = smov 86  }
  0x20   :  { %v196_v24 = vld [vmem:[#allocation0] sm:$0x3]  }
  0x21   :  { %v204_v25 = vld [vmem:[#allocation0] sm:$0x3]  }
  0x22   :  { %109 = vrot.lane.b32.xlu0 %v108_v13, %s718_s19  ;;  %v212_v26 = vld [vmem:[#allocation0] sm:$0x3]   ;;  %s748_s19 = smov 85  }
  0x23   :  { %117 = vrot.lane.b32.xlu1 %v116_v14, %s719_s20  ;;  %v220_v27 = vld [vmem:[#allocation0] sm:$0x3]   ;;  %s749_s20 = smov 84  }
  0x24   :  { %v228_v28 = vld [vmem:[#allocation0] sm:$0x3]  }
  0x25   :  { %v236_v29 = vld [vmem:[#allocation0] sm:$0x3]  }
  0x26   :  { %125 = vrot.lane.b32.xlu0 %v124_v15, %s720_s21  ;;  %v244_v30 = vld [vmem:[#allocation0] sm:$0x3]   ;;  %s750_s21 = smov 83  }
  0x27   :  { %133 = vrot.lane.b32.xlu1 %v132_v16, %s721_s22  ;;  %v252_v31 = vld [vmem:[#allocation0] sm:$0x3]   ;;  %s751_s22 = smov 82  }
  0x28   :  { %v260_v32 = vld [vmem:[#allocation0] sm:$0x3]  }
  0x29   :  { %v268_v33 = vld [vmem:[#allocation0] sm:$0x3]  }
  0x2a   :  { %141 = vrot.lane.b32.xlu0 %v140_v17, %s722_s23  ;;  %v276_v34 = vld [vmem:[#allocation0] sm:$0x3]   ;;  %s752_s23 = smov 81  }
  0x2b   :  { %149 = vrot.lane.b32.xlu1 %v148_v18, %s723_s24  ;;  %v284_v35 = vld [vmem:[#allocation0] sm:$0x3]   ;;  %s753_s24 = smov 80  }
  0x2c   :  { %v292_v36 = vld [vmem:[#allocation0] sm:$0x3]  }
  0x2d   :  { %v300_v37 = vld [vmem:[#allocation0] sm:$0x3]  }
  0x2e   :  { %157 = vrot.lane.b32.xlu0 %v156_v19, %s724_s25  ;;  %v308_v38 = vld [vmem:[#allocation0] sm:$0x3]   ;;  %s754_s25 = smov 79  }
  0x2f   :  { %165 = vrot.lane.b32.xlu1 %v164_v20, %s725_s26  ;;  %v316_v39 = vld [vmem:[#allocation0] sm:$0x3]   ;;  %s755_s26 = smov 78  }
  0x30   :  { %v324_v40 = vld [vmem:[#allocation0] sm:$0x3]  }
  0x31   :  { %v332_v41 = vld [vmem:[#allocation0] sm:$0x3]  }
  0x32   :  { %173 = vrot.lane.b32.xlu0 %v172_v21, %s726_s27  ;;  %v340_v42 = vld [vmem:[#allocation0] sm:$0x3]   ;;  %s756_s27 = smov 77  }
  0x33   :  { %181 = vrot.lane.b32.xlu1 %v180_v22, %s727_s28  ;;  %v348_v43 = vld [vmem:[#allocation0] sm:$0x3]   ;;  %s757_s28 = smov 76  }
  0x34   :  { %v356_v44 = vld [vmem:[#allocation0] sm:$0x3]  }
  0x35   :  { %v364_v45 = vld [vmem:[#allocation0] sm:$0x3]  }
  0x36   :  { %189 = vrot.lane.b32.xlu0 %v188_v23, %s728_s29  ;;  %v372_v46 = vld [vmem:[#allocation0] sm:$0x3]   ;;  %s758_s29 = smov 75  }
  0x37   :  { %197 = vrot.lane.b32.xlu1 %v196_v24, %s729_s30  ;;  %v380_v47 = vld [vmem:[#allocation0] sm:$0x3]   ;;  %s759_s30 = smov 74  }
  0x38   :  { %v388_v48 = vld [vmem:[#allocation0] sm:$0x3]  }
  0x39   :  { %v396_v49 = vld [vmem:[#allocation0] sm:$0x3]  }
  0x3a   :  { %205 = vrot.lane.b32.xlu0 %v204_v25, %s730_s2  ;;  %v404_v50 = vld [vmem:[#allocation0] sm:$0x3]   ;;  %s760_s2 = smov 73  }
  0x3b   :  { %213 = vrot.lane.b32.xlu1 %v212_v26, %s731_s3  ;;  %v412_v51 = vld [vmem:[#allocation0] sm:$0x3]   ;;  %s761_s3 = smov 72  }
  0x3c   :  { %v420_v52 = vld [vmem:[#allocation0] sm:$0x3]  }
  0x3d   :  { %v428_v53 = vld [vmem:[#allocation0] sm:$0x3]  }
  0x3e   :  { %221 = vrot.lane.b32.xlu0 %v220_v27, %s732_s4  ;;  %v436_v54 = vld [vmem:[#allocation0] sm:$0x3]  }
  0x3f   :  { %229 = vrot.lane.b32.xlu1 %v228_v28, %s733_s5  ;;  %v444_v55 = vld [vmem:[#allocation0] sm:$0x3]  }
  0x40   :  { %v452_v56 = vld [vmem:[#allocation0] sm:$0x3]  }
  0x41   :  { %v460_v57 = vld [vmem:[#allocation0] sm:$0x3]  }
  0x42   :  { %237 = vrot.lane.b32.xlu0 %v236_v29, %s734_s6  ;;  %v468_v58 = vld [vmem:[#allocation0] sm:$0x3]  }
  0x43   :  { %245 = vrot.lane.b32.xlu1 %v244_v30, %s735_s7  ;;  %v7_v59 = vld [vmem:[#allocation0] sm:$0x3]  }
  0x44   :  { %9 = vst.msk [vmem:[%s1295_s1] sm:$0x1] %vm8_vm0, %v7_v59   ;;  %516 = vst.msk [vmem:[%s1295_s1 + $0x3f] sm:$0x2] %vm8_vm0, %v7_v59   ;;  %v476_v60 = vld [vmem:[#allocation0] sm:$0x3]  }
  0x45   :  { %v484_v61 = vld [vmem:[#allocation0] sm:$0x3]  }
  0x46   :  { %253 = vrot.lane.b32.xlu0 %v252_v31, %s736_s0  ;;  %s762_s0 = smov 71   ;;  %v492_v0 = vld [vmem:[#allocation0] sm:$0x3]  }
  0x47   :  { %261 = vrot.lane.b32.xlu1 %v260_v32, %s737_s8  ;;  %s763_s8 = smov 70   ;;  %v500_v1 = vld [vmem:[#allocation0] sm:$0x3]  }
  0x48   :  { %v508_v4 = vld [vmem:[#allocation0] sm:$0x3]  }
  0x4a   :  { %269 = vrot.lane.b32.xlu0 %v268_v33, %s738_s9 }
  0x4b   :  { %277 = vrot.lane.b32.xlu1 %v276_v34, %s739_s10 }
  0x4e   :  { %285 = vrot.lane.b32.xlu0 %v284_v35, %s740_s11 }
  0x4f   :  { %293 = vrot.lane.b32.xlu1 %v292_v36, %s741_s12 }
  0x52   :  { %301 = vrot.lane.b32.xlu0 %v300_v37, %s742_s13 }
  0x53   :  { %309 = vrot.lane.b32.xlu1 %v308_v38, %s743_s14 }
  0x56   :  { %317 = vrot.lane.b32.xlu0 %v316_v39, %s744_s15 }
  0x57   :  { %325 = vrot.lane.b32.xlu1 %v324_v40, %s745_s16 }
  0x5a   :  { %333 = vrot.lane.b32.xlu0 %v332_v41, %s746_s17  ;;  %s764_s17 = smov 69  }
  0x5b   :  { %341 = vrot.lane.b32.xlu1 %v340_v42, %s747_s18  ;;  %s765_s18 = smov 68  }
  0x5e   :  { %349 = vrot.lane.b32.xlu0 %v348_v43, %s748_s19 }
  0x5f   :  { %357 = vrot.lane.b32.xlu1 %v356_v44, %s749_s20 }
  0x62   :  { %365 = vrot.lane.b32.xlu0 %v364_v45, %s750_s21 }
  0x63   :  { %373 = vrot.lane.b32.xlu1 %v372_v46, %s751_s22 }
  0x66   :  { %381 = vrot.lane.b32.xlu0 %v380_v47, %s752_s23 }
  0x67   :  { %389 = vrot.lane.b32.xlu1 %v388_v48, %s753_s24 }
  0x6a   :  { %397 = vrot.lane.b32.xlu0 %v396_v49, %s754_s25 }
  0x6b   :  { %405 = vrot.lane.b32.xlu1 %v404_v50, %s755_s26 }
  0x6e   :  { %413 = vrot.lane.b32.xlu0 %v412_v51, %s756_s27  ;;  %s766_s27 = smov 67  }
  0x6f   :  { %421 = vrot.lane.b32.xlu1 %v420_v52, %s757_s28  ;;  %s767_s28 = smov 66  }
  0x72   :  { %429 = vrot.lane.b32.xlu0 %v428_v53, %s758_s29 }
  0x73   :  { %437 = vrot.lane.b32.xlu1 %v436_v54, %s759_s30 }
  0x76   :  { %445 = vrot.lane.b32.xlu0 %v444_v55, %s760_s2 }
  0x77   :  { %453 = vrot.lane.b32.xlu1 %v452_v56, %s761_s3 }
  0x7a   :  { %461 = vrot.lane.b32.xlu0 %v460_v57, %s762_s0  ;;  %s768_s0 = smov 65  }
  0x7b   :  { %469 = vrot.lane.b32.xlu1 %v468_v58, %s763_s8 }
  0x7c   :  { %v14_v62 = vpop.permute.xlu0 %13  }
  0x7d   :  { %v30_v63 = vpop.permute.xlu1 %29   ;;  %517 = vst.msk [vmem:[%s1295_s1 + $0x1] sm:$0x1] %vm8_vm0, %v14_v62   ;;  %518 = vst.msk [vmem:[%s1295_s1 + $0x40] sm:$0x2] %vm8_vm0, %v14_v62  }
  0x7e   :  { %521 = vst.msk [vmem:[%s1295_s1 + $0x3] sm:$0x1] %vm8_vm0, %v30_v63   ;;  %522 = vst.msk [vmem:[%s1295_s1 + $0x42] sm:$0x2] %vm8_vm0, %v30_v63   ;;  %477 = vrot.lane.b32.xlu0 %v476_v60, %s764_s17 }
  0x7f   :  { %485 = vrot.lane.b32.xlu1 %v484_v61, %s765_s18 }
  0x80   :  { %v22_v2 = vpop.permute.xlu0 %21  }
  0x81   :  { %v38_v3 = vpop.permute.xlu1 %37   ;;  %519 = vst.msk [vmem:[%s1295_s1 + $0x2] sm:$0x1] %vm8_vm0, %v22_v2   ;;  %520 = vst.msk [vmem:[%s1295_s1 + $0x41] sm:$0x2] %vm8_vm0, %v22_v2  }
  0x82   :  { %523 = vst.msk [vmem:[%s1295_s1 + $0x4] sm:$0x1] %vm8_vm0, %v38_v3   ;;  %524 = vst.msk [vmem:[%s1295_s1 + $0x43] sm:$0x2] %vm8_vm0, %v38_v3   ;;  %493 = vrot.lane.b32.xlu0 %v492_v0, %s766_s27 }
  0x83   :  { %501 = vrot.lane.b32.xlu1 %v500_v1, %s767_s28 }
  0x84   :  { %v46_v5 = vpop.permute.xlu0 %45  }
  0x85   :  { %v54_v6 = vpop.permute.xlu1 %53   ;;  %525 = vst.msk [vmem:[%s1295_s1 + $0x5] sm:$0x1] %vm8_vm0, %v46_v5   ;;  %526 = vst.msk [vmem:[%s1295_s1 + $0x44] sm:$0x2] %vm8_vm0, %v46_v5  }
  0x86   :  { %527 = vst.msk [vmem:[%s1295_s1 + $0x6] sm:$0x1] %vm8_vm0, %v54_v6   ;;  %528 = vst.msk [vmem:[%s1295_s1 + $0x45] sm:$0x2] %vm8_vm0, %v54_v6   ;;  %509 = vrot.lane.b32.xlu0 %v508_v4, %s768_s0 }
  0x88   :  { %v62_v7 = vpop.permute.xlu0 %61  }
  0x89   :  { %v70_v8 = vpop.permute.xlu1 %69   ;;  %529 = vst.msk [vmem:[%s1295_s1 + $0x7] sm:$0x1] %vm8_vm0, %v62_v7   ;;  %530 = vst.msk [vmem:[%s1295_s1 + $0x46] sm:$0x2] %vm8_vm0, %v62_v7  }
  0x8a   :  { %531 = vst.msk [vmem:[%s1295_s1 + $0x8] sm:$0x1] %vm8_vm0, %v70_v8   ;;  %532 = vst.msk [vmem:[%s1295_s1 + $0x47] sm:$0x2] %vm8_vm0, %v70_v8  }
  0x8c   :  { %v78_v9 = vpop.permute.xlu0 %77  }
  0x8d   :  { %v86_v10 = vpop.permute.xlu1 %85   ;;  %533 = vst.msk [vmem:[%s1295_s1 + $0x9] sm:$0x1] %vm8_vm0, %v78_v9   ;;  %534 = vst.msk [vmem:[%s1295_s1 + $0x48] sm:$0x2] %vm8_vm0, %v78_v9  }
  0x8e   :  { %535 = vst.msk [vmem:[%s1295_s1 + $0xa] sm:$0x1] %vm8_vm0, %v86_v10   ;;  %536 = vst.msk [vmem:[%s1295_s1 + $0x49] sm:$0x2] %vm8_vm0, %v86_v10  }
  0x90   :  { %v94_v11 = vpop.permute.xlu0 %93  }
  0x91   :  { %v102_v12 = vpop.permute.xlu1 %101   ;;  %537 = vst.msk [vmem:[%s1295_s1 + $0xb] sm:$0x1] %vm8_vm0, %v94_v11   ;;  %538 = vst.msk [vmem:[%s1295_s1 + $0x4a] sm:$0x2] %vm8_vm0, %v94_v11  }
  0x92   :  { %539 = vst.msk [vmem:[%s1295_s1 + $0xc] sm:$0x1] %vm8_vm0, %v102_v12   ;;  %540 = vst.msk [vmem:[%s1295_s1 + $0x4b] sm:$0x2] %vm8_vm0, %v102_v12  }
  0x94   :  { %v110_v13 = vpop.permute.xlu0 %109  }
  0x95   :  { %v118_v14 = vpop.permute.xlu1 %117   ;;  %541 = vst.msk [vmem:[%s1295_s1 + $0xd] sm:$0x1] %vm8_vm0, %v110_v13   ;;  %542 = vst.msk [vmem:[%s1295_s1 + $0x4c] sm:$0x2] %vm8_vm0, %v110_v13  }
  0x96   :  { %543 = vst.msk [vmem:[%s1295_s1 + $0xe] sm:$0x1] %vm8_vm0, %v118_v14   ;;  %544 = vst.msk [vmem:[%s1295_s1 + $0x4d] sm:$0x2] %vm8_vm0, %v118_v14  }
  0x98   :  { %v126_v15 = vpop.permute.xlu0 %125  }
  0x99   :  { %v134_v16 = vpop.permute.xlu1 %133   ;;  %545 = vst.msk [vmem:[%s1295_s1 + $0xf] sm:$0x1] %vm8_vm0, %v126_v15   ;;  %546 = vst.msk [vmem:[%s1295_s1 + $0x4e] sm:$0x2] %vm8_vm0, %v126_v15  }
  0x9a   :  { %547 = vst.msk [vmem:[%s1295_s1 + $0x10] sm:$0x1] %vm8_vm0, %v134_v16   ;;  %548 = vst.msk [vmem:[%s1295_s1 + $0x4f] sm:$0x2] %vm8_vm0, %v134_v16  }
  0x9c   :  { %v142_v17 = vpop.permute.xlu0 %141  }
  0x9d   :  { %v150_v18 = vpop.permute.xlu1 %149   ;;  %549 = vst.msk [vmem:[%s1295_s1 + $0x11] sm:$0x1] %vm8_vm0, %v142_v17   ;;  %550 = vst.msk [vmem:[%s1295_s1 + $0x50] sm:$0x2] %vm8_vm0, %v142_v17  }
  0x9e   :  { %551 = vst.msk [vmem:[%s1295_s1 + $0x12] sm:$0x1] %vm8_vm0, %v150_v18   ;;  %552 = vst.msk [vmem:[%s1295_s1 + $0x51] sm:$0x2] %vm8_vm0, %v150_v18  }
  0xa0   :  { %v158_v19 = vpop.permute.xlu0 %157  }
  0xa1   :  { %v166_v20 = vpop.permute.xlu1 %165   ;;  %553 = vst.msk [vmem:[%s1295_s1 + $0x13] sm:$0x1] %vm8_vm0, %v158_v19   ;;  %554 = vst.msk [vmem:[%s1295_s1 + $0x52] sm:$0x2] %vm8_vm0, %v158_v19  }
  0xa2   :  { %555 = vst.msk [vmem:[%s1295_s1 + $0x14] sm:$0x1] %vm8_vm0, %v166_v20   ;;  %556 = vst.msk [vmem:[%s1295_s1 + $0x53] sm:$0x2] %vm8_vm0, %v166_v20  }
  0xa4   :  { %v174_v21 = vpop.permute.xlu0 %173  }
  0xa5   :  { %v182_v22 = vpop.permute.xlu1 %181   ;;  %557 = vst.msk [vmem:[%s1295_s1 + $0x15] sm:$0x1] %vm8_vm0, %v174_v21   ;;  %558 = vst.msk [vmem:[%s1295_s1 + $0x54] sm:$0x2] %vm8_vm0, %v174_v21  }
  0xa6   :  { %559 = vst.msk [vmem:[%s1295_s1 + $0x16] sm:$0x1] %vm8_vm0, %v182_v22   ;;  %560 = vst.msk [vmem:[%s1295_s1 + $0x55] sm:$0x2] %vm8_vm0, %v182_v22  }
  0xa8   :  { %v190_v23 = vpop.permute.xlu0 %189  }
  0xa9   :  { %v198_v24 = vpop.permute.xlu1 %197   ;;  %561 = vst.msk [vmem:[%s1295_s1 + $0x17] sm:$0x1] %vm8_vm0, %v190_v23   ;;  %562 = vst.msk [vmem:[%s1295_s1 + $0x56] sm:$0x2] %vm8_vm0, %v190_v23  }
  0xaa   :  { %563 = vst.msk [vmem:[%s1295_s1 + $0x18] sm:$0x1] %vm8_vm0, %v198_v24   ;;  %564 = vst.msk [vmem:[%s1295_s1 + $0x57] sm:$0x2] %vm8_vm0, %v198_v24  }
  0xac   :  { %v206_v25 = vpop.permute.xlu0 %205  }
  0xad   :  { %v214_v26 = vpop.permute.xlu1 %213   ;;  %565 = vst.msk [vmem:[%s1295_s1 + $0x19] sm:$0x1] %vm8_vm0, %v206_v25   ;;  %566 = vst.msk [vmem:[%s1295_s1 + $0x58] sm:$0x2] %vm8_vm0, %v206_v25  }
  0xae   :  { %567 = vst.msk [vmem:[%s1295_s1 + $0x1a] sm:$0x1] %vm8_vm0, %v214_v26   ;;  %568 = vst.msk [vmem:[%s1295_s1 + $0x59] sm:$0x2] %vm8_vm0, %v214_v26  }
  0xb0   :  { %v222_v27 = vpop.permute.xlu0 %221  }
  0xb1   :  { %v230_v28 = vpop.permute.xlu1 %229   ;;  %569 = vst.msk [vmem:[%s1295_s1 + $0x1b] sm:$0x1] %vm8_vm0, %v222_v27   ;;  %570 = vst.msk [vmem:[%s1295_s1 + $0x5a] sm:$0x2] %vm8_vm0, %v222_v27  }
  0xb2   :  { %571 = vst.msk [vmem:[%s1295_s1 + $0x1c] sm:$0x1] %vm8_vm0, %v230_v28   ;;  %572 = vst.msk [vmem:[%s1295_s1 + $0x5b] sm:$0x2] %vm8_vm0, %v230_v28  }
  0xb4   :  { %v238_v29 = vpop.permute.xlu0 %237  }
  0xb5   :  { %v246_v30 = vpop.permute.xlu1 %245   ;;  %573 = vst.msk [vmem:[%s1295_s1 + $0x1d] sm:$0x1] %vm8_vm0, %v238_v29   ;;  %574 = vst.msk [vmem:[%s1295_s1 + $0x5c] sm:$0x2] %vm8_vm0, %v238_v29  }
  0xb6   :  { %575 = vst.msk [vmem:[%s1295_s1 + $0x1e] sm:$0x1] %vm8_vm0, %v246_v30   ;;  %576 = vst.msk [vmem:[%s1295_s1 + $0x5d] sm:$0x2] %vm8_vm0, %v246_v30  }
  0xb8   :  { %v254_v31 = vpop.permute.xlu0 %253  }
  0xb9   :  { %v262_v32 = vpop.permute.xlu1 %261   ;;  %577 = vst.msk [vmem:[%s1295_s1 + $0x1f] sm:$0x1] %vm8_vm0, %v254_v31   ;;  %578 = vst.msk [vmem:[%s1295_s1 + $0x5e] sm:$0x2] %vm8_vm0, %v254_v31  }
  0xba   :  { %579 = vst.msk [vmem:[%s1295_s1 + $0x20] sm:$0x1] %vm8_vm0, %v262_v32   ;;  %580 = vst.msk [vmem:[%s1295_s1 + $0x5f] sm:$0x2] %vm8_vm0, %v262_v32  }
  0xbc   :  { %v270_v33 = vpop.permute.xlu0 %269  }
  0xbd   :  { %v278_v34 = vpop.permute.xlu1 %277   ;;  %581 = vst.msk [vmem:[%s1295_s1 + $0x21] sm:$0x1] %vm8_vm0, %v270_v33   ;;  %582 = vst.msk [vmem:[%s1295_s1 + $0x60] sm:$0x2] %vm8_vm0, %v270_v33  }
  0xbe   :  { %583 = vst.msk [vmem:[%s1295_s1 + $0x22] sm:$0x1] %vm8_vm0, %v278_v34   ;;  %584 = vst.msk [vmem:[%s1295_s1 + $0x61] sm:$0x2] %vm8_vm0, %v278_v34  }
  0xc0   :  { %v286_v35 = vpop.permute.xlu0 %285  }
  0xc1   :  { %v294_v36 = vpop.permute.xlu1 %293   ;;  %585 = vst.msk [vmem:[%s1295_s1 + $0x23] sm:$0x1] %vm8_vm0, %v286_v35   ;;  %586 = vst.msk [vmem:[%s1295_s1 + $0x62] sm:$0x2] %vm8_vm0, %v286_v35  }
  0xc2   :  { %587 = vst.msk [vmem:[%s1295_s1 + $0x24] sm:$0x1] %vm8_vm0, %v294_v36   ;;  %588 = vst.msk [vmem:[%s1295_s1 + $0x63] sm:$0x2] %vm8_vm0, %v294_v36  }
  0xc4   :  { %v302_v37 = vpop.permute.xlu0 %301  }
  0xc5   :  { %v310_v38 = vpop.permute.xlu1 %309   ;;  %589 = vst.msk [vmem:[%s1295_s1 + $0x25] sm:$0x1] %vm8_vm0, %v302_v37   ;;  %590 = vst.msk [vmem:[%s1295_s1 + $0x64] sm:$0x2] %vm8_vm0, %v302_v37  }
  0xc6   :  { %591 = vst.msk [vmem:[%s1295_s1 + $0x26] sm:$0x1] %vm8_vm0, %v310_v38   ;;  %592 = vst.msk [vmem:[%s1295_s1 + $0x65] sm:$0x2] %vm8_vm0, %v310_v38  }
  0xc8   :  { %v318_v39 = vpop.permute.xlu0 %317  }
  0xc9   :  { %v326_v40 = vpop.permute.xlu1 %325   ;;  %593 = vst.msk [vmem:[%s1295_s1 + $0x27] sm:$0x1] %vm8_vm0, %v318_v39   ;;  %594 = vst.msk [vmem:[%s1295_s1 + $0x66] sm:$0x2] %vm8_vm0, %v318_v39  }
  0xca   :  { %595 = vst.msk [vmem:[%s1295_s1 + $0x28] sm:$0x1] %vm8_vm0, %v326_v40   ;;  %596 = vst.msk [vmem:[%s1295_s1 + $0x67] sm:$0x2] %vm8_vm0, %v326_v40  }
  0xcc   :  { %v334_v41 = vpop.permute.xlu0 %333  }
  0xcd   :  { %v342_v42 = vpop.permute.xlu1 %341   ;;  %597 = vst.msk [vmem:[%s1295_s1 + $0x29] sm:$0x1] %vm8_vm0, %v334_v41   ;;  %598 = vst.msk [vmem:[%s1295_s1 + $0x68] sm:$0x2] %vm8_vm0, %v334_v41  }
  0xce   :  { %599 = vst.msk [vmem:[%s1295_s1 + $0x2a] sm:$0x1] %vm8_vm0, %v342_v42   ;;  %600 = vst.msk [vmem:[%s1295_s1 + $0x69] sm:$0x2] %vm8_vm0, %v342_v42  }
  0xd0   :  { %v350_v43 = vpop.permute.xlu0 %349  }
  0xd1   :  { %v358_v44 = vpop.permute.xlu1 %357   ;;  %601 = vst.msk [vmem:[%s1295_s1 + $0x2b] sm:$0x1] %vm8_vm0, %v350_v43   ;;  %602 = vst.msk [vmem:[%s1295_s1 + $0x6a] sm:$0x2] %vm8_vm0, %v350_v43  }
  0xd2   :  { %603 = vst.msk [vmem:[%s1295_s1 + $0x2c] sm:$0x1] %vm8_vm0, %v358_v44   ;;  %604 = vst.msk [vmem:[%s1295_s1 + $0x6b] sm:$0x2] %vm8_vm0, %v358_v44  }
  0xd4   :  { %v366_v45 = vpop.permute.xlu0 %365  }
  0xd5   :  { %v374_v46 = vpop.permute.xlu1 %373   ;;  %605 = vst.msk [vmem:[%s1295_s1 + $0x2d] sm:$0x1] %vm8_vm0, %v366_v45   ;;  %606 = vst.msk [vmem:[%s1295_s1 + $0x6c] sm:$0x2] %vm8_vm0, %v366_v45  }
  0xd6   :  { %607 = vst.msk [vmem:[%s1295_s1 + $0x2e] sm:$0x1] %vm8_vm0, %v374_v46   ;;  %608 = vst.msk [vmem:[%s1295_s1 + $0x6d] sm:$0x2] %vm8_vm0, %v374_v46  }
  0xd8   :  { %v382_v47 = vpop.permute.xlu0 %381  }
  0xd9   :  { %v390_v48 = vpop.permute.xlu1 %389   ;;  %609 = vst.msk [vmem:[%s1295_s1 + $0x2f] sm:$0x1] %vm8_vm0, %v382_v47   ;;  %610 = vst.msk [vmem:[%s1295_s1 + $0x6e] sm:$0x2] %vm8_vm0, %v382_v47  }
  0xda   :  { %611 = vst.msk [vmem:[%s1295_s1 + $0x30] sm:$0x1] %vm8_vm0, %v390_v48   ;;  %612 = vst.msk [vmem:[%s1295_s1 + $0x6f] sm:$0x2] %vm8_vm0, %v390_v48  }
  0xdc   :  { %v398_v49 = vpop.permute.xlu0 %397  }
  0xdd   :  { %v406_v50 = vpop.permute.xlu1 %405   ;;  %613 = vst.msk [vmem:[%s1295_s1 + $0x31] sm:$0x1] %vm8_vm0, %v398_v49   ;;  %614 = vst.msk [vmem:[%s1295_s1 + $0x70] sm:$0x2] %vm8_vm0, %v398_v49  }
  0xde   :  { %615 = vst.msk [vmem:[%s1295_s1 + $0x32] sm:$0x1] %vm8_vm0, %v406_v50   ;;  %616 = vst.msk [vmem:[%s1295_s1 + $0x71] sm:$0x2] %vm8_vm0, %v406_v50  }
  0xe0   :  { %v414_v51 = vpop.permute.xlu0 %413  }
  0xe1   :  { %v422_v52 = vpop.permute.xlu1 %421   ;;  %617 = vst.msk [vmem:[%s1295_s1 + $0x33] sm:$0x1] %vm8_vm0, %v414_v51   ;;  %618 = vst.msk [vmem:[%s1295_s1 + $0x72] sm:$0x2] %vm8_vm0, %v414_v51  }
  0xe2   :  { %619 = vst.msk [vmem:[%s1295_s1 + $0x34] sm:$0x1] %vm8_vm0, %v422_v52   ;;  %620 = vst.msk [vmem:[%s1295_s1 + $0x73] sm:$0x2] %vm8_vm0, %v422_v52  }
  0xe4   :  { %v430_v53 = vpop.permute.xlu0 %429  }
  0xe5   :  { %v438_v54 = vpop.permute.xlu1 %437   ;;  %621 = vst.msk [vmem:[%s1295_s1 + $0x35] sm:$0x1] %vm8_vm0, %v430_v53   ;;  %622 = vst.msk [vmem:[%s1295_s1 + $0x74] sm:$0x2] %vm8_vm0, %v430_v53  }
  0xe6   :  { %623 = vst.msk [vmem:[%s1295_s1 + $0x36] sm:$0x1] %vm8_vm0, %v438_v54   ;;  %624 = vst.msk [vmem:[%s1295_s1 + $0x75] sm:$0x2] %vm8_vm0, %v438_v54  }
  0xe8   :  { %v446_v55 = vpop.permute.xlu0 %445  }
  0xe9   :  { %v454_v56 = vpop.permute.xlu1 %453   ;;  %625 = vst.msk [vmem:[%s1295_s1 + $0x37] sm:$0x1] %vm8_vm0, %v446_v55   ;;  %626 = vst.msk [vmem:[%s1295_s1 + $0x76] sm:$0x2] %vm8_vm0, %v446_v55  }
  0xea   :  { %627 = vst.msk [vmem:[%s1295_s1 + $0x38] sm:$0x1] %vm8_vm0, %v454_v56   ;;  %628 = vst.msk [vmem:[%s1295_s1 + $0x77] sm:$0x2] %vm8_vm0, %v454_v56  }
  0xec   :  { %v462_v57 = vpop.permute.xlu0 %461  }
  0xed   :  { %v470_v58 = vpop.permute.xlu1 %469   ;;  %629 = vst.msk [vmem:[%s1295_s1 + $0x39] sm:$0x1] %vm8_vm0, %v462_v57   ;;  %630 = vst.msk [vmem:[%s1295_s1 + $0x78] sm:$0x2] %vm8_vm0, %v462_v57  }
  0xee   :  { %631 = vst.msk [vmem:[%s1295_s1 + $0x3a] sm:$0x1] %vm8_vm0, %v470_v58   ;;  %632 = vst.msk [vmem:[%s1295_s1 + $0x79] sm:$0x2] %vm8_vm0, %v470_v58  }
  0xf0   :  { %v478_v59 = vpop.permute.xlu0 %477  }
  0xf1   :  { %v486_v60 = vpop.permute.xlu1 %485   ;;  %633 = vst.msk [vmem:[%s1295_s1 + $0x3b] sm:$0x1] %vm8_vm0, %v478_v59   ;;  %634 = vst.msk [vmem:[%s1295_s1 + $0x7a] sm:$0x2] %vm8_vm0, %v478_v59  }
  0xf2   :  { %635 = vst.msk [vmem:[%s1295_s1 + $0x3c] sm:$0x1] %vm8_vm0, %v486_v60   ;;  %636 = vst.msk [vmem:[%s1295_s1 + $0x7b] sm:$0x2] %vm8_vm0, %v486_v60  }
  0xf4   :  { %v494_v61 = vpop.permute.xlu0 %493  }
  0xf5   :  { %v502_v62 = vpop.permute.xlu1 %501   ;;  %637 = vst.msk [vmem:[%s1295_s1 + $0x3d] sm:$0x1] %vm8_vm0, %v494_v61   ;;  %638 = vst.msk [vmem:[%s1295_s1 + $0x7c] sm:$0x2] %vm8_vm0, %v494_v61  }
  0xf6   :  { %639 = vst.msk [vmem:[%s1295_s1 + $0x3e] sm:$0x1] %vm8_vm0, %v502_v62   ;;  %640 = vst.msk [vmem:[%s1295_s1 + $0x7d] sm:$0x2] %vm8_vm0, %v502_v62  }
  0xf8   :  { %v510_v63 = vpop.permute.xlu0 %509  }
  0xf9   :  { %641 = vst.msk [vmem:[%s1295_s1 + $0x3f] sm:$0x1] %vm8_vm0, %v510_v63   ;;  %642 = vst.msk [vmem:[%s1295_s1 + $0x7e] sm:$0x2] %vm8_vm0, %v510_v63  }

// kernel: policy_value_forward.1
= control target key start
LH: loop header
LB: loop body
LE: loop exit
PB: predicated region body
PF: predicated region fallthrough
CT: control target
= control target key end

     0   :  { %vm90_vm0 = vcmask 64512   ;;  %vm92_vm1 = vcmask 58368   ;;  %s4397_s17 = smov 16   ;;  %s4398_s18 = smov 8   ;;  %s6116_s0 = inlined_call_operand.vmem [shape: f32[2,10,10,8], index: 0, kind: input, shape index: {}]   ;;  %s6117_s1 = inlined_call_operand.vmem [shape: f32[72,8], index: 1, kind: input, shape index: {}]   ;;  %s6118_s2 = inlined_call_operand.vmem [shape: f32[1,8], index: 2, kind: input, shape index: {}]   ;;  %s6119_s3 = inlined_call_operand.vmem [shape: f32[72,8], index: 3, kind: input, shape index: {}]   ;;  %s6120_s4 = inlined_call_operand.vmem [shape: f32[1,8], index: 4, kind: input, shape index: {}]   ;;  %s6121_s5 = inlined_call_operand.vmem [shape: f32[72,8], index: 5, kind: input, shape index: {}]   ;;  %s6122_s6 = inlined_call_operand.vmem [shape: f32[1,8], index: 6, kind: input, shape index: {}]   ;;  %s6123_s7 = inlined_call_operand.vmem [shape: f32[8,3], index: 7, kind: input, shape index: {}]   ;;  %s6124_s8 = inlined_call_operand.vmem [shape: f32[1,3], index: 8, kind: input, shape index: {}]   ;;  %s6125_s9 = inlined_call_operand.vmem [shape: f32[128,3], index: 9, kind: input, shape index: {}]   ;;  %s6126_s10 = inlined_call_operand.vmem [shape: f32[128,3], index: 10, kind: input, shape index: {}]   ;;  %s6127_s11 = inlined_call_operand.vmem [shape: f32[128,3], index: 11, kind: input, shape index: {}]   ;;  %s6128_s12 = inlined_call_operand.vmem [shape: f32[1,3], index: 12, kind: input, shape index: {}]   ;;  %s6129_s13 = inlined_call_operand.vmem [shape: f32[2,128], index: 13, kind: input, shape index: {}]   ;;  %s6130_s14 = inlined_call_operand.hbm [shape: f32[2,2], index: 14, kind: output, shape index: {0}]   ;;  %s6131_s15 = inlined_call_operand.vmem [shape: f32[2,1], index: 15, kind: output, shape index: {1}]  }
   0x1   :  { %v50_v0 = vld [vmem:[%s6116_s0] sm:$0xff]  ;;  %v51_v1 = vld [vmem:[%s6116_s0 + $0x8] sm:$0x3]  ;;  %v52_v2 = vld [vmem:[%s6116_s0 + $0x10] sm:$0xff]  ;;  %s6132_s19 = smov 24  }
   0x2   :  { %91 = vst.msk [vmem:[#allocation2] sm:$0xff] %vm90_vm0, %v50_v0  ;;  %v53_v3 = vld [vmem:[%s6116_s0 + $0x18] sm:$0x3]  ;;  %v54_v4 = vld [vmem:[%s6116_s0 + $0x20] sm:$0xff]  ;;  %94 = vst.msk [vmem:[#allocation2 + $0x10] sm:$0xff] %vm90_vm0, %v52_v2 }
   0x3   :  { %93 = vst.msk [vmem:[#allocation2 + $0x8] sm:$0x3] %vm92_vm1, %v51_v1  ;;  %95 = vst.msk [vmem:[#allocation2 + $0x18] sm:$0x3] %vm92_vm1, %v53_v3  ;;  %v55_v5 = vld [vmem:[%s6116_s0 + $0x28] sm:$0x3] }
   0x4   :  { %96 = vst.msk [vmem:[#allocation2 + $0x20] sm:$0xff] %vm90_vm0, %v54_v4  ;;  %v56_v6 = vld [vmem:[%s6116_s0 + $0x30] sm:$0xff]  ;;  %v58_v7 = vld [vmem:[%s6116_s0 + $0x40] sm:$0xff]  ;;  %v57_v8 = vld [vmem:[%s6116_s0 + $0x38] sm:$0x3] }
   0x5   :  { %97 = vst.msk [vmem:[#allocation2 + $0x28] sm:$0x3] %vm92_vm1, %v55_v5  ;;  %v59_v9 = vld [vmem:[%s6116_s0 + $0x48] sm:$0x3]  ;;  %99 = vst.msk [vmem:[#allocation2 + $0x38] sm:$0x3] %vm92_vm1, %v57_v8 }
   0x6   :  { %98 = vst.msk [vmem:[#allocation2 + $0x30] sm:$0xff] %vm90_vm0, %v56_v6  ;;  %100 = vst.msk [vmem:[#allocation2 + $0x40] sm:$0xff] %vm90_vm0, %v58_v7  ;;  %v60_v10 = vld [vmem:[%s6116_s0 + $0x50] sm:$0xff]  ;;  %v61_v11 = vld [vmem:[%s6116_s0 + $0x58] sm:$0x3] }
   0x7   :  { %101 = vst.msk [vmem:[#allocation2 + $0x48] sm:$0x3] %vm92_vm1, %v59_v9  ;;  %v62_v12 = vld [vmem:[%s6116_s0 + $0x60] sm:$0xff]  ;;  %103 = vst.msk [vmem:[#allocation2 + $0x58] sm:$0x3] %vm92_vm1, %v61_v11  ;;  %v64_v14 = vld [vmem:[%s6116_s0 + $0x70] sm:$0xff] }
   0x8   :  { %102 = vst.msk [vmem:[#allocation2 + $0x50] sm:$0xff] %vm90_vm0, %v60_v10  ;;  %104 = vst.msk [vmem:[#allocation2 + $0x60] sm:$0xff] %vm90_vm0, %v62_v12  ;;  %v63_v13 = vld [vmem:[%s6116_s0 + $0x68] sm:$0x3]  ;;  %v65_v15 = vld [vmem:[%s6116_s0 + $0x78] sm:$0x3] }
   0x9   :  { %105 = vst.msk [vmem:[#allocation2 + $0x68] sm:$0x3] %vm92_vm1, %v63_v13  ;;  %107 = vst.msk [vmem:[#allocation2 + $0x78] sm:$0x3] %vm92_vm1, %v65_v15  ;;  %v66_v16 = vld [vmem:[%s6116_s0 + $0x80] sm:$0xff]  ;;  %v72_v20 = vld [vmem:[%s6116_s0 + $0xb0] sm:$0xff] }
   0xa   :  { %106 = vst.msk [vmem:[#allocation2 + $0x70] sm:$0xff] %vm90_vm0, %v64_v14  ;;  %v67_v17 = vld [vmem:[%s6116_s0 + $0x88] sm:$0x3]  ;;  %v70_v18 = vld [vmem:[%s6116_s0 + $0xa0] sm:$0xff]  ;;  %108 = vst.msk [vmem:[#allocation2 + $0x80] sm:$0xff] %vm90_vm0, %v66_v16 }
   0xb   :  { %109 = vst.msk [vmem:[#allocation2 + $0x88] sm:$0x3] %vm92_vm1, %v67_v17  ;;  %v71_v19 = vld [vmem:[%s6116_s0 + $0xa8] sm:$0x3]  ;;  %v73_v21 = vld [vmem:[%s6116_s0 + $0xb8] sm:$0x3] }
   0xc   :  { %112 = vst.msk [vmem:[#allocation2 + $0xa0] sm:$0xff] %vm90_vm0, %v70_v18  ;;  %v261_v22 = vld [vmem:[#allocation2 + $0x2] sm:$0xff]  ;;  %114 = vst.msk [vmem:[#allocation2 + $0xb0] sm:$0xff] %vm90_vm0, %v72_v20  ;;  %v262_v26 = vld [vmem:[#allocation2 + $0x12] sm:$0xff] }
   0xd   :  { %v164_v23 = vld [vmem:[#allocation2 + $0x1] sm:$0xff]  ;;  %113 = vst.msk [vmem:[#allocation2 + $0xa8] sm:$0x3] %vm92_vm1, %v71_v19  ;;  %115 = vst.msk [vmem:[#allocation2 + $0xb8] sm:$0x3] %vm92_vm1, %v73_v21  ;;  %293 = vrot.lane.b32.xlu1 %v261_v22, %s4397_s17  ;;  %v165_v27 = vld [vmem:[#allocation2 + $0x11] sm:$0xff] }
   0xe   :  { %v132_v24 = vld [vmem:[#allocation2] sm:$0xff]  ;;  %196 = vrot.lane.b32.xlu0 %v164_v23, %s4398_s18  ;;  %v359_v28 = vld [vmem:[#allocation2 + $0x10] sm:$0xff]  ;;  %v69_v38 = vld [vmem:[%s6116_s0 + $0x98] sm:$0x3] }
   0xf   :  { %v360_v25 = vld [vmem:[#allocation2 + $0x20] sm:$0xff]  ;;  %148 = vst.msk [vmem:[#allocation3] sm:$0xff] %vm90_vm0, %v132_v24  ;;  %v4584_v29 = vld [vmem:[#allocation2 + $0x30] sm:$0xff]  ;;  %149 = vst.msk [vmem:[#allocation3 + $0x8] sm:$0xff] %vm90_vm0, %v359_v28 }
  0x10   :  { %150 = vst.msk [vmem:[#allocation3 + $0x10] sm:$0xff] %vm90_vm0, %v360_v25  ;;  %v4587_v30 = vld [vmem:[#allocation2 + $0x40] sm:$0xff]  ;;  %151 = vst.msk [vmem:[#allocation3 + $0x18] sm:$0xff] %vm90_vm0, %v4584_v29  ;;  %v4593_v31 = vld [vmem:[#allocation2 + $0x50] sm:$0xff] }
  0x11   :  { %295 = vrot.lane.b32.xlu1 %v262_v26, %s4397_s17  ;;  %152 = vst.msk [vmem:[#allocation3 + $0x20] sm:$0xff] %vm90_vm0, %v4587_v30  ;;  %v4597_v32 = vld [vmem:[#allocation2 + $0x60] sm:$0xff]  ;;  %153 = vst.msk [vmem:[#allocation3 + $0x28] sm:$0xff] %vm90_vm0, %v4593_v31  ;;  %v4601_v33 = vld [vmem:[#allocation2 + $0x70] sm:$0xff] }
  0x12   :  { %198 = vrot.lane.b32.xlu0 %v165_v27, %s4398_s18  ;;  %154 = vst.msk [vmem:[#allocation3 + $0x30] sm:$0xff] %vm90_vm0, %v4597_v32  ;;  %155 = vst.msk [vmem:[#allocation3 + $0x38] sm:$0xff] %vm90_vm0, %v4601_v33  ;;  %v166_v34 = vld [vmem:[#allocation2 + $0x21] sm:$0xff]  ;;  %v68_v36 = vld [vmem:[%s6116_s0 + $0x90] sm:$0xff] }
  0x13   :  { %v4609_v35 = vld [vmem:[#allocation2 + $0xb0] sm:$0xff]  ;;  %110 = vst.msk [vmem:[#allocation2 + $0x90] sm:$0xff] %vm90_vm0, %v68_v36  ;;  %v74_v37 = vld [vmem:[%s6116_s0 + $0xc0] sm:$0xff]  ;;  %v75_v39 = vld [vmem:[%s6116_s0 + $0xc8] sm:$0x3] }
  0x14   :  { %157 = vst.msk [vmem:[#allocation3 + $0x48] sm:$0xff] %vm90_vm0, %v4609_v35  ;;  %116 = vst.msk [vmem:[#allocation2 + $0xc0] sm:$0xff] %vm90_vm0, %v74_v37  ;;  %v76_v40 = vld [vmem:[%s6116_s0 + $0xd0] sm:$0xff]  ;;  %v77_v41 = vld [vmem:[%s6116_s0 + $0xd8] sm:$0x3] }
  0x15   :  { %393 = vrot.lane.b32.xlu1 %v360_v25, %s6132_s19  ;;  %111 = vst.msk [vmem:[#allocation2 + $0x98] sm:$0x3] %vm92_vm1, %v69_v38  ;;  %117 = vst.msk [vmem:[#allocation2 + $0xc8] sm:$0x3] %vm92_vm1, %v75_v39 }
  0x16   :  { %391 = vrot.lane.b32.xlu0 %v359_v28, %s6132_s19 }
  0x17   :  { %21 = vsyncpa [#allocation5], 0  ;;  %s4400_s20 = smov 32   ;;  %118 = vst.msk [vmem:[#allocation2 + $0xd0] sm:$0xff] %vm90_vm0, %v76_v40  ;;  %s4401_s21 = smov 40   ;;  %v263_v42 = vld [vmem:[#allocation2 + $0x22] sm:$0xff] }
  0x18   :  { %119 = vst.msk [vmem:[#allocation2 + $0xd8] sm:$0x3] %vm92_vm1, %v77_v41  ;;  %v167_v43 = vld [vmem:[#allocation2 + $0x31] sm:$0xff]  ;;  %s4402_s22 = smov 48   ;;  %v966_v45 = vld [vmem:[%s6117_s1 + $0x40] sm:$0xff]  ;;  %v963_v51 = vld [vmem:[%s6117_s1 + $0x28] sm:$0xff] }
  0x19   :  { %200 = vrot.lane.b32.xlu1 %v166_v34, %s4398_s18  ;;  %v264_v46 = vld [vmem:[#allocation2 + $0x32] sm:$0xff]  ;;  %4129 = vmatprep.subr.mxu0 %v966_v45  ;;  %v78_v49 = vld [vmem:[%s6116_s0 + $0xe0] sm:$0xff]  ;;  %s4403_s24 = smov 56   ;;  %v79_v55 = vld [vmem:[%s6116_s0 + $0xe8] sm:$0x3]  ;;  %s4404_s25 = smov 64  }
  0x1a   :  { %488 = vrot.lane.b32.xlu0 %v165_v27, %s4400_s20  ;;  %4130 = vmatpush3.msra.mxu0 %v966_v45  ;;  %v965_v47 = vld [vmem:[%s6117_s1 + $0x38] sm:$0xff]  ;;  %v964_v50 = vld [vmem:[%s6117_s1 + $0x30] sm:$0xff]  ;;  %120 = vst.msk [vmem:[#allocation2 + $0xe0] sm:$0xff] %vm90_vm0, %v78_v49  ;;  %v962_v52 = vld [vmem:[%s6117_s1 + $0x20] sm:$0xff]  ;;  %s6134_s26 = smov 24   ;;  %vm244_vm2 = vcmask 130112  }
  0x1b   :  { %v4641_v44 = vld [vmem:[#allocation2 + $0xc0] sm:$0xff]  ;;  %4131 = vmatprep.subr.mxu0 %v965_v47  ;;  %v961_v53 = vld [vmem:[%s6117_s1 + $0x18] sm:$0xff]  ;;  %121 = vst.msk [vmem:[#allocation2 + $0xe8] sm:$0x3] %vm92_vm1, %v79_v55  ;;  %v960_v56 = vld [vmem:[%s6117_s1 + $0x10] sm:$0xff]  ;;  %vm341_vm3 = vcmask 195712  }
  0x1c   :  { %158 = vst.msk [vmem:[#allocation3 + $0x50] sm:$0xff] %vm90_vm0, %v4641_v44  ;;  %4132 = vmatpush3.msra.mxu0 %v965_v47  ;;  %v959_v57 = vld [vmem:[%s6117_s1 + $0x8] sm:$0xff]  ;;  %v958_v59 = vld [vmem:[%s6117_s1] sm:$0xff]  ;;  %v80_v60 = vld [vmem:[%s6116_s0 + $0xf0] sm:$0xff]  ;;  %vm439_vm4 = vcmask 261312   ;;  %vm536_vm5 = vcmask 326912  }
  0x1d   :  { %585 = vrot.lane.b32.xlu1 %v262_v26, %s4401_s21  ;;  %4133 = vmatprep.subr.mxu0 %v964_v50  ;;  %v459_v58 = vld [vmem:[#allocation2 + $0x41] sm:$0xff]  ;;  %v81_v61 = vld [vmem:[%s6116_s0 + $0xf8] sm:$0x3]  ;;  %122 = vst.msk [vmem:[#allocation2 + $0xf0] sm:$0xff] %vm90_vm0, %v80_v60  ;;  %v84_v6 = vld [vmem:[%s6116_s0 + $0x110] sm:$0xff]  ;;  %vm633_vm6 = vcmask 392512  }
  0x1e   :  { %490 = vrot.lane.b32.xlu0 %v166_v34, %s4400_s20  ;;  %v4655_v48 = vld [vmem:[#allocation2 + $0xd0] sm:$0xff]  ;;  %4134 = vmatpush3.msra.mxu0 %v964_v50  ;;  %123 = vst.msk [vmem:[#allocation2 + $0xf8] sm:$0x3] %vm92_vm1, %v81_v61  ;;  %v265_v62 = vld [vmem:[#allocation2 + $0x42] sm:$0xff]  ;;  %v85_v7 = vld [vmem:[%s6116_s0 + $0x118] sm:$0x3] }
  0x1f   :  { %159 = vst.msk [vmem:[#allocation3 + $0x58] sm:$0xff] %vm90_vm0, %v4655_v48  ;;  %4135 = vmatprep.subr.mxu0 %v963_v51  ;;  %v169_v63 = vld [vmem:[#allocation2 + $0x51] sm:$0xff]  ;;  %v82_v2 = vld [vmem:[%s6116_s0 + $0x100] sm:$0xff]  ;;  %v83_v4 = vld [vmem:[%s6116_s0 + $0x108] sm:$0x3]  ;;  %vm731_vm7 = vcmask 458112  }
  0x20   :  { %4136 = vmatpush3.msra.mxu0 %v963_v51  ;;  %v266_v0 = vld [vmem:[#allocation2 + $0x52] sm:$0xff]  ;;  %124 = vst.msk [vmem:[#allocation2 + $0x100] sm:$0xff] %vm90_vm0, %v82_v2  ;;  %v461_v5 = vld [vmem:[#allocation2 + $0x61] sm:$0xff]  ;;  %126 = vst.msk [vmem:[#allocation2 + $0x110] sm:$0xff] %vm90_vm0, %v84_v6  ;;  %vm828_vm8 = vcmask 523712   ;;  %vm925_vm9 = vcmask 589312  }
  0x21   :  { %297 = vrot.lane.b32.xlu1 %v263_v42, %s4397_s17  ;;  %4137 = vmatprep.subr.mxu0 %v962_v52  ;;  %v4681_v54 = vld [vmem:[#allocation2 + $0xe0] sm:$0xff]  ;;  %125 = vst.msk [vmem:[#allocation2 + $0x108] sm:$0x3] %vm92_vm1, %v83_v4  ;;  %127 = vst.msk [vmem:[#allocation2 + $0x118] sm:$0x3] %vm92_vm1, %v85_v7  ;;  %v171_v9 = vld [vmem:[#allocation2 + $0x71] sm:$0xff] }
  0x22   :  { %202 = vrot.lane.b32.xlu0 %v167_v43, %s4398_s18  ;;  %160 = vst.msk [vmem:[#allocation3 + $0x60] sm:$0xff] %vm90_vm0, %v4681_v54  ;;  %4138 = vmatpush3.msra.mxu0 %v962_v52  ;;  %v267_v8 = vld [vmem:[#allocation2 + $0x62] sm:$0xff]  ;;  %v268_v10 = vld [vmem:[#allocation2 + $0x72] sm:$0xff]  ;;  %vm974_vm10 = vcmask 588800   ;;  %vm4409_vm11 = vmmov 0   ;;  %vm3913_vm12 = vcmask 9216  }
  0x23   :  { %4139 = vmatprep.subr.mxu0 %v961_v53  ;;  %v86_v11 = vld [vmem:[%s6116_s0 + $0x120] sm:$0xff]  ;;  %v87_v15 = vld [vmem:[%s6116_s0 + $0x128] sm:$0x3]  ;;  %v173_v19 = vld [vmem:[#allocation2 + $0xb1] sm:$0xff]  ;;  %vm3931_vm13 = vcmask 1024  }
  0x24   :  { %4140 = vmatpush3.msra.mxu0 %v961_v53  ;;  %v4720_v1 = vld [vmem:[#allocation2 + $0xf0] sm:$0xff]  ;;  %128 = vst.msk [vmem:[#allocation2 + $0x120] sm:$0xff] %vm90_vm0, %v86_v11  ;;  %v140_v12 = vld [vmem:[#allocation2 + $0xa0] sm:$0xff] }
  0x25   :  { %683 = vrot.lane.b32.xlu1 %v360_v25, %s4402_s22  ;;  %4141 = vmatprep.subr.mxu0 %v960_v56  ;;  %161 = vst.msk [vmem:[#allocation3 + $0x68] sm:$0xff] %vm90_vm0, %v4720_v1  ;;  %156 = vst.msk [vmem:[#allocation3 + $0x40] sm:$0xff] %vm90_vm0, %v140_v12  ;;  %v366_v14 = vld [vmem:[#allocation2 + $0x80] sm:$0xff]  ;;  %v270_v25 = vld [vmem:[#allocation2 + $0xb2] sm:$0xff] }
  0x26   :  { %587 = vrot.lane.b32.xlu0 %v263_v42, %s4401_s21  ;;  %4142 = vmatpush3.msra.mxu0 %v960_v56  ;;  %129 = vst.msk [vmem:[#allocation2 + $0x128] sm:$0x3] %vm92_vm1, %v87_v15  ;;  %v463_v16 = vld [vmem:[#allocation2 + $0x81] sm:$0xff]  ;;  %v658_v28 = vld [vmem:[#allocation2 + $0x90] sm:$0xff] }
  0x27   :  { %4143 = vmatprep.subr.mxu0 %v959_v57  ;;  %v4734_v3 = vld [vmem:[#allocation2 + $0x100] sm:$0xff]  ;;  %v4772_v13 = vld [vmem:[#allocation2 + $0x110] sm:$0xff] }
  0x28   :  { %4144 = vmatpush3.msra.mxu0 %v959_v57  ;;  %162 = vst.msk [vmem:[#allocation3 + $0x70] sm:$0xff] %vm90_vm0, %v4734_v3  ;;  %163 = vst.msk [vmem:[#allocation3 + $0x78] sm:$0xff] %vm90_vm0, %v4772_v13  ;;  %v172_v17 = vld [vmem:[#allocation2 + $0xa1] sm:$0xff]  ;;  %v852_v41 = vld [vmem:[#allocation2 + $0x92] sm:$0xff] }
  0x29   :  { %395 = vrot.lane.b32.xlu1 %v4584_v29, %s6132_s19  ;;  %4145 = vmatprep.subr.mxu0 %v958_v59  ;;  %v269_v18 = vld [vmem:[#allocation2 + $0xa2] sm:$0xff]  ;;  %v272_v52 = vld [vmem:[#allocation2 + $0xd2] sm:$0xff] }
  0x2a   :  { %299 = vrot.lane.b32.xlu0 %v264_v46, %s4397_s17  ;;  %4146 = vmatpush3.msra.mxu0 %v958_v59  ;;  %v560_v22 = vld [vmem:[#allocation2 + $0x82] sm:$0xff]  ;;  %v177_v6 = vld [vmem:[#allocation2 + $0xf1] sm:$0xff] }
  0x2b   :  { %v465_v38 = vld [vmem:[#allocation2 + $0xc1] sm:$0xff]  ;;  %v274_v11 = vld [vmem:[#allocation2 + $0xf2] sm:$0xff] }
  0x2c   :  { %v271_v45 = vld [vmem:[#allocation2 + $0xc2] sm:$0xff] }
  0x2d   :  { %780 = vrot.lane.b32.xlu1 %v166_v34, %s4403_s24 }
  0x2e   :  { %685 = vrot.lane.b32.xlu0 %v4584_v29, %s4402_s22  ;;  %v88_v29 = vld [vmem:[%s6116_s0 + $0x130] sm:$0xff] }
  0x2f   :  { %130 = vst.msk [vmem:[#allocation2 + $0x130] sm:$0xff] %vm90_vm0, %v88_v29  ;;  %v566_v29 = vld [vmem:[#allocation2 + $0x102] sm:$0xff] }
  0x31   :  { %492 = vrot.lane.b32.xlu1 %v167_v43, %s4400_s20 }
  0x32   :  { %397 = vrot.lane.b32.xlu0 %v4587_v30, %s6132_s19 }
  0x35   :  { %877 = vrot.lane.b32.xlu1 %v263_v42, %s4404_s25 }
  0x36   :  { %782 = vrot.lane.b32.xlu0 %v167_v43, %s4403_s24 }
  0x39   :  { %494 = vrot.lane.b32.xlu1 %v459_v58, %s4400_s20 }
  0x3a   :  { %204 = vrot.lane.b32.xlu0 %v459_v58, %s4398_s18 }
  0x3d   :  { %879 = vrot.lane.b32.xlu1 %v264_v46, %s4404_s25 }
  0x3e   :  { %589 = vrot.lane.b32.xlu0 %v264_v46, %s4401_s21  ;;  %v175_v46 = vld [vmem:[#allocation2 + $0xd1] sm:$0xff] }
  0x41   :  { %301 = vrot.lane.b32.xlu1 %v265_v62, %s4397_s17 }
  0x42   :  { %206 = vrot.lane.b32.xlu0 %v169_v63, %s4398_s18 }
  0x45   :  { %687 = vrot.lane.b32.xlu1 %v4587_v30, %s4402_s22 }
  0x46   :  { %591 = vrot.lane.b32.xlu0 %v265_v62, %s4401_s21 }
  0x49   :  { %399 = vrot.lane.b32.xlu1 %v4593_v31, %s6134_s26 }
  0x4a   :  { %303 = vrot.lane.b32.xlu0 %v266_v0, %s4397_s17 }
  0x4d   :  { %784 = vrot.lane.b32.xlu1 %v459_v58, %s4403_s24 }
  0x4e   :  { %689 = vrot.lane.b32.xlu0 %v4593_v31, %s4402_s22 }
  0x51   :  { %496 = vrot.lane.b32.xlu1 %v169_v63, %s4400_s20 }
  0x52   :  { %401 = vrot.lane.b32.xlu0 %v4597_v32, %s6134_s26 }
  0x55   :  { %881 = vrot.lane.b32.xlu1 %v265_v62, %s4404_s25 }
  0x56   :  { %786 = vrot.lane.b32.xlu0 %v169_v63, %s4403_s24 }
  0x59   :  { %498 = vrot.lane.b32.xlu1 %v461_v5, %s4400_s20 }
  0x5a   :  { %208 = vrot.lane.b32.xlu0 %v461_v5, %s4398_s18 }
  0x5d   :  { %883 = vrot.lane.b32.xlu1 %v266_v0, %s4404_s25 }
  0x5e   :  { %593 = vrot.lane.b32.xlu0 %v266_v0, %s4401_s21 }
  0x61   :  { %305 = vrot.lane.b32.xlu1 %v267_v8, %s4397_s17 }
  0x62   :  { %210 = vrot.lane.b32.xlu0 %v171_v9, %s4398_s18 }
  0x65   :  { %691 = vrot.lane.b32.xlu1 %v4597_v32, %s4402_s22  ;;  %v89_v32 = vld [vmem:[%s6116_s0 + $0x138] sm:$0x3] }
  0x66   :  { %595 = vrot.lane.b32.xlu0 %v267_v8, %s4401_s21  ;;  %131 = vst.msk [vmem:[#allocation2 + $0x138] sm:$0x3] %vm92_vm1, %v89_v32  ;;  %v276_v32 = vld [vmem:[#allocation2 + $0x112] sm:$0xff] }
  0x69   :  { %403 = vrot.lane.b32.xlu1 %v4601_v33, %s6134_s26 }
  0x6a   :  { %307 = vrot.lane.b32.xlu0 %v268_v10, %s4397_s17 }
  0x6d   :  { %788 = vrot.lane.b32.xlu1 %v461_v5, %s4403_s24  ;;  %v273_v5 = vld [vmem:[#allocation2 + $0xe2] sm:$0xff] }
  0x6e   :  { %693 = vrot.lane.b32.xlu0 %v4601_v33, %s4402_s22 }
  0x71   :  { %500 = vrot.lane.b32.xlu1 %v171_v9, %s4400_s20 }
  0x72   :  { %405 = vrot.lane.b32.xlu0 %v366_v14, %s6134_s26 }
  0x75   :  { %885 = vrot.lane.b32.xlu1 %v267_v8, %s4404_s25 }
  0x76   :  { %790 = vrot.lane.b32.xlu0 %v171_v9, %s4403_s24 }
  0x79   :  { %502 = vrot.lane.b32.xlu1 %v463_v16, %s4400_s20 }
  0x7a   :  { %212 = vrot.lane.b32.xlu0 %v172_v17, %s4398_s18 }
  0x7d   :  { %887 = vrot.lane.b32.xlu1 %v268_v10, %s4404_s25 }
  0x7e   :  { %597 = vrot.lane.b32.xlu0 %v268_v10, %s4401_s21 }
  0x7f   :  { %v294_v20 = vpop.permute.xlu1 %293 }
  0x80   :  { %v197_v21 = vpop.permute.xlu0 %196 }
  0x81   :  { %245 = vst.msk [vmem:[#allocation3] sm:$0xff] %vm244_vm2, %v197_v21  ;;  %309 = vrot.lane.b32.xlu1 %v269_v18, %s4397_s17 }
  0x82   :  { %214 = vrot.lane.b32.xlu0 %v173_v19, %s4398_s18  ;;  %342 = vst.msk [vmem:[#allocation3] sm:$0xff] %vm341_vm3, %v294_v20 }
  0x83   :  { %v296_v23 = vpop.permute.xlu1 %295 }
  0x84   :  { %v199_v24 = vpop.permute.xlu0 %198 }
  0x85   :  { %246 = vst.msk [vmem:[#allocation3 + $0x8] sm:$0xff] %vm244_vm2, %v199_v24  ;;  %695 = vrot.lane.b32.xlu1 %v366_v14, %s4402_s22 }
  0x86   :  { %599 = vrot.lane.b32.xlu0 %v560_v22, %s4401_s21  ;;  %343 = vst.msk [vmem:[#allocation3 + $0x8] sm:$0xff] %vm341_vm3, %v296_v23 }
  0x87   :  { %v394_v26 = vpop.permute.xlu1 %393 }
  0x88   :  { %v392_v27 = vpop.permute.xlu0 %391  ;;  %441 = vst.msk [vmem:[#allocation3 + $0x8] sm:$0xff] %vm439_vm4, %v394_v26  ;;  %v179_v26 = vld [vmem:[#allocation2 + $0x111] sm:$0xff] }
  0x89   :  { %440 = vst.msk [vmem:[#allocation3] sm:$0xff] %vm439_vm4, %v392_v27  ;;  %407 = vrot.lane.b32.xlu1 %v4609_v35, %s6134_s26  ;;  %v755_v35 = vld [vmem:[#allocation2 + $0x91] sm:$0xff] }
  0x8a   :  { %311 = vrot.lane.b32.xlu0 %v270_v25, %s4397_s17 }
  0x8b   :  { %v201_v30 = vpop.permute.xlu1 %200 }
  0x8c   :  { %v489_v31 = vpop.permute.xlu0 %488  ;;  %247 = vst.msk [vmem:[#allocation3 + $0x10] sm:$0xff] %vm244_vm2, %v201_v30 }
  0x8d   :  { %537 = vst.msk [vmem:[#allocation3] sm:$0xff] %vm536_vm5, %v489_v31  ;;  %792 = vrot.lane.b32.xlu1 %v463_v16, %s4403_s24 }
  0x8e   :  { %697 = vrot.lane.b32.xlu0 %v658_v28, %s4402_s22 }
  0x8f   :  { %v586_v33 = vpop.permute.xlu1 %585 }
  0x90   :  { %v491_v34 = vpop.permute.xlu0 %490  ;;  %634 = vst.msk [vmem:[#allocation3] sm:$0xff] %vm633_vm6, %v586_v33 }
  0x91   :  { %538 = vst.msk [vmem:[#allocation3 + $0x8] sm:$0xff] %vm536_vm5, %v491_v34  ;;  %504 = vrot.lane.b32.xlu1 %v173_v19, %s4400_s20 }
  0x92   :  { %409 = vrot.lane.b32.xlu0 %v4641_v44, %s6134_s26 }
  0x93   :  { %v298_v36 = vpop.permute.xlu1 %297 }
  0x94   :  { %v203_v37 = vpop.permute.xlu0 %202  ;;  %344 = vst.msk [vmem:[#allocation3 + $0x10] sm:$0xff] %vm341_vm3, %v298_v36 }
  0x95   :  { %248 = vst.msk [vmem:[#allocation3 + $0x18] sm:$0xff] %vm244_vm2, %v203_v37  ;;  %889 = vrot.lane.b32.xlu1 %v560_v22, %s4404_s25 }
  0x96   :  { %794 = vrot.lane.b32.xlu0 %v755_v35, %s4403_s24 }
  0x97   :  { %v684_v39 = vpop.permute.xlu1 %683 }
  0x98   :  { %v588_v40 = vpop.permute.xlu0 %587  ;;  %732 = vst.msk [vmem:[#allocation3] sm:$0xff] %vm731_vm7, %v684_v39 }
  0x99   :  { %635 = vst.msk [vmem:[#allocation3 + $0x8] sm:$0xff] %vm633_vm6, %v588_v40  ;;  %506 = vrot.lane.b32.xlu1 %v465_v38, %s4400_s20 }
  0x9a   :  { %216 = vrot.lane.b32.xlu0 %v465_v38, %s4398_s18 }
  0x9b   :  { %v396_v42 = vpop.permute.xlu1 %395 }
  0x9c   :  { %v300_v43 = vpop.permute.xlu0 %299  ;;  %442 = vst.msk [vmem:[#allocation3 + $0x10] sm:$0xff] %vm439_vm4, %v396_v42 }
  0x9d   :  { %345 = vst.msk [vmem:[#allocation3 + $0x18] sm:$0xff] %vm341_vm3, %v300_v43  ;;  %891 = vrot.lane.b32.xlu1 %v852_v41, %s4404_s25 }
  0x9e   :  { %601 = vrot.lane.b32.xlu0 %v270_v25, %s4401_s21 }
  0x9f   :  { %v781_v47 = vpop.permute.xlu1 %780 }
  0xa0   :  { %v686_v49 = vpop.permute.xlu0 %685  ;;  %829 = vst.msk [vmem:[#allocation3] sm:$0xff] %vm828_vm8, %v781_v47 }
  0xa1   :  { %733 = vst.msk [vmem:[#allocation3 + $0x8] sm:$0xff] %vm731_vm7, %v686_v49  ;;  %313 = vrot.lane.b32.xlu1 %v271_v45, %s4397_s17 }
  0xa2   :  { %218 = vrot.lane.b32.xlu0 %v175_v46, %s4398_s18 }
  0xa3   :  { %v493_v50 = vpop.permute.xlu1 %492 }
  0xa4   :  { %v398_v51 = vpop.permute.xlu0 %397  ;;  %539 = vst.msk [vmem:[#allocation3 + $0x10] sm:$0xff] %vm536_vm5, %v493_v50  ;;  %v666_v50 = vld [vmem:[#allocation2 + $0x130] sm:$0xff] }
  0xa5   :  { %443 = vst.msk [vmem:[#allocation3 + $0x18] sm:$0xff] %vm439_vm4, %v398_v51  ;;  %699 = vrot.lane.b32.xlu1 %v4641_v44, %s4402_s22 }
  0xa6   :  { %603 = vrot.lane.b32.xlu0 %v271_v45, %s4401_s21 }
  0xa7   :  { %v878_v53 = vpop.permute.xlu1 %877 }
  0xa8   :  { %v783_v55 = vpop.permute.xlu0 %782  ;;  %926 = vst.msk [vmem:[#allocation3] sm:$0xff] %vm925_vm9, %v878_v53  ;;  %v763_v53 = vld [vmem:[#allocation2 + $0x131] sm:$0xff] }
  0xa9   :  { %830 = vst.msk [vmem:[#allocation3 + $0x8] sm:$0xff] %vm828_vm8, %v783_v55  ;;  %411 = vrot.lane.b32.xlu1 %v4655_v48, %s6134_s26 }
  0xaa   :  { %315 = vrot.lane.b32.xlu0 %v272_v52, %s4397_s17 }
  0xab   :  { %v495_v56 = vpop.permute.xlu1 %494 }
  0xac   :  { %v205_v57 = vpop.permute.xlu0 %204  ;;  %540 = vst.msk [vmem:[#allocation3 + $0x18] sm:$0xff] %vm536_vm5, %v495_v56 }
  0xad   :  { %249 = vst.msk [vmem:[#allocation3 + $0x20] sm:$0xff] %vm244_vm2, %v205_v57  ;;  %796 = vrot.lane.b32.xlu1 %v465_v38, %s4403_s24  ;;  %v860_v57 = vld [vmem:[#allocation2 + $0x132] sm:$0xff] }
  0xae   :  { %701 = vrot.lane.b32.xlu0 %v4655_v48, %s4402_s22  ;;  %v467_v48 = vld [vmem:[#allocation2 + $0xe1] sm:$0xff] }
  0xaf   :  { %v880_v44 = vpop.permute.xlu1 %879  ;;  %v942_v59 = vld [vmem:[#allocation3] sm:$0xff] }
  0xb0   :  { %v590_v58 = vpop.permute.xlu0 %589  ;;  %927 = vst.msk [vmem:[#allocation3 + $0x8] sm:$0xff] %vm925_vm9, %v880_v44  ;;  %4147 = vmatprep.mubr.msk.f32.mxu0 %vm974_vm10, %v942_v59  ;;  %v1232_v59 = vld [vmem:[#allocation2 + $0x1] sm:$0xff] }
  0xb1   :  { %636 = vst.msk [vmem:[#allocation3 + $0x10] sm:$0xff] %vm633_vm6, %v590_v58  ;;  %508 = vrot.lane.b32.xlu1 %v175_v46, %s4400_s20 }
  0xb2   :  { %413 = vrot.lane.b32.xlu0 %v4681_v54, %s6134_s26 }
  0xb3   :  { %v302_v60 = vpop.permute.xlu1 %301 }
  0xb4   :  { %v207_v61 = vpop.permute.xlu0 %206  ;;  %346 = vst.msk [vmem:[#allocation3 + $0x20] sm:$0xff] %vm341_vm3, %v302_v60 }
  0xb5   :  { %250 = vst.msk [vmem:[#allocation3 + $0x28] sm:$0xff] %vm244_vm2, %v207_v61  ;;  %893 = vrot.lane.b32.xlu1 %v271_v45, %s4404_s25 }
  0xb6   :  { %798 = vrot.lane.b32.xlu0 %v175_v46, %s4403_s24  ;;  %v568_v46 = vld [vmem:[#allocation2 + $0x122] sm:$0xff] }
  0xb7   :  { %v688_v62 = vpop.permute.xlu1 %687  ;;  %v943_v0 = vld [vmem:[#allocation3 + $0x8] sm:$0xff] }
  0xb8   :  { %v592_v63 = vpop.permute.xlu0 %591  ;;  %734 = vst.msk [vmem:[#allocation3 + $0x10] sm:$0xff] %vm731_vm7, %v688_v62  ;;  %4148 = vmatmul.mubr.msk.f32.vlgmr.msra.gmra.mxu0 %vm974_vm10, %v943_v0 }
  0xb9   :  { %637 = vst.msk [vmem:[#allocation3 + $0x18] sm:$0xff] %vm633_vm6, %v592_v63  ;;  %510 = vrot.lane.b32.xlu1 %v467_v48, %s4400_s20 }
  0xba   :  { %220 = vrot.lane.b32.xlu0 %v467_v48, %s4398_s18 }
  0xbb   :  { %v400_v2 = vpop.permute.xlu1 %399 }
  0xbc   :  { %v304_v4 = vpop.permute.xlu0 %303  ;;  %444 = vst.msk [vmem:[#allocation3 + $0x20] sm:$0xff] %vm439_vm4, %v400_v2 }
  0xbd   :  { %347 = vst.msk [vmem:[#allocation3 + $0x28] sm:$0xff] %vm341_vm3, %v304_v4  ;;  %895 = vrot.lane.b32.xlu1 %v272_v52, %s4404_s25 }
  0xbe   :  { %605 = vrot.lane.b32.xlu0 %v272_v52, %s4401_s21 }
  0xbf   :  { %v785_v7 = vpop.permute.xlu1 %784 }
  0xc0   :  { %v690_v8 = vpop.permute.xlu0 %689  ;;  %831 = vst.msk [vmem:[#allocation3 + $0x10] sm:$0xff] %vm828_vm8, %v785_v7 }
  0xc1   :  { %735 = vst.msk [vmem:[#allocation3 + $0x18] sm:$0xff] %vm731_vm7, %v690_v8  ;;  %317 = vrot.lane.b32.xlu1 %v273_v5, %s4397_s17 }
  0xc2   :  { %222 = vrot.lane.b32.xlu0 %v177_v6, %s4398_s18 }
  0xc3   :  { %v497_v9 = vpop.permute.xlu1 %496 }
  0xc4   :  { %v402_v10 = vpop.permute.xlu0 %401  ;;  %541 = vst.msk [vmem:[#allocation3 + $0x20] sm:$0xff] %vm536_vm5, %v497_v9 }
  0xc5   :  { %445 = vst.msk [vmem:[#allocation3 + $0x28] sm:$0xff] %vm439_vm4, %v402_v10  ;;  %703 = vrot.lane.b32.xlu1 %v4681_v54, %s4402_s22 }
  0xc6   :  { %607 = vrot.lane.b32.xlu0 %v273_v5, %s4401_s21 }
  0xc7   :  { %v882_v12 = vpop.permute.xlu1 %881 }
  0xc8   :  { %v787_v14 = vpop.permute.xlu0 %786  ;;  %928 = vst.msk [vmem:[#allocation3 + $0x10] sm:$0xff] %vm925_vm9, %v882_v12 }
  0xc9   :  { %832 = vst.msk [vmem:[#allocation3 + $0x18] sm:$0xff] %vm828_vm8, %v787_v14  ;;  %415 = vrot.lane.b32.xlu1 %v4720_v1, %s6134_s26 }
  0xca   :  { %319 = vrot.lane.b32.xlu0 %v274_v11, %s4397_s17 }
  0xcb   :  { %v499_v15 = vpop.permute.xlu1 %498 }
  0xcc   :  { %v209_v16 = vpop.permute.xlu0 %208  ;;  %542 = vst.msk [vmem:[#allocation3 + $0x28] sm:$0xff] %vm536_vm5, %v499_v15 }
  0xcd   :  { %251 = vst.msk [vmem:[#allocation3 + $0x30] sm:$0xff] %vm244_vm2, %v209_v16  ;;  %800 = vrot.lane.b32.xlu1 %v467_v48, %s4403_s24  ;;  %v1328_v48 = vld [vmem:[#allocation2 + $0x2] sm:$0xff] }
  0xce   :  { %705 = vrot.lane.b32.xlu0 %v4720_v1, %s4402_s22  ;;  %v469_v1 = vld [vmem:[#allocation2 + $0x101] sm:$0xff] }
  0xcf   :  { %v884_v54 = vpop.permute.xlu1 %883  ;;  %v944_v18 = vld [vmem:[#allocation3 + $0x10] sm:$0xff] }
  0xd0   :  { %v594_v17 = vpop.permute.xlu0 %593  ;;  %929 = vst.msk [vmem:[#allocation3 + $0x18] sm:$0xff] %vm925_vm9, %v884_v54  ;;  %4150 = vmatprep.mubr.msk.f32.mxu0 %vm974_vm10, %v944_v18 }
  0xd1   :  { %638 = vst.msk [vmem:[#allocation3 + $0x20] sm:$0xff] %vm633_vm6, %v594_v17  ;;  %512 = vrot.lane.b32.xlu1 %v177_v6, %s4400_s20 }
  0xd2   :  { %417 = vrot.lane.b32.xlu0 %v4734_v3, %s6134_s26 }
  0xd3   :  { %v306_v19 = vpop.permute.xlu1 %305 }
  0xd4   :  { %v211_v20 = vpop.permute.xlu0 %210  ;;  %348 = vst.msk [vmem:[#allocation3 + $0x30] sm:$0xff] %vm341_vm3, %v306_v19 }
  0xd5   :  { %252 = vst.msk [vmem:[#allocation3 + $0x38] sm:$0xff] %vm244_vm2, %v211_v20  ;;  %897 = vrot.lane.b32.xlu1 %v273_v5, %s4404_s25 }
  0xd6   :  { %802 = vrot.lane.b32.xlu0 %v177_v6, %s4403_s24 }
  0xd7   :  { %v692_v21 = vpop.permute.xlu1 %691  ;;  %v945_v23 = vld [vmem:[#allocation3 + $0x18] sm:$0xff] }
  0xd8   :  { %v596_v22 = vpop.permute.xlu0 %595  ;;  %736 = vst.msk [vmem:[#allocation3 + $0x20] sm:$0xff] %vm731_vm7, %v692_v21  ;;  %4151 = vmatmul.mubr.msk.f32.gmra.mxu0 %vm974_vm10, %v945_v23 }
  0xd9   :  { %639 = vst.msk [vmem:[#allocation3 + $0x28] sm:$0xff] %vm633_vm6, %v596_v22  ;;  %514 = vrot.lane.b32.xlu1 %v469_v1, %s4400_s20 }
  0xda   :  { %224 = vrot.lane.b32.xlu0 %v469_v1, %s4398_s18 }
  0xdb   :  { %v404_v24 = vpop.permute.xlu1 %403 }
  0xdc   :  { %v308_v25 = vpop.permute.xlu0 %307  ;;  %446 = vst.msk [vmem:[#allocation3 + $0x30] sm:$0xff] %vm439_vm4, %v404_v24 }
  0xdd   :  { %349 = vst.msk [vmem:[#allocation3 + $0x38] sm:$0xff] %vm341_vm3, %v308_v25  ;;  %899 = vrot.lane.b32.xlu1 %v274_v11, %s4404_s25 }
  0xde   :  { %609 = vrot.lane.b32.xlu0 %v274_v11, %s4401_s21 }
  0xdf   :  { %v789_v27 = vpop.permute.xlu1 %788 }
  0xe0   :  { %v694_v28 = vpop.permute.xlu0 %693  ;;  %833 = vst.msk [vmem:[#allocation3 + $0x20] sm:$0xff] %vm828_vm8, %v789_v27 }
  0xe1   :  { %737 = vst.msk [vmem:[#allocation3 + $0x28] sm:$0xff] %vm731_vm7, %v694_v28  ;;  %321 = vrot.lane.b32.xlu1 %v566_v29, %s4397_s17 }
  0xe2   :  { %226 = vrot.lane.b32.xlu0 %v179_v26, %s4398_s18 }
  0xe3   :  { %v501_v30 = vpop.permute.xlu1 %500 }
  0xe4   :  { %v406_v31 = vpop.permute.xlu0 %405  ;;  %543 = vst.msk [vmem:[#allocation3 + $0x30] sm:$0xff] %vm536_vm5, %v501_v30 }
  0xe5   :  { %447 = vst.msk [vmem:[#allocation3 + $0x38] sm:$0xff] %vm439_vm4, %v406_v31  ;;  %707 = vrot.lane.b32.xlu1 %v4734_v3, %s4402_s22  ;;  %v374_v3 = vld [vmem:[#allocation2 + $0x120] sm:$0xff] }
  0xe6   :  { %611 = vrot.lane.b32.xlu0 %v566_v29, %s4401_s21 }
  0xe7   :  { %v886_v33 = vpop.permute.xlu1 %885 }
  0xe8   :  { %v791_v34 = vpop.permute.xlu0 %790  ;;  %930 = vst.msk [vmem:[#allocation3 + $0x20] sm:$0xff] %vm925_vm9, %v886_v33 }
  0xe9   :  { %834 = vst.msk [vmem:[#allocation3 + $0x28] sm:$0xff] %vm828_vm8, %v791_v34  ;;  %419 = vrot.lane.b32.xlu1 %v4772_v13, %s6134_s26 }
  0xea   :  { %323 = vrot.lane.b32.xlu0 %v276_v32, %s4397_s17 }
  0xeb   :  { %v503_v35 = vpop.permute.xlu1 %502 }
  0xec   :  { %v213_v36 = vpop.permute.xlu0 %212  ;;  %544 = vst.msk [vmem:[#allocation3 + $0x38] sm:$0xff] %vm536_vm5, %v503_v35 }
  0xed   :  { %253 = vst.msk [vmem:[#allocation3 + $0x40] sm:$0xff] %vm244_vm2, %v213_v36  ;;  %804 = vrot.lane.b32.xlu1 %v469_v1, %s4403_s24 }
  0xee   :  { %709 = vrot.lane.b32.xlu0 %v4772_v13, %s4402_s22  ;;  %v471_v13 = vld [vmem:[#allocation2 + $0x121] sm:$0xff] }
  0xef   :  { %v888_v37 = vpop.permute.xlu1 %887  ;;  %v946_v39 = vld [vmem:[#allocation3 + $0x20] sm:$0xff] }
  0xf0   :  { %v598_v38 = vpop.permute.xlu0 %597  ;;  %931 = vst.msk [vmem:[#allocation3 + $0x28] sm:$0xff] %vm925_vm9, %v888_v37  ;;  %4153 = vmatprep.mubr.msk.f32.mxu0 %vm974_vm10, %v946_v39 }
  0xf1   :  { %640 = vst.msk [vmem:[#allocation3 + $0x30] sm:$0xff] %vm633_vm6, %v598_v38  ;;  %516 = vrot.lane.b32.xlu1 %v179_v26, %s4400_s20 }
  0xf2   :  { %421 = vrot.lane.b32.xlu0 %v374_v3, %s6134_s26 }
  0xf3   :  { %v310_v40 = vpop.permute.xlu1 %309 }
  0xf4   :  { %v215_v41 = vpop.permute.xlu0 %214  ;;  %350 = vst.msk [vmem:[#allocation3 + $0x40] sm:$0xff] %vm341_vm3, %v310_v40 }
  0xf5   :  { %254 = vst.msk [vmem:[#allocation3 + $0x48] sm:$0xff] %vm244_vm2, %v215_v41  ;;  %901 = vrot.lane.b32.xlu1 %v566_v29, %s4404_s25 }
  0xf6   :  { %806 = vrot.lane.b32.xlu0 %v179_v26, %s4403_s24 }
  0xf7   :  { %v696_v42 = vpop.permute.xlu1 %695  ;;  %v947_v45 = vld [vmem:[#allocation3 + $0x28] sm:$0xff] }
  0xf8   :  { %v600_v43 = vpop.permute.xlu0 %599  ;;  %738 = vst.msk [vmem:[#allocation3 + $0x30] sm:$0xff] %vm731_vm7, %v696_v42  ;;  %4154 = vmatmul.mubr.msk.f32.gmra.mxu0 %vm974_vm10, %v947_v45 }
  0xf9   :  { %641 = vst.msk [vmem:[#allocation3 + $0x38] sm:$0xff] %vm633_vm6, %v600_v43  ;;  %613 = vrot.lane.b32.xlu1 %v276_v32, %s4401_s21 }
  0xfa   :  { %518 = vrot.lane.b32.xlu0 %v471_v13, %s4400_s20 }
  0xfb   :  { %v408_v47 = vpop.permute.xlu1 %407 }
  0xfc   :  { %v312_v49 = vpop.permute.xlu0 %311  ;;  %448 = vst.msk [vmem:[#allocation3 + $0x40] sm:$0xff] %vm439_vm4, %v408_v47 }
  0xfd   :  { %351 = vst.msk [vmem:[#allocation3 + $0x48] sm:$0xff] %vm341_vm3, %v312_v49  ;;  %615 = vrot.lane.b32.xlu1 %v568_v46, %s4401_s21 }
  0xfe   :  { %903 = vrot.lane.b32.xlu0 %v276_v32, %s4404_s25 }
  0xff   :  { %v793_v51 = vpop.permute.xlu1 %792 }
 0x100   :  { %v698_v52 = vpop.permute.xlu0 %697  ;;  %835 = vst.msk [vmem:[#allocation3 + $0x30] sm:$0xff] %vm828_vm8, %v793_v51 }
 0x101   :  { %739 = vst.msk [vmem:[#allocation3 + $0x38] sm:$0xff] %vm731_vm7, %v698_v52  ;;  %713 = vrot.lane.b32.xlu1 %v666_v50, %s4402_s22 }
 0x102   :  { %711 = vrot.lane.b32.xlu0 %v374_v3, %s4402_s22 }
 0x103   :  { %v505_v55 = vpop.permute.xlu1 %504 }
 0x104   :  { %v410_v56 = vpop.permute.xlu0 %409  ;;  %545 = vst.msk [vmem:[#allocation3 + $0x40] sm:$0xff] %vm536_vm5, %v505_v55 }
 0x105   :  { %449 = vst.msk [vmem:[#allocation3 + $0x48] sm:$0xff] %vm439_vm4, %v410_v56  ;;  %810 = vrot.lane.b32.xlu1 %v763_v53, %s4403_s24  ;;  %v1200_v53 = vld [vmem:[#allocation2] sm:$0xff] }
 0x106   :  { %808 = vrot.lane.b32.xlu0 %v471_v13, %s4403_s24  ;;  %1216 = vst.msk [vmem:[#allocation3] sm:$0xff] %vm90_vm0, %v1200_v53 }
 0x107   :  { %v890_v44 = vpop.permute.xlu1 %889 }
 0x108   :  { %v795_v58 = vpop.permute.xlu0 %794  ;;  %932 = vst.msk [vmem:[#allocation3 + $0x30] sm:$0xff] %vm925_vm9, %v890_v44 }
 0x109   :  { %836 = vst.msk [vmem:[#allocation3 + $0x38] sm:$0xff] %vm828_vm8, %v795_v58  ;;  %907 = vrot.lane.b32.xlu1 %v860_v57, %s4404_s25 }
 0x10a   :  { %905 = vrot.lane.b32.xlu0 %v568_v46, %s4404_s25 }
 0x10b   :  { %v507_v60 = vpop.permute.xlu1 %506 }
 0x10c   :  { %v217_v61 = vpop.permute.xlu0 %216  ;;  %546 = vst.msk [vmem:[#allocation3 + $0x48] sm:$0xff] %vm536_vm5, %v507_v60 }
 0x10d   :  { %255 = vst.msk [vmem:[#allocation3 + $0x50] sm:$0xff] %vm244_vm2, %v217_v61 }
 0x10e   :  { %1264 = vrot.lane.b32.xlu0 %v1232_v59, %s4398_s18  ;;  %v5025_v59 = vld [vmem:[%s6118_s2] ss:$0 sm:$0xff] }
 0x10f   :  { %v892_v62 = vpop.permute.xlu1 %891  ;;  %v948_v0 = vld [vmem:[#allocation3 + $0x30] sm:$0xff] }
 0x110   :  { %v602_v63 = vpop.permute.xlu0 %601  ;;  %933 = vst.msk [vmem:[#allocation3 + $0x38] sm:$0xff] %vm925_vm9, %v892_v62  ;;  %4156 = vmatprep.mubr.msk.f32.mxu0 %vm974_vm10, %v948_v0 }
 0x111   :  { %642 = vst.msk [vmem:[#allocation3 + $0x40] sm:$0xff] %vm633_vm6, %v602_v63 }
 0x112   :  { %1360 = vrot.lane.b32.xlu0 %v1328_v48, %s4397_s17 }
 0x113   :  { %v314_v2 = vpop.permute.xlu1 %313 }
 0x114   :  { %v219_v4 = vpop.permute.xlu0 %218  ;;  %352 = vst.msk [vmem:[#allocation3 + $0x50] sm:$0xff] %vm341_vm3, %v314_v2 }
 0x115   :  { %256 = vst.msk [vmem:[#allocation3 + $0x58] sm:$0xff] %vm244_vm2, %v219_v4 }
 0x117   :  { %v700_v5 = vpop.permute.xlu1 %699  ;;  %v949_v7 = vld [vmem:[#allocation3 + $0x38] sm:$0xff] }
 0x118   :  { %v604_v6 = vpop.permute.xlu0 %603  ;;  %740 = vst.msk [vmem:[#allocation3 + $0x40] sm:$0xff] %vm731_vm7, %v700_v5  ;;  %4157 = vmatmul.mubr.msk.f32.gmra.mxu0 %vm974_vm10, %v949_v7 }
 0x119   :  { %643 = vst.msk [vmem:[#allocation3 + $0x48] sm:$0xff] %vm633_vm6, %v604_v6 }
 0x11b   :  { %v412_v8 = vpop.permute.xlu1 %411 }
 0x11c   :  { %v316_v9 = vpop.permute.xlu0 %315  ;;  %450 = vst.msk [vmem:[#allocation3 + $0x50] sm:$0xff] %vm439_vm4, %v412_v8 }
 0x11d   :  { %353 = vst.msk [vmem:[#allocation3 + $0x58] sm:$0xff] %vm341_vm3, %v316_v9 }
 0x11f   :  { %v797_v10 = vpop.permute.xlu1 %796 }
 0x120   :  { %v702_v11 = vpop.permute.xlu0 %701  ;;  %837 = vst.msk [vmem:[#allocation3 + $0x40] sm:$0xff] %vm828_vm8, %v797_v10 }
 0x121   :  { %741 = vst.msk [vmem:[#allocation3 + $0x48] sm:$0xff] %vm731_vm7, %v702_v11 }
 0x123   :  { %v509_v12 = vpop.permute.xlu1 %508 }
 0x124   :  { %v414_v14 = vpop.permute.xlu0 %413  ;;  %547 = vst.msk [vmem:[#allocation3 + $0x50] sm:$0xff] %vm536_vm5, %v509_v12 }
 0x125   :  { %451 = vst.msk [vmem:[#allocation3 + $0x58] sm:$0xff] %vm439_vm4, %v414_v14 }
 0x127   :  { %v894_v15 = vpop.permute.xlu1 %893 }
 0x128   :  { %v799_v16 = vpop.permute.xlu0 %798  ;;  %934 = vst.msk [vmem:[#allocation3 + $0x40] sm:$0xff] %vm925_vm9, %v894_v15 }
 0x129   :  { %838 = vst.msk [vmem:[#allocation3 + $0x48] sm:$0xff] %vm828_vm8, %v799_v16 }
 0x12b   :  { %v511_v54 = vpop.permute.xlu1 %510 }
 0x12c   :  { %v221_v17 = vpop.permute.xlu0 %220  ;;  %548 = vst.msk [vmem:[#allocation3 + $0x58] sm:$0xff] %vm536_vm5, %v511_v54 }
 0x12d   :  { %257 = vst.msk [vmem:[#allocation3 + $0x60] sm:$0xff] %vm244_vm2, %v221_v17 }
 0x12f   :  { %v896_v18 = vpop.permute.xlu1 %895  ;;  %v950_v20 = vld [vmem:[#allocation3 + $0x40] sm:$0xff] }
 0x130   :  { %v606_v19 = vpop.permute.xlu0 %605  ;;  %935 = vst.msk [vmem:[#allocation3 + $0x48] sm:$0xff] %vm925_vm9, %v896_v18  ;;  %4159 = vmatprep.mubr.msk.f32.mxu0 %vm974_vm10, %v950_v20 }
 0x131   :  { %644 = vst.msk [vmem:[#allocation3 + $0x50] sm:$0xff] %vm633_vm6, %v606_v19 }
 0x133   :  { %v318_v1 = vpop.permute.xlu1 %317 }
 0x134   :  { %v223_v21 = vpop.permute.xlu0 %222  ;;  %354 = vst.msk [vmem:[#allocation3 + $0x60] sm:$0xff] %vm341_vm3, %v318_v1 }
 0x135   :  { %258 = vst.msk [vmem:[#allocation3 + $0x68] sm:$0xff] %vm244_vm2, %v223_v21 }
 0x137   :  { %v704_v22 = vpop.permute.xlu1 %703  ;;  %v951_v24 = vld [vmem:[#allocation3 + $0x48] sm:$0xff] }
 0x138   :  { %v608_v23 = vpop.permute.xlu0 %607  ;;  %742 = vst.msk [vmem:[#allocation3 + $0x50] sm:$0xff] %vm731_vm7, %v704_v22  ;;  %4160 = vmatmul.mubr.msk.f32.gmra.mxu0 %vm974_vm10, %v951_v24 }
 0x139   :  { %645 = vst.msk [vmem:[#allocation3 + $0x58] sm:$0xff] %vm633_vm6, %v608_v23 }
 0x13b   :  { %v416_v25 = vpop.permute.xlu1 %415 }
 0x13c   :  { %v320_v26 = vpop.permute.xlu0 %319  ;;  %452 = vst.msk [vmem:[#allocation3 + $0x60] sm:$0xff] %vm439_vm4, %v416_v25 }
 0x13d   :  { %355 = vst.msk [vmem:[#allocation3 + $0x68] sm:$0xff] %vm341_vm3, %v320_v26 }
 0x13f   :  { %v801_v27 = vpop.permute.xlu1 %800 }
 0x140   :  { %v706_v28 = vpop.permute.xlu0 %705  ;;  %839 = vst.msk [vmem:[#allocation3 + $0x50] sm:$0xff] %vm828_vm8, %v801_v27  ;;  %v2024_v27 = vld [vmem:[%s6119_s3 + $0x40] sm:$0xff] }
 0x141   :  { %743 = vst.msk [vmem:[#allocation3 + $0x58] sm:$0xff] %vm731_vm7, %v706_v28  ;;  %4171 = vmatprep.subr.mxu1 %v2024_v27 }
 0x142   :  { %4172 = vmatpush3.msra.mxu1 %v2024_v27 }
 0x143   :  { %v513_v29 = vpop.permute.xlu1 %512 }
 0x144   :  { %v418_v30 = vpop.permute.xlu0 %417  ;;  %549 = vst.msk [vmem:[#allocation3 + $0x60] sm:$0xff] %vm536_vm5, %v513_v29  ;;  %v2023_v29 = vld [vmem:[%s6119_s3 + $0x38] sm:$0xff] }
 0x145   :  { %453 = vst.msk [vmem:[#allocation3 + $0x68] sm:$0xff] %vm439_vm4, %v418_v30  ;;  %v2022_v30 = vld [vmem:[%s6119_s3 + $0x30] sm:$0xff]  ;;  %4173 = vmatprep.subr.mxu1 %v2023_v29 }
 0x146   :  { %4174 = vmatpush3.msra.mxu1 %v2023_v29  ;;  %v5183_v29 = vld [vmem:[#allocation2 + $0x91] sm:$0xff] }
 0x147   :  { %v898_v31 = vpop.permute.xlu1 %897  ;;  %4175 = vmatprep.subr.mxu1 %v2022_v30 }
 0x148   :  { %v803_v32 = vpop.permute.xlu0 %802  ;;  %936 = vst.msk [vmem:[#allocation3 + $0x50] sm:$0xff] %vm925_vm9, %v898_v31  ;;  %4176 = vmatpush3.msra.mxu1 %v2022_v30  ;;  %v5185_v30 = vld [vmem:[#allocation2 + $0x92] sm:$0xff] }
 0x149   :  { %840 = vst.msk [vmem:[#allocation3 + $0x58] sm:$0xff] %vm828_vm8, %v803_v32  ;;  %v2021_v32 = vld [vmem:[%s6119_s3 + $0x28] sm:$0xff] }
 0x14a   :  { %4177 = vmatprep.subr.mxu1 %v2021_v32 }
 0x14b   :  { %v515_v33 = vpop.permute.xlu1 %514  ;;  %4178 = vmatpush3.msra.mxu1 %v2021_v32 }
 0x14c   :  { %v225_v34 = vpop.permute.xlu0 %224  ;;  %550 = vst.msk [vmem:[#allocation3 + $0x68] sm:$0xff] %vm536_vm5, %v515_v33  ;;  %v2020_v33 = vld [vmem:[%s6119_s3 + $0x20] sm:$0xff] }
 0x14d   :  { %259 = vst.msk [vmem:[#allocation3 + $0x70] sm:$0xff] %vm244_vm2, %v225_v34  ;;  %4179 = vmatprep.subr.mxu1 %v2020_v33 }
 0x14e   :  { %4180 = vmatpush3.msra.mxu1 %v2020_v33 }
 0x14f   :  { %v900_v35 = vpop.permute.xlu1 %899  ;;  %v952_v3 = vld [vmem:[#allocation3 + $0x50] sm:$0xff] }
 0x150   :  { %v610_v36 = vpop.permute.xlu0 %609  ;;  %937 = vst.msk [vmem:[#allocation3 + $0x58] sm:$0xff] %vm925_vm9, %v900_v35  ;;  %4162 = vmatprep.mubr.msk.f32.mxu0 %vm974_vm10, %v952_v3 }
 0x151   :  { %646 = vst.msk [vmem:[#allocation3 + $0x60] sm:$0xff] %vm633_vm6, %v610_v36  ;;  %v2019_v36 = vld [vmem:[%s6119_s3 + $0x18] sm:$0xff] }
 0x152   :  { %4181 = vmatprep.subr.mxu1 %v2019_v36 }
 0x153   :  { %v322_v38 = vpop.permute.xlu1 %321  ;;  %4182 = vmatpush3.msra.mxu1 %v2019_v36 }
 0x154   :  { %v227_v37 = vpop.permute.xlu0 %226  ;;  %356 = vst.msk [vmem:[#allocation3 + $0x70] sm:$0xff] %vm341_vm3, %v322_v38 }
 0x155   :  { %260 = vst.msk [vmem:[#allocation3 + $0x78] sm:$0xff] %vm244_vm2, %v227_v37 }
 0x157   :  { %v953_v40 = vld [vmem:[#allocation3 + $0x58] sm:$0xff]  ;;  %v708_v41 = vpop.permute.xlu1 %707 }
 0x158   :  { %v612_v39 = vpop.permute.xlu0 %611  ;;  %4163 = vmatmul.mubr.msk.f32.gmra.mxu0 %vm974_vm10, %v953_v40  ;;  %744 = vst.msk [vmem:[#allocation3 + $0x60] sm:$0xff] %vm731_vm7, %v708_v41  ;;  %v2017_v41 = vld [vmem:[%s6119_s3 + $0x8] sm:$0xff] }
 0x159   :  { %647 = vst.msk [vmem:[#allocation3 + $0x68] sm:$0xff] %vm633_vm6, %v612_v39  ;;  %v2018_v39 = vld [vmem:[%s6119_s3 + $0x10] sm:$0xff] }
 0x15a   :  { %4183 = vmatprep.subr.mxu1 %v2018_v39 }
 0x15b   :  { %v420_v42 = vpop.permute.xlu1 %419  ;;  %4184 = vmatpush3.msra.mxu1 %v2018_v39 }
 0x15c   :  { %v324_v13 = vpop.permute.xlu0 %323  ;;  %454 = vst.msk [vmem:[#allocation3 + $0x70] sm:$0xff] %vm439_vm4, %v420_v42  ;;  %4185 = vmatprep.subr.mxu1 %v2017_v41 }
 0x15d   :  { %357 = vst.msk [vmem:[#allocation3 + $0x78] sm:$0xff] %vm341_vm3, %v324_v13  ;;  %v2016_v13 = vld [vmem:[%s6119_s3] sm:$0xff]  ;;  %4186 = vmatpush3.msra.mxu1 %v2017_v41 }
 0x15e   :  { %4187 = vmatprep.subr.mxu1 %v2016_v13 }
 0x15f   :  { %v805_v45 = vpop.permute.xlu1 %804  ;;  %4188 = vmatpush3.msra.mxu1 %v2016_v13 }
 0x160   :  { %v710_v43 = vpop.permute.xlu0 %709  ;;  %841 = vst.msk [vmem:[#allocation3 + $0x60] sm:$0xff] %vm828_vm8, %v805_v45 }
 0x161   :  { %745 = vst.msk [vmem:[#allocation3 + $0x68] sm:$0xff] %vm731_vm7, %v710_v43 }
 0x163   :  { %v517_v47 = vpop.permute.xlu1 %516 }
 0x164   :  { %v422_v46 = vpop.permute.xlu0 %421  ;;  %551 = vst.msk [vmem:[#allocation3 + $0x70] sm:$0xff] %vm536_vm5, %v517_v47 }
 0x165   :  { %455 = vst.msk [vmem:[#allocation3 + $0x78] sm:$0xff] %vm439_vm4, %v422_v46 }
 0x167   :  { %v902_v50 = vpop.permute.xlu1 %901 }
 0x168   :  { %v807_v49 = vpop.permute.xlu0 %806  ;;  %938 = vst.msk [vmem:[#allocation3 + $0x60] sm:$0xff] %vm925_vm9, %v902_v50 }
 0x169   :  { %842 = vst.msk [vmem:[#allocation3 + $0x68] sm:$0xff] %vm828_vm8, %v807_v49 }
 0x16b   :  { %v614_v52 = vpop.permute.xlu1 %613 }
 0x16c   :  { %v519_v51 = vpop.permute.xlu0 %518  ;;  %648 = vst.msk [vmem:[#allocation3 + $0x70] sm:$0xff] %vm633_vm6, %v614_v52 }
 0x16d   :  { %552 = vst.msk [vmem:[#allocation3 + $0x78] sm:$0xff] %vm536_vm5, %v519_v51 }
 0x16f   :  { %v954_v56 = vld [vmem:[#allocation3 + $0x60] sm:$0xff]  ;;  %v616_v57 = vpop.permute.xlu1 %615 }
 0x170   :  { %v904_v55 = vpop.permute.xlu0 %903  ;;  %4165 = vmatprep.mubr.msk.f32.mxu0 %vm974_vm10, %v954_v56  ;;  %649 = vst.msk [vmem:[#allocation3 + $0x78] sm:$0xff] %vm633_vm6, %v616_v57 }
 0x171   :  { %939 = vst.msk [vmem:[#allocation3 + $0x68] sm:$0xff] %vm925_vm9, %v904_v55 }
 0x173   :  { %v714_v58 = vpop.permute.xlu1 %713 }
 0x174   :  { %v712_v44 = vpop.permute.xlu0 %711  ;;  %747 = vst.msk [vmem:[#allocation3 + $0x78] sm:$0xff] %vm731_vm7, %v714_v58 }
 0x175   :  { %746 = vst.msk [vmem:[#allocation3 + $0x70] sm:$0xff] %vm731_vm7, %v712_v44 }
 0x177   :  { %v811_v48 = vpop.permute.xlu1 %810 }
 0x178   :  { %v955_v60 = vld [vmem:[#allocation3 + $0x68] sm:$0xff]  ;;  %v809_v61 = vpop.permute.xlu0 %808  ;;  %v4149_v62 = vpop.f32.mrf.mxu0  ;;  %844 = vst.msk [vmem:[#allocation3 + $0x78] sm:$0xff] %vm828_vm8, %v811_v48 }
 0x179   :  { %4166 = vmatmul.mubr.msk.f32.gmra.mxu0 %vm974_vm10, %v955_v60  ;;  %843 = vst.msk [vmem:[#allocation3 + $0x70] sm:$0xff] %vm828_vm8, %v809_v61  ;;  %v1095_v63 = vadd.f32 %v4149_v62, %v5025_v59  ;;  %v5134_v60 = vld [vmem:[#allocation2 + $0xa0] sm:$0xff] }
 0x17a   :  { %v1089_v0 = vpop.f32.mrf.mxu0  ;;  %1224 = vst.msk [vmem:[#allocation3 + $0x40] sm:$0xff] %vm90_vm0, %v5134_v60  ;;  %v5143_v62 = vld [vmem:[#allocation2 + $0xa1] sm:$0xff] }
 0x17b   :  { %v1169_v2 = vmax.f32 %v1095_v63, 0.0  ;;  %v1090_v4 = vadd.f32 %v5025_v59, %v1089_v0  ;;  %v908_v6 = vpop.permute.xlu1 %907 }
 0x17c   :  { %v906_v5 = vpop.permute.xlu0 %905  ;;  %941 = vst.msk [vmem:[#allocation3 + $0x78] sm:$0xff] %vm925_vm9, %v908_v6 }
 0x17d   :  { %940 = vst.msk [vmem:[#allocation3 + $0x70] sm:$0xff] %vm925_vm9, %v906_v5  ;;  %v1168_v7 = vmax.f32 %v1090_v4, 0.0  ;;  %v5146_v4 = vld [vmem:[#allocation2 + $0xa2] sm:$0xff] }
 0x17e   :  { %1185 = vst.msk [vmem:[#allocation2 + $0x21] sm:$0xff] %vm90_vm0, %v1169_v2 }
 0x17f   :  { %1184 = vst.msk [vmem:[#allocation2 + $0x11] sm:$0xff] %vm90_vm0, %v1168_v7 }
 0x180   :  { %v1265_v8 = vpop.permute.xlu0 %1264 }
 0x181   :  { %1312 = vst.msk [vmem:[#allocation3] sm:$0xff] %vm244_vm2, %v1265_v8 }
 0x183   :  { %v957_v10 = vld [vmem:[#allocation3 + $0x78] sm:$0xff] }
 0x184   :  { %v956_v9 = vld [vmem:[#allocation3 + $0x70] sm:$0xff]  ;;  %v1361_v11 = vpop.permute.xlu0 %1360 }
 0x185   :  { %v1521_v12 = vld [vmem:[#allocation2 + $0x21] sm:$0xff]  ;;  %4168 = vmatprep.mubr.msk.f32.mxu0 %vm974_vm10, %v956_v9  ;;  %1408 = vst.msk [vmem:[#allocation3] sm:$0xff] %vm341_vm3, %v1361_v11 }
 0x186   :  { %v1425_v14 = vld [vmem:[#allocation2 + $0x20] sm:$0xff]  ;;  %1554 = vrot.lane.b32.xlu0 %v1521_v12, %s4400_s20  ;;  %v1424_v15 = vld [vmem:[#allocation2 + $0x10] sm:$0xff]  ;;  %4169 = vmatmul.mubr.msk.f32.gmra.mxu0 %vm974_vm10, %v957_v10 }
 0x187   :  { %1458 = vrot.lane.b32.xlu1 %v1425_v14, %s6134_s26  ;;  %1218 = vst.msk [vmem:[#allocation3 + $0x10] sm:$0xff] %vm90_vm0, %v1425_v14  ;;  %1217 = vst.msk [vmem:[#allocation3 + $0x8] sm:$0xff] %vm90_vm0, %v1424_v15  ;;  %v1617_v16 = vld [vmem:[#allocation2 + $0x22] sm:$0xff]  ;;  %v1520_v54 = vld [vmem:[#allocation2 + $0x11] sm:$0xff] }
 0x188   :  { %v1329_v22 = vld [vmem:[#allocation2 + $0x12] sm:$0xff] }
 0x18a   :  { %1650 = vrot.lane.b32.xlu0 %v1617_v16, %s4401_s21 }
 0x18b   :  { %1268 = vrot.lane.b32.xlu1 %v1521_v12, %s4398_s18 }
 0x18e   :  { %1456 = vrot.lane.b32.xlu0 %v1424_v15, %s6134_s26 }
 0x18f   :  { %1364 = vrot.lane.b32.xlu1 %v1617_v16, %s4397_s17 }
 0x192   :  { %1552 = vrot.lane.b32.xlu0 %v1520_v54, %s4400_s20 }
 0x193   :  { %1744 = vrot.lane.b32.xlu1 %v1425_v14, %s4402_s22 }
 0x197   :  { %1840 = vrot.lane.b32.xlu1 %v1521_v12, %s4403_s24 }
 0x198   :  { %v4152_v17 = vpop.f32.mrf.mxu0 }
 0x199   :  { %v1105_v18 = vadd.f32 %v4152_v17, %v5025_v59 }
 0x19a   :  { %v1099_v19 = vpop.f32.mrf.mxu0 }
 0x19b   :  { %1936 = vrot.lane.b32.xlu1 %v1617_v16, %s4404_s25  ;;  %v1171_v20 = vmax.f32 %v1105_v18, 0.0  ;;  %v1100_v1 = vadd.f32 %v5025_v59, %v1099_v19 }
 0x19d   :  { %1187 = vst.msk [vmem:[#allocation2 + $0x41] sm:$0xff] %vm90_vm0, %v1171_v20  ;;  %v1170_v21 = vmax.f32 %v1100_v1, 0.0 }
 0x19f   :  { %1266 = vrot.lane.b32.xlu1 %v1520_v54, %s4398_s18  ;;  %1186 = vst.msk [vmem:[#allocation2 + $0x31] sm:$0xff] %vm90_vm0, %v1170_v21 }
 0x1a3   :  { %1362 = vrot.lane.b32.xlu1 %v1329_v22, %s4397_s17 }
 0x1a4   :  { %v1427_v23 = vld [vmem:[#allocation2 + $0x40] sm:$0xff] }
 0x1a5   :  { %1462 = vrot.lane.b32.xlu0 %v1427_v23, %s6134_s26  ;;  %1220 = vst.msk [vmem:[#allocation3 + $0x20] sm:$0xff] %vm90_vm0, %v1427_v23  ;;  %v1236_v25 = vld [vmem:[#allocation2 + $0x41] sm:$0xff] }
 0x1a6   :  { %v1713_v24 = vld [vmem:[#allocation2 + $0x30] sm:$0xff]  ;;  %v1619_v26 = vld [vmem:[#allocation2 + $0x42] sm:$0xff] }
 0x1a7   :  { %1648 = vrot.lane.b32.xlu1 %v1329_v22, %s4401_s21  ;;  %1219 = vst.msk [vmem:[#allocation3 + $0x18] sm:$0xff] %vm90_vm0, %v1713_v24  ;;  %v1235_v28 = vld [vmem:[#allocation2 + $0x31] sm:$0xff] }
 0x1a8   :  { %v1331_v31 = vld [vmem:[#allocation2 + $0x32] sm:$0xff] }
 0x1a9   :  { %1272 = vrot.lane.b32.xlu0 %v1236_v25, %s4398_s18 }
 0x1ab   :  { %1558 = vrot.lane.b32.xlu1 %v1236_v25, %s4400_s20 }
 0x1ad   :  { %1654 = vrot.lane.b32.xlu0 %v1619_v26, %s4401_s21 }
 0x1af   :  { %1368 = vrot.lane.b32.xlu1 %v1619_v26, %s4397_s17 }
 0x1b1   :  { %1270 = vrot.lane.b32.xlu0 %v1235_v28, %s4398_s18 }
 0x1b3   :  { %1748 = vrot.lane.b32.xlu1 %v1427_v23, %s4402_s22  ;;  %v5171_v23 = vld [vmem:[#allocation2 + $0x90] sm:$0xff] }
 0x1b5   :  { %1366 = vrot.lane.b32.xlu0 %v1331_v31, %s4397_s17 }
 0x1b7   :  { %1844 = vrot.lane.b32.xlu1 %v1236_v25, %s4403_s24 }
 0x1b8   :  { %v4155_v34 = vpop.f32.mrf.mxu0 }
 0x1b9   :  { %v1115_v35 = vadd.f32 %v4155_v34, %v5025_v59  ;;  %1746 = vrot.lane.b32.xlu0 %v1713_v24, %s4402_s22 }
 0x1ba   :  { %v1109_v3 = vpop.f32.mrf.mxu0 }
 0x1bb   :  { %1940 = vrot.lane.b32.xlu1 %v1619_v26, %s4404_s25  ;;  %v1173_v37 = vmax.f32 %v1115_v35, 0.0  ;;  %v1110_v38 = vadd.f32 %v5025_v59, %v1109_v3 }
 0x1bd   :  { %1189 = vst.msk [vmem:[#allocation2 + $0x61] sm:$0xff] %vm90_vm0, %v1173_v37  ;;  %v1172_v40 = vmax.f32 %v1110_v38, 0.0  ;;  %1842 = vrot.lane.b32.xlu0 %v1235_v28, %s4403_s24 }
 0x1bf   :  { %1460 = vrot.lane.b32.xlu1 %v1713_v24, %s6134_s26  ;;  %1188 = vst.msk [vmem:[#allocation2 + $0x51] sm:$0xff] %vm90_vm0, %v1172_v40 }
 0x1c1   :  { %1652 = vrot.lane.b32.xlu0 %v1331_v31, %s4401_s21 }
 0x1c3   :  { %1556 = vrot.lane.b32.xlu1 %v1235_v28, %s4400_s20 }
 0x1c4   :  { %v1429_v42 = vld [vmem:[#allocation2 + $0x60] sm:$0xff] }
 0x1c5   :  { %1466 = vrot.lane.b32.xlu0 %v1429_v42, %s6134_s26  ;;  %1222 = vst.msk [vmem:[#allocation3 + $0x30] sm:$0xff] %vm90_vm0, %v1429_v42  ;;  %v1238_v45 = vld [vmem:[#allocation2 + $0x61] sm:$0xff] }
 0x1c6   :  { %v1715_v43 = vld [vmem:[#allocation2 + $0x50] sm:$0xff]  ;;  %v1621_v46 = vld [vmem:[#allocation2 + $0x62] sm:$0xff] }
 0x1c7   :  { %1938 = vrot.lane.b32.xlu1 %v1331_v31, %s4404_s25  ;;  %1221 = vst.msk [vmem:[#allocation3 + $0x28] sm:$0xff] %vm90_vm0, %v1715_v43  ;;  %v1237_v47 = vld [vmem:[#allocation2 + $0x51] sm:$0xff] }
 0x1c8   :  { %v1333_v49 = vld [vmem:[#allocation2 + $0x52] sm:$0xff] }
 0x1c9   :  { %1276 = vrot.lane.b32.xlu0 %v1238_v45, %s4398_s18 }
 0x1cb   :  { %1562 = vrot.lane.b32.xlu1 %v1238_v45, %s4400_s20 }
 0x1cd   :  { %1658 = vrot.lane.b32.xlu0 %v1621_v46, %s4401_s21 }
 0x1cf   :  { %1372 = vrot.lane.b32.xlu1 %v1621_v46, %s4397_s17 }
 0x1d1   :  { %1274 = vrot.lane.b32.xlu0 %v1237_v47, %s4398_s18 }
 0x1d3   :  { %1752 = vrot.lane.b32.xlu1 %v1429_v42, %s4402_s22 }
 0x1d5   :  { %1370 = vrot.lane.b32.xlu0 %v1333_v49, %s4397_s17 }
 0x1d7   :  { %1848 = vrot.lane.b32.xlu1 %v1238_v45, %s4403_s24 }
 0x1d8   :  { %v4158_v50 = vpop.f32.mrf.mxu0 }
 0x1d9   :  { %v1125_v51 = vadd.f32 %v4158_v50, %v5025_v59  ;;  %1750 = vrot.lane.b32.xlu0 %v1715_v43, %s4402_s22 }
 0x1da   :  { %v1119_v52 = vpop.f32.mrf.mxu0 }
 0x1db   :  { %1464 = vrot.lane.b32.xlu1 %v1715_v43, %s6134_s26  ;;  %v1175_v53 = vmax.f32 %v1125_v51, 0.0  ;;  %v1120_v55 = vadd.f32 %v5025_v59, %v1119_v52 }
 0x1dd   :  { %1191 = vst.msk [vmem:[#allocation2 + $0x81] sm:$0xff] %vm90_vm0, %v1175_v53  ;;  %v1174_v56 = vmax.f32 %v1120_v55, 0.0  ;;  %1846 = vrot.lane.b32.xlu0 %v1237_v47, %s4403_s24 }
 0x1df   :  { %1560 = vrot.lane.b32.xlu1 %v1237_v47, %s4400_s20  ;;  %1190 = vst.msk [vmem:[#allocation2 + $0x71] sm:$0xff] %vm90_vm0, %v1174_v56 }
 0x1e1   :  { %1656 = vrot.lane.b32.xlu0 %v1333_v49, %s4401_s21 }
 0x1e3   :  { %1942 = vrot.lane.b32.xlu1 %v1333_v49, %s4404_s25 }
 0x1e4   :  { %v1431_v57 = vld [vmem:[#allocation2 + $0x80] sm:$0xff] }
 0x1e5   :  { %1470 = vrot.lane.b32.xlu0 %v1431_v57, %s6134_s26  ;;  %v1527_v48 = vld [vmem:[#allocation2 + $0x81] sm:$0xff] }
 0x1e6   :  { %v1430_v44 = vld [vmem:[#allocation2 + $0x70] sm:$0xff]  ;;  %v1623_v20 = vld [vmem:[#allocation2 + $0x82] sm:$0xff] }
 0x1e7   :  { %1468 = vrot.lane.b32.xlu1 %v1430_v44, %s6134_s26  ;;  %1223 = vst.msk [vmem:[#allocation3 + $0x38] sm:$0xff] %vm90_vm0, %v1430_v44  ;;  %v1239_v58 = vld [vmem:[#allocation2 + $0x71] sm:$0xff] }
 0x1e8   :  { %v1335_v61 = vld [vmem:[#allocation2 + $0x72] sm:$0xff] }
 0x1e9   :  { %1278 = vrot.lane.b32.xlu0 %v1239_v58, %s4398_s18 }
 0x1eb   :  { %1564 = vrot.lane.b32.xlu1 %v1239_v58, %s4400_s20 }
 0x1ed   :  { %1374 = vrot.lane.b32.xlu0 %v1335_v61, %s4397_s17 }
 0x1ef   :  { %1944 = vrot.lane.b32.xlu1 %v1621_v46, %s4404_s25 }
 0x1f1   :  { %1754 = vrot.lane.b32.xlu0 %v1430_v44, %s4402_s22 }
 0x1f3   :  { %1566 = vrot.lane.b32.xlu1 %v1527_v48, %s4400_s20 }
 0x1f5   :  { %1850 = vrot.lane.b32.xlu0 %v1239_v58, %s4403_s24 }
 0x1f7   :  { %1946 = vrot.lane.b32.xlu1 %v1335_v61, %s4404_s25 }
 0x1f8   :  { %v1555_v63 = vpop.permute.xlu0 %1554  ;;  %v4161_v2 = vpop.f32.mrf.mxu0 }
 0x1f9   :  { %v1459_v0 = vpop.permute.xlu1 %1458  ;;  %v1135_v5 = vadd.f32 %v4161_v2, %v5025_v59  ;;  %1280 = vrot.lane.b32.xlu0 %v5143_v62, %s4398_s18 }
 0x1fa   :  { %v1129_v6 = vpop.f32.mrf.mxu0 }
 0x1fb   :  { %v1177_v7 = vmax.f32 %v1135_v5, 0.0  ;;  %v1130_v8 = vadd.f32 %v5025_v59, %v1129_v6  ;;  %1376 = vrot.lane.b32.xlu1 %v5146_v4, %s4397_s17 }
 0x1fc   :  { %v1651_v9 = vpop.permute.xlu0 %1650 }
 0x1fd   :  { %v1269_v10 = vpop.permute.xlu1 %1268  ;;  %1193 = vst.msk [vmem:[#allocation2 + $0xc1] sm:$0xff] %vm90_vm0, %v1177_v7  ;;  %v1176_v11 = vmax.f32 %v1130_v8, 0.0  ;;  %1660 = vrot.lane.b32.xlu0 %v1335_v61, %s4401_s21 }
 0x1fe   :  { %1314 = vst.msk [vmem:[#allocation3 + $0x10] sm:$0xff] %vm244_vm2, %v1269_v10 }
 0x1ff   :  { %1192 = vst.msk [vmem:[#allocation2 + $0xb1] sm:$0xff] %vm90_vm0, %v1176_v11  ;;  %1756 = vrot.lane.b32.xlu1 %v1431_v57, %s4402_s22 }
 0x200   :  { %v1457_v14 = vpop.permute.xlu0 %1456 }
 0x201   :  { %v1365_v12 = vpop.permute.xlu1 %1364  ;;  %1504 = vst.msk [vmem:[#allocation3] sm:$0xff] %vm439_vm4, %v1457_v14 }
 0x202   :  { %1410 = vst.msk [vmem:[#allocation3 + $0x10] sm:$0xff] %vm341_vm3, %v1365_v12 }
 0x204   :  { %v1553_v16 = vpop.permute.xlu0 %1552  ;;  %v1433_v54 = vld [vmem:[#allocation2 + $0xc0] sm:$0xff] }
 0x205   :  { %v1745_v15 = vpop.permute.xlu1 %1744  ;;  %1600 = vst.msk [vmem:[#allocation3] sm:$0xff] %vm536_vm5, %v1553_v16  ;;  %v1529_v25 = vld [vmem:[#allocation2 + $0xc1] sm:$0xff] }
 0x206   :  { %1226 = vst.msk [vmem:[#allocation3 + $0x50] sm:$0xff] %vm90_vm0, %v1433_v54  ;;  %v1241_v17 = vld [vmem:[#allocation2 + $0xb1] sm:$0xff]  ;;  %v1338_v37 = vld [vmem:[#allocation2 + $0xc2] sm:$0xff] }
 0x207   :  { %v1432_v18 = vld [vmem:[#allocation2 + $0xb0] sm:$0xff]  ;;  %1282 = vrot.lane.b32.xlu0 %v1241_v17, %s4398_s18 }
 0x208   :  { %1472 = vrot.lane.b32.xlu1 %v1432_v18, %s6134_s26  ;;  %1225 = vst.msk [vmem:[#allocation3 + $0x48] sm:$0xff] %vm90_vm0, %v1432_v18  ;;  %v1337_v21 = vld [vmem:[#allocation2 + $0xb2] sm:$0xff] }
 0x209   :  { %v1841_v19 = vpop.permute.xlu1 %1840 }
 0x20b   :  { %1662 = vrot.lane.b32.xlu0 %v1623_v20, %s4401_s21 }
 0x20c   :  { %1852 = vrot.lane.b32.xlu1 %v1527_v48, %s4403_s24 }
 0x20d   :  { %v1937_v1 = vpop.permute.xlu1 %1936 }
 0x20f   :  { %1378 = vrot.lane.b32.xlu0 %v1337_v21, %s4397_s17 }
 0x210   :  { %1568 = vrot.lane.b32.xlu1 %v1241_v17, %s4400_s20 }
 0x211   :  { %v1267_v22 = vpop.permute.xlu1 %1266 }
 0x212   :  { %1313 = vst.msk [vmem:[#allocation3 + $0x8] sm:$0xff] %vm244_vm2, %v1267_v22 }
 0x213   :  { %1758 = vrot.lane.b32.xlu0 %v5171_v23, %s4402_s22 }
 0x214   :  { %1948 = vrot.lane.b32.xlu1 %v1623_v20, %s4404_s25 }
 0x215   :  { %v1363_v24 = vpop.permute.xlu1 %1362 }
 0x216   :  { %1409 = vst.msk [vmem:[#allocation3 + $0x8] sm:$0xff] %vm341_vm3, %v1363_v24 }
 0x217   :  { %1505 = vst.msk [vmem:[#allocation3 + $0x8] sm:$0xff] %vm439_vm4, %v1459_v0  ;;  %1474 = vrot.lane.b32.xlu0 %v1433_v54, %s6134_s26  ;;  %v1463_v26 = vpop.permute.xlu0 %1462 }
 0x218   :  { %1601 = vst.msk [vmem:[#allocation3 + $0x8] sm:$0xff] %vm536_vm5, %v1555_v63  ;;  %1570 = vrot.lane.b32.xlu1 %v1529_v25, %s4400_s20  ;;  %v4164_v28 = vpop.f32.mrf.mxu0 }
 0x219   :  { %1697 = vst.msk [vmem:[#allocation3 + $0x8] sm:$0xff] %vm633_vm6, %v1651_v9  ;;  %v1649_v27 = vpop.permute.xlu1 %1648  ;;  %v1145_v31 = vadd.f32 %v4164_v28, %v5025_v59 }
 0x21a   :  { %1696 = vst.msk [vmem:[#allocation3] sm:$0xff] %vm633_vm6, %v1649_v27  ;;  %v1139_v32 = vpop.f32.mrf.mxu0 }
 0x21b   :  { %1792 = vst.msk [vmem:[#allocation3] sm:$0xff] %vm731_vm7, %v1745_v15  ;;  %v1179_v33 = vmax.f32 %v1145_v31, 0.0  ;;  %v1140_v34 = vadd.f32 %v5025_v59, %v1139_v32  ;;  %1854 = vrot.lane.b32.xlu0 %v5183_v29, %s4403_s24  ;;  %v1273_v35 = vpop.permute.xlu0 %1272 }
 0x21c   :  { %1888 = vst.msk [vmem:[#allocation3] sm:$0xff] %vm828_vm8, %v1841_v19  ;;  %1950 = vrot.lane.b32.xlu1 %v5185_v30, %s4404_s25 }
 0x21d   :  { %1984 = vst.msk [vmem:[#allocation3] sm:$0xff] %vm925_vm9, %v1937_v1  ;;  %v1559_v36 = vpop.permute.xlu1 %1558  ;;  %v1178_v3 = vmax.f32 %v1140_v34, 0.0 }
 0x21e   :  { %1316 = vst.msk [vmem:[#allocation3 + $0x20] sm:$0xff] %vm244_vm2, %v1273_v35 }
 0x21f   :  { %1195 = vst.msk [vmem:[#allocation2 + $0xe1] sm:$0xff] %vm90_vm0, %v1179_v33  ;;  %1194 = vst.msk [vmem:[#allocation2 + $0xd1] sm:$0xff] %vm90_vm0, %v1178_v3  ;;  %1284 = vrot.lane.b32.xlu0 %v1529_v25, %s4398_s18  ;;  %v1655_v38 = vpop.permute.xlu0 %1654 }
 0x220   :  { %1380 = vrot.lane.b32.xlu1 %v1338_v37, %s4397_s17 }
 0x221   :  { %v1369_v39 = vpop.permute.xlu1 %1368 }
 0x222   :  { %1412 = vst.msk [vmem:[#allocation3 + $0x20] sm:$0xff] %vm341_vm3, %v1369_v39 }
 0x223   :  { %1664 = vrot.lane.b32.xlu0 %v1337_v21, %s4401_s21  ;;  %v1271_v41 = vpop.permute.xlu0 %1270 }
 0x224   :  { %v2000_v40 = vld [vmem:[#allocation3] sm:$0xff]  ;;  %1760 = vrot.lane.b32.xlu1 %v1433_v54, %s4402_s22  ;;  %1315 = vst.msk [vmem:[#allocation3 + $0x18] sm:$0xff] %vm244_vm2, %v1271_v41 }
 0x225   :  { %v1749_v13 = vpop.permute.xlu1 %1748  ;;  %4189 = vmatprep.mubr.msk.f32.mxu1 %vm974_vm10, %v2000_v40 }
 0x226   :  { %v5206_v42 = vld [vmem:[#allocation2 + $0xe0] sm:$0xff]  ;;  %v1243_v43 = vld [vmem:[#allocation2 + $0xd1] sm:$0xff] }
 0x227   :  { %1228 = vst.msk [vmem:[#allocation3 + $0x60] sm:$0xff] %vm90_vm0, %v5206_v42  ;;  %v1434_v45 = vld [vmem:[#allocation2 + $0xd0] sm:$0xff]  ;;  %1286 = vrot.lane.b32.xlu0 %v1243_v43, %s4398_s18  ;;  %v1367_v46 = vpop.permute.xlu0 %1366  ;;  %v1531_v57 = vld [vmem:[#allocation2 + $0xe1] sm:$0xff] }
 0x228   :  { %1476 = vrot.lane.b32.xlu1 %v1434_v45, %s6134_s26  ;;  %1227 = vst.msk [vmem:[#allocation3 + $0x58] sm:$0xff] %vm90_vm0, %v1434_v45  ;;  %v1339_v51 = vld [vmem:[#allocation2 + $0xd2] sm:$0xff]  ;;  %v1340_v8 = vld [vmem:[#allocation2 + $0xe2] sm:$0xff] }
 0x229   :  { %v1845_v47 = vpop.permute.xlu1 %1844  ;;  %1411 = vst.msk [vmem:[#allocation3 + $0x18] sm:$0xff] %vm341_vm3, %v1367_v46 }
 0x22a   :  { %1507 = vst.msk [vmem:[#allocation3 + $0x18] sm:$0xff] %vm439_vm4, %v1463_v26 }
 0x22b   :  { %1603 = vst.msk [vmem:[#allocation3 + $0x18] sm:$0xff] %vm536_vm5, %v1559_v36  ;;  %1666 = vrot.lane.b32.xlu0 %v1338_v37, %s4401_s21  ;;  %v1747_v49 = vpop.permute.xlu0 %1746 }
 0x22c   :  { %1699 = vst.msk [vmem:[#allocation3 + $0x18] sm:$0xff] %vm633_vm6, %v1655_v38  ;;  %1856 = vrot.lane.b32.xlu1 %v1529_v25, %s4403_s24 }
 0x22d   :  { %v1941_v50 = vpop.permute.xlu1 %1940  ;;  %1793 = vst.msk [vmem:[#allocation3 + $0x8] sm:$0xff] %vm731_vm7, %v1747_v49 }
 0x22f   :  { %1382 = vrot.lane.b32.xlu0 %v1339_v51, %s4397_s17  ;;  %v1843_v52 = vpop.permute.xlu0 %1842 }
 0x230   :  { %1572 = vrot.lane.b32.xlu1 %v1243_v43, %s4400_s20  ;;  %1889 = vst.msk [vmem:[#allocation3 + $0x8] sm:$0xff] %vm828_vm8, %v1843_v52 }
 0x231   :  { %v1461_v53 = vpop.permute.xlu1 %1460 }
 0x232   :  { %1506 = vst.msk [vmem:[#allocation3 + $0x10] sm:$0xff] %vm439_vm4, %v1461_v53 }
 0x233   :  { %1762 = vrot.lane.b32.xlu0 %v1434_v45, %s4402_s22  ;;  %v1653_v55 = vpop.permute.xlu0 %1652 }
 0x234   :  { %1952 = vrot.lane.b32.xlu1 %v1338_v37, %s4404_s25 }
 0x235   :  { %v1557_v56 = vpop.permute.xlu1 %1556 }
 0x236   :  { %1602 = vst.msk [vmem:[#allocation3 + $0x10] sm:$0xff] %vm536_vm5, %v1557_v56 }
 0x237   :  { %1698 = vst.msk [vmem:[#allocation3 + $0x10] sm:$0xff] %vm633_vm6, %v1653_v55  ;;  %1478 = vrot.lane.b32.xlu0 %v5206_v42, %s6134_s26  ;;  %v1467_v44 = vpop.permute.xlu0 %1466 }
 0x238   :  { %1794 = vst.msk [vmem:[#allocation3 + $0x10] sm:$0xff] %vm731_vm7, %v1749_v13  ;;  %1574 = vrot.lane.b32.xlu1 %v1531_v57, %s4400_s20 }
 0x239   :  { %1890 = vst.msk [vmem:[#allocation3 + $0x10] sm:$0xff] %vm828_vm8, %v1845_v47  ;;  %v1939_v58 = vpop.permute.xlu1 %1938  ;;  %v4167_v61 = vpop.f32.mrf.mxu0 }
 0x23a   :  { %1986 = vst.msk [vmem:[#allocation3 + $0x10] sm:$0xff] %vm925_vm9, %v1941_v50  ;;  %1985 = vst.msk [vmem:[#allocation3 + $0x8] sm:$0xff] %vm925_vm9, %v1939_v58  ;;  %v1155_v48 = vadd.f32 %v4167_v61, %v5025_v59 }
 0x23b   :  { %v1149_v63 = vpop.f32.mrf.mxu0  ;;  %1858 = vrot.lane.b32.xlu0 %v1243_v43, %s4403_s24  ;;  %v1277_v5 = vpop.permute.xlu0 %1276 }
 0x23c   :  { %v1181_v0 = vmax.f32 %v1155_v48, 0.0  ;;  %v1150_v2 = vadd.f32 %v5025_v59, %v1149_v63  ;;  %1954 = vrot.lane.b32.xlu1 %v1339_v51, %s4404_s25  ;;  %1318 = vst.msk [vmem:[#allocation3 + $0x30] sm:$0xff] %vm244_vm2, %v1277_v5  ;;  %v1727_v48 = vld [vmem:[#allocation2 + $0x130] sm:$0xff] }
 0x23d   :  { %v1563_v6 = vpop.permute.xlu1 %1562  ;;  %v1823_v5 = vld [vmem:[#allocation2 + $0x131] sm:$0xff] }
 0x23e   :  { %1197 = vst.msk [vmem:[#allocation2 + $0x101] sm:$0xff] %vm90_vm0, %v1181_v0  ;;  %v1180_v7 = vmax.f32 %v1150_v2, 0.0 }
 0x23f   :  { %1288 = vrot.lane.b32.xlu0 %v1531_v57, %s4398_s18  ;;  %v1659_v9 = vpop.permute.xlu0 %1658 }
 0x240   :  { %1196 = vst.msk [vmem:[#allocation2 + $0xf1] sm:$0xff] %vm90_vm0, %v1180_v7  ;;  %1384 = vrot.lane.b32.xlu1 %v1340_v8, %s4397_s17 }
 0x241   :  { %v1373_v10 = vpop.permute.xlu1 %1372  ;;  %v2001_v11 = vld [vmem:[#allocation3 + $0x8] sm:$0xff]  ;;  %v2002_v12 = vld [vmem:[#allocation3 + $0x10] sm:$0xff] }
 0x242   :  { %1414 = vst.msk [vmem:[#allocation3 + $0x30] sm:$0xff] %vm341_vm3, %v1373_v10  ;;  %4190 = vmatmul.mubr.msk.f32.vlgmr.msra.gmra.mxu1 %vm974_vm10, %v2001_v11 }
 0x243   :  { %4192 = vmatprep.mubr.msk.f32.mxu1 %vm974_vm10, %v2002_v12  ;;  %1668 = vrot.lane.b32.xlu0 %v1339_v51, %s4401_s21  ;;  %v1275_v14 = vpop.permute.xlu0 %1274 }
 0x244   :  { %1764 = vrot.lane.b32.xlu1 %v5206_v42, %s4402_s22  ;;  %1317 = vst.msk [vmem:[#allocation3 + $0x28] sm:$0xff] %vm244_vm2, %v1275_v14 }
 0x245   :  { %v1753_v15 = vpop.permute.xlu1 %1752  ;;  %v5251_v16 = vld [vmem:[#allocation2 + $0x100] sm:$0xff] }
 0x246   :  { %1230 = vst.msk [vmem:[#allocation3 + $0x70] sm:$0xff] %vm90_vm0, %v5251_v16  ;;  %v4170_v18 = vpop.f32.mrf.mxu0  ;;  %v1533_v35 = vld [vmem:[#allocation2 + $0x101] sm:$0xff] }
 0x247   :  { %v1245_v54 = vld [vmem:[#allocation2 + $0xf1] sm:$0xff]  ;;  %v1371_v19 = vpop.permute.xlu0 %1370  ;;  %v1165_v1 = vadd.f32 %v4170_v18, %v5025_v59  ;;  %v1342_v40 = vld [vmem:[#allocation2 + $0x102] sm:$0xff] }
 0x248   :  { %v1436_v17 = vld [vmem:[#allocation2 + $0xf0] sm:$0xff]  ;;  %1290 = vrot.lane.b32.xlu0 %v1245_v54, %s4398_s18  ;;  %1413 = vst.msk [vmem:[#allocation3 + $0x28] sm:$0xff] %vm341_vm3, %v1371_v19  ;;  %v1159_v21 = vpop.f32.mrf.mxu0 }
 0x249   :  { %1480 = vrot.lane.b32.xlu1 %v1436_v17, %s6134_s26  ;;  %v1849_v20 = vpop.permute.xlu1 %1848  ;;  %1229 = vst.msk [vmem:[#allocation3 + $0x68] sm:$0xff] %vm90_vm0, %v1436_v17  ;;  %v1183_v22 = vmax.f32 %v1165_v1, 0.0  ;;  %v1160_v24 = vadd.f32 %v5025_v59, %v1159_v21  ;;  %v1341_v59 = vld [vmem:[#allocation2 + $0xf2] sm:$0xff] }
 0x24a   :  { %1509 = vst.msk [vmem:[#allocation3 + $0x28] sm:$0xff] %vm439_vm4, %v1467_v44 }
 0x24b   :  { %1605 = vst.msk [vmem:[#allocation3 + $0x28] sm:$0xff] %vm536_vm5, %v1563_v6  ;;  %v1751_v25 = vpop.permute.xlu0 %1750  ;;  %v1182_v27 = vmax.f32 %v1160_v24, 0.0 }
 0x24c   :  { %1701 = vst.msk [vmem:[#allocation3 + $0x28] sm:$0xff] %vm633_vm6, %v1659_v9  ;;  %1670 = vrot.lane.b32.xlu0 %v1340_v8, %s4401_s21 }
 0x24d   :  { %1860 = vrot.lane.b32.xlu1 %v1531_v57, %s4403_s24  ;;  %v1465_v26 = vpop.permute.xlu1 %1464  ;;  %1199 = vst.msk [vmem:[#allocation2 + $0x121] sm:$0xff] %vm90_vm0, %v1183_v22  ;;  %1198 = vst.msk [vmem:[#allocation2 + $0x111] sm:$0xff] %vm90_vm0, %v1182_v27 }
 0x24e   :  { %1795 = vst.msk [vmem:[#allocation3 + $0x18] sm:$0xff] %vm731_vm7, %v1751_v25 }
 0x24f   :  { %1508 = vst.msk [vmem:[#allocation3 + $0x20] sm:$0xff] %vm439_vm4, %v1465_v26  ;;  %v1847_v28 = vpop.permute.xlu0 %1846 }
 0x250   :  { %1386 = vrot.lane.b32.xlu0 %v1341_v59, %s4397_s17  ;;  %1891 = vst.msk [vmem:[#allocation3 + $0x18] sm:$0xff] %vm828_vm8, %v1847_v28 }
 0x251   :  { %1576 = vrot.lane.b32.xlu1 %v1245_v54, %s4400_s20  ;;  %v1561_v31 = vpop.permute.xlu1 %1560 }
 0x252   :  { %1604 = vst.msk [vmem:[#allocation3 + $0x20] sm:$0xff] %vm536_vm5, %v1561_v31 }
 0x253   :  { %v1657_v32 = vpop.permute.xlu0 %1656 }
 0x254   :  { %1766 = vrot.lane.b32.xlu0 %v1436_v17, %s4402_s22  ;;  %1700 = vst.msk [vmem:[#allocation3 + $0x20] sm:$0xff] %vm633_vm6, %v1657_v32  ;;  %v1438_v34 = vld [vmem:[#allocation2 + $0x110] sm:$0xff]  ;;  %v1439_v57 = vld [vmem:[#allocation2 + $0x120] sm:$0xff] }
 0x255   :  { %1956 = vrot.lane.b32.xlu1 %v1340_v8, %s4404_s25  ;;  %v1943_v33 = vpop.permute.xlu1 %1942  ;;  %1796 = vst.msk [vmem:[#allocation3 + $0x20] sm:$0xff] %vm731_vm7, %v1753_v15  ;;  %v1247_v45 = vld [vmem:[#allocation2 + $0x111] sm:$0xff]  ;;  %v1631_v61 = vld [vmem:[#allocation2 + $0x122] sm:$0xff] }
 0x256   :  { %1987 = vst.msk [vmem:[#allocation3 + $0x18] sm:$0xff] %vm925_vm9, %v1943_v33  ;;  %v1343_v52 = vld [vmem:[#allocation2 + $0x112] sm:$0xff]  ;;  %v1535_v2 = vld [vmem:[#allocation2 + $0x121] sm:$0xff] }
 0x257   :  { %1231 = vst.msk [vmem:[#allocation3 + $0x78] sm:$0xff] %vm90_vm0, %v1438_v34  ;;  %v1471_v36 = vpop.permute.xlu0 %1470  ;;  %v1919_v8 = vld [vmem:[#allocation2 + $0x132] sm:$0xff] }
 0x258   :  { %1892 = vst.msk [vmem:[#allocation3 + $0x20] sm:$0xff] %vm828_vm8, %v1849_v20  ;;  %1482 = vrot.lane.b32.xlu0 %v5251_v16, %s6134_s26 }
 0x259   :  { %1578 = vrot.lane.b32.xlu1 %v1533_v35, %s4400_s20  ;;  %v1469_v3 = vpop.permute.xlu1 %1468 }
 0x25a   :  { %1510 = vst.msk [vmem:[#allocation3 + $0x30] sm:$0xff] %vm439_vm4, %v1469_v3 }
 0x25b   :  { %v1279_v37 = vpop.permute.xlu0 %1278 }
 0x25c   :  { %1862 = vrot.lane.b32.xlu0 %v1245_v54, %s4403_s24  ;;  %1319 = vst.msk [vmem:[#allocation3 + $0x38] sm:$0xff] %vm244_vm2, %v1279_v37  ;;  %v2289_v54 = vld [vmem:[#allocation2 + $0x1] sm:$0xff] }
 0x25d   :  { %1958 = vrot.lane.b32.xlu1 %v1341_v59, %s4404_s25  ;;  %v2003_v38 = vld [vmem:[#allocation3 + $0x18] sm:$0xff]  ;;  %v1565_v39 = vpop.permute.xlu1 %1564 }
 0x25e   :  { %4193 = vmatmul.mubr.msk.f32.gmra.mxu1 %vm974_vm10, %v2003_v38  ;;  %1606 = vst.msk [vmem:[#allocation3 + $0x30] sm:$0xff] %vm536_vm5, %v1565_v39 }
 0x25f   :  { %v1375_v41 = vpop.permute.xlu0 %1374 }
 0x260   :  { %1292 = vrot.lane.b32.xlu0 %v1533_v35, %s4398_s18  ;;  %1415 = vst.msk [vmem:[#allocation3 + $0x38] sm:$0xff] %vm341_vm3, %v1375_v41 }
 0x261   :  { %1388 = vrot.lane.b32.xlu1 %v1342_v40, %s4397_s17  ;;  %1511 = vst.msk [vmem:[#allocation3 + $0x38] sm:$0xff] %vm439_vm4, %v1471_v36  ;;  %v1945_v13 = vpop.permute.xlu1 %1944 }
 0x262   :  { %1988 = vst.msk [vmem:[#allocation3 + $0x20] sm:$0xff] %vm925_vm9, %v1945_v13 }
 0x263   :  { %v1755_v42 = vpop.permute.xlu0 %1754 }
 0x264   :  { %1672 = vrot.lane.b32.xlu0 %v1341_v59, %s4401_s21  ;;  %1797 = vst.msk [vmem:[#allocation3 + $0x28] sm:$0xff] %vm731_vm7, %v1755_v42 }
 0x265   :  { %1768 = vrot.lane.b32.xlu1 %v5251_v16, %s4402_s22  ;;  %v1567_v43 = vpop.permute.xlu1 %1566 }
 0x266   :  { %1607 = vst.msk [vmem:[#allocation3 + $0x38] sm:$0xff] %vm536_vm5, %v1567_v43 }
 0x267   :  { %v1851_v46 = vpop.permute.xlu0 %1850 }
 0x268   :  { %1294 = vrot.lane.b32.xlu0 %v1247_v45, %s4398_s18  ;;  %1893 = vst.msk [vmem:[#allocation3 + $0x28] sm:$0xff] %vm828_vm8, %v1851_v46 }
 0x269   :  { %1484 = vrot.lane.b32.xlu1 %v1438_v34, %s6134_s26  ;;  %v1947_v47 = vpop.permute.xlu1 %1946  ;;  %v2004_v49 = vld [vmem:[#allocation3 + $0x20] sm:$0xff] }
 0x26a   :  { %1989 = vst.msk [vmem:[#allocation3 + $0x28] sm:$0xff] %vm925_vm9, %v1947_v47  ;;  %4195 = vmatprep.mubr.msk.f32.mxu1 %vm974_vm10, %v2004_v49 }
 0x26b   :  { %v1281_v50 = vpop.permute.xlu0 %1280 }
 0x26c   :  { %1674 = vrot.lane.b32.xlu0 %v1342_v40, %s4401_s21  ;;  %1320 = vst.msk [vmem:[#allocation3 + $0x40] sm:$0xff] %vm244_vm2, %v1281_v50 }
 0x26d   :  { %1864 = vrot.lane.b32.xlu1 %v1533_v35, %s4403_s24  ;;  %v1377_v51 = vpop.permute.xlu1 %1376 }
 0x26e   :  { %1416 = vst.msk [vmem:[#allocation3 + $0x40] sm:$0xff] %vm341_vm3, %v1377_v51 }
 0x26f   :  { %v1661_v53 = vpop.permute.xlu0 %1660 }
 0x270   :  { %1390 = vrot.lane.b32.xlu0 %v1343_v52, %s4397_s17  ;;  %1702 = vst.msk [vmem:[#allocation3 + $0x30] sm:$0xff] %vm633_vm6, %v1661_v53 }
 0x271   :  { %1580 = vrot.lane.b32.xlu1 %v1247_v45, %s4400_s20  ;;  %v1757_v55 = vpop.permute.xlu1 %1756  ;;  %v2005_v56 = vld [vmem:[#allocation3 + $0x28] sm:$0xff] }
 0x272   :  { %1798 = vst.msk [vmem:[#allocation3 + $0x30] sm:$0xff] %vm731_vm7, %v1757_v55  ;;  %4196 = vmatmul.mubr.msk.f32.gmra.mxu1 %vm974_vm10, %v2005_v56 }
 0x274   :  { %1770 = vrot.lane.b32.xlu0 %v1438_v34, %s4402_s22 }
 0x275   :  { %1960 = vrot.lane.b32.xlu1 %v1342_v40, %s4404_s25 }
 0x278   :  { %1486 = vrot.lane.b32.xlu0 %v1439_v57, %s6134_s26 }
 0x279   :  { %1676 = vrot.lane.b32.xlu1 %v1343_v52, %s4401_s21  ;;  %v1283_v44 = vpop.permute.xlu0 %1282 }
 0x27a   :  { %v1473_v58 = vpop.permute.xlu1 %1472  ;;  %1321 = vst.msk [vmem:[#allocation3 + $0x48] sm:$0xff] %vm244_vm2, %v1283_v44 }
 0x27b   :  { %1512 = vst.msk [vmem:[#allocation3 + $0x40] sm:$0xff] %vm439_vm4, %v1473_v58 }
 0x27c   :  { %1866 = vrot.lane.b32.xlu0 %v1247_v45, %s4403_s24 }
 0x27d   :  { %1678 = vrot.lane.b32.xlu1 %v1631_v61, %s4401_s21  ;;  %v1663_v63 = vpop.permute.xlu0 %1662 }
 0x27e   :  { %v1853_v0 = vpop.permute.xlu1 %1852  ;;  %1703 = vst.msk [vmem:[#allocation3 + $0x38] sm:$0xff] %vm633_vm6, %v1663_v63 }
 0x27f   :  { %1894 = vst.msk [vmem:[#allocation3 + $0x30] sm:$0xff] %vm828_vm8, %v1853_v0 }
 0x280   :  { %1582 = vrot.lane.b32.xlu0 %v1535_v2, %s4400_s20 }
 0x281   :  { %1774 = vrot.lane.b32.xlu1 %v1727_v48, %s4402_s22  ;;  %v1379_v6 = vpop.permute.xlu0 %1378 }
 0x282   :  { %v1569_v7 = vpop.permute.xlu1 %1568  ;;  %1417 = vst.msk [vmem:[#allocation3 + $0x48] sm:$0xff] %vm341_vm3, %v1379_v6 }
 0x283   :  { %1608 = vst.msk [vmem:[#allocation3 + $0x40] sm:$0xff] %vm536_vm5, %v1569_v7 }
 0x284   :  { %1962 = vrot.lane.b32.xlu0 %v1343_v52, %s4404_s25 }
 0x285   :  { %1870 = vrot.lane.b32.xlu1 %v1823_v5, %s4403_s24  ;;  %v1759_v9 = vpop.permute.xlu0 %1758  ;;  %v2257_v5 = vld [vmem:[#allocation2] sm:$0xff] }
 0x286   :  { %v1949_v10 = vpop.permute.xlu1 %1948  ;;  %1799 = vst.msk [vmem:[#allocation3 + $0x38] sm:$0xff] %vm731_vm7, %v1759_v9 }
 0x287   :  { %1990 = vst.msk [vmem:[#allocation3 + $0x30] sm:$0xff] %vm925_vm9, %v1949_v10 }
 0x288   :  { %1772 = vrot.lane.b32.xlu0 %v1439_v57, %s4402_s22  ;;  %2273 = vst.msk [vmem:[#allocation3] sm:$0xff] %vm90_vm0, %v2257_v5 }
 0x289   :  { %1966 = vrot.lane.b32.xlu1 %v1919_v8, %s4404_s25  ;;  %v1475_v11 = vpop.permute.xlu0 %1474 }
 0x28a   :  { %v1571_v12 = vpop.permute.xlu1 %1570  ;;  %1513 = vst.msk [vmem:[#allocation3 + $0x48] sm:$0xff] %vm439_vm4, %v1475_v11 }
 0x28b   :  { %1609 = vst.msk [vmem:[#allocation3 + $0x48] sm:$0xff] %vm536_vm5, %v1571_v12 }
 0x28c   :  { %1868 = vrot.lane.b32.xlu0 %v1535_v2, %s4403_s24 }
 0x28d   :  { %2433 = vrot.lane.b32.xlu1 %v5146_v4, %s4397_s17  ;;  %v1855_v14 = vpop.permute.xlu0 %1854  ;;  %v2385_v4 = vld [vmem:[#allocation2 + $0x2] sm:$0xff] }
 0x28e   :  { %v1951_v15 = vpop.permute.xlu1 %1950  ;;  %v2006_v16 = vld [vmem:[#allocation3 + $0x30] sm:$0xff]  ;;  %1895 = vst.msk [vmem:[#allocation3 + $0x38] sm:$0xff] %vm828_vm8, %v1855_v14 }
 0x28f   :  { %4198 = vmatprep.mubr.msk.f32.mxu1 %vm974_vm10, %v2006_v16  ;;  %1991 = vst.msk [vmem:[#allocation3 + $0x38] sm:$0xff] %vm925_vm9, %v1951_v15 }
 0x290   :  { %1964 = vrot.lane.b32.xlu0 %v1631_v61, %s4404_s25 }
 0x291   :  { %3007 = vrot.lane.b32.xlu1 %v5185_v30, %s4404_s25  ;;  %v1285_v17 = vpop.permute.xlu0 %1284 }
 0x292   :  { %v1381_v18 = vpop.permute.xlu1 %1380  ;;  %1322 = vst.msk [vmem:[#allocation3 + $0x50] sm:$0xff] %vm244_vm2, %v1285_v17  ;;  %v5421_v17 = vld [vmem:[%s6120_s4] ss:$0 sm:$0xff] }
 0x293   :  { %1418 = vst.msk [vmem:[#allocation3 + $0x50] sm:$0xff] %vm341_vm3, %v1381_v18 }
 0x294   :  { %2321 = vrot.lane.b32.xlu0 %v2289_v54, %s4398_s18 }
 0x295   :  { %v1665_v19 = vpop.permute.xlu0 %1664 }
 0x296   :  { %v1761_v20 = vpop.permute.xlu1 %1760  ;;  %1704 = vst.msk [vmem:[#allocation3 + $0x40] sm:$0xff] %vm633_vm6, %v1665_v19  ;;  %v2007_v1 = vld [vmem:[#allocation3 + $0x38] sm:$0xff] }
 0x297   :  { %1800 = vst.msk [vmem:[#allocation3 + $0x40] sm:$0xff] %vm731_vm7, %v1761_v20  ;;  %4199 = vmatmul.mubr.msk.f32.gmra.mxu1 %vm974_vm10, %v2007_v1 }
 0x298   :  { %2417 = vrot.lane.b32.xlu0 %v2385_v4, %s4397_s17 }
 0x299   :  { %v1287_v30 = vpop.permute.xlu0 %1286 }
 0x29a   :  { %v1477_v21 = vpop.permute.xlu1 %1476  ;;  %1323 = vst.msk [vmem:[#allocation3 + $0x58] sm:$0xff] %vm244_vm2, %v1287_v30 }
 0x29b   :  { %1514 = vst.msk [vmem:[#allocation3 + $0x50] sm:$0xff] %vm439_vm4, %v1477_v21 }
 0x29c   :  { %2337 = vrot.lane.b32.xlu0 %v5143_v62, %s4398_s18 }
 0x29d   :  { %v1667_v22 = vpop.permute.xlu0 %1666 }
 0x29e   :  { %v1857_v24 = vpop.permute.xlu1 %1856  ;;  %1705 = vst.msk [vmem:[#allocation3 + $0x48] sm:$0xff] %vm633_vm6, %v1667_v22 }
 0x29f   :  { %1896 = vst.msk [vmem:[#allocation3 + $0x40] sm:$0xff] %vm828_vm8, %v1857_v24 }
 0x2a0   :  { %2815 = vrot.lane.b32.xlu0 %v5171_v23, %s4402_s22 }
 0x2a1   :  { %v1383_v25 = vpop.permute.xlu0 %1382 }
 0x2a2   :  { %v1573_v26 = vpop.permute.xlu1 %1572  ;;  %1419 = vst.msk [vmem:[#allocation3 + $0x58] sm:$0xff] %vm341_vm3, %v1383_v25 }
 0x2a3   :  { %1610 = vst.msk [vmem:[#allocation3 + $0x50] sm:$0xff] %vm536_vm5, %v1573_v26 }
 0x2a4   :  { %2911 = vrot.lane.b32.xlu0 %v5183_v29, %s4403_s24 }
 0x2a5   :  { %v1763_v27 = vpop.permute.xlu0 %1762 }
 0x2a6   :  { %v1953_v62 = vpop.permute.xlu1 %1952  ;;  %1801 = vst.msk [vmem:[#allocation3 + $0x48] sm:$0xff] %vm731_vm7, %v1763_v27 }
 0x2a7   :  { %1992 = vst.msk [vmem:[#allocation3 + $0x40] sm:$0xff] %vm925_vm9, %v1953_v62 }
 0x2a9   :  { %v1479_v59 = vpop.permute.xlu0 %1478 }
 0x2aa   :  { %v1575_v28 = vpop.permute.xlu1 %1574  ;;  %1515 = vst.msk [vmem:[#allocation3 + $0x58] sm:$0xff] %vm439_vm4, %v1479_v59 }
 0x2ab   :  { %1611 = vst.msk [vmem:[#allocation3 + $0x58] sm:$0xff] %vm536_vm5, %v1575_v28 }
 0x2ad   :  { %v1859_v23 = vpop.permute.xlu0 %1858 }
 0x2ae   :  { %v1955_v31 = vpop.permute.xlu1 %1954  ;;  %v2008_v32 = vld [vmem:[#allocation3 + $0x40] sm:$0xff]  ;;  %1897 = vst.msk [vmem:[#allocation3 + $0x48] sm:$0xff] %vm828_vm8, %v1859_v23 }
 0x2af   :  { %4201 = vmatprep.mubr.msk.f32.mxu1 %vm974_vm10, %v2008_v32  ;;  %2281 = vst.msk [vmem:[#allocation3 + $0x40] sm:$0xff] %vm90_vm0, %v5134_v60 }
 0x2b0   :  { %1993 = vst.msk [vmem:[#allocation3 + $0x48] sm:$0xff] %vm925_vm9, %v1955_v31 }
 0x2b1   :  { %v1289_v29 = vpop.permute.xlu0 %1288 }
 0x2b2   :  { %v1385_v33 = vpop.permute.xlu1 %1384  ;;  %1324 = vst.msk [vmem:[#allocation3 + $0x60] sm:$0xff] %vm244_vm2, %v1289_v29 }
 0x2b3   :  { %1420 = vst.msk [vmem:[#allocation3 + $0x60] sm:$0xff] %vm341_vm3, %v1385_v33 }
 0x2b5   :  { %v1669_v34 = vpop.permute.xlu0 %1668 }
 0x2b6   :  { %v1765_v35 = vpop.permute.xlu1 %1764  ;;  %1706 = vst.msk [vmem:[#allocation3 + $0x50] sm:$0xff] %vm633_vm6, %v1669_v34 }
 0x2b7   :  { %v2009_v36 = vld [vmem:[#allocation3 + $0x48] sm:$0xff]  ;;  %1802 = vst.msk [vmem:[#allocation3 + $0x50] sm:$0xff] %vm731_vm7, %v1765_v35 }
 0x2b8   :  { %4202 = vmatmul.mubr.msk.f32.gmra.mxu1 %vm974_vm10, %v2009_v36 }
 0x2ba   :  { %v1291_v3 = vpop.permute.xlu0 %1290 }
 0x2bb   :  { %v1481_v37 = vpop.permute.xlu1 %1480  ;;  %1325 = vst.msk [vmem:[#allocation3 + $0x68] sm:$0xff] %vm244_vm2, %v1291_v3 }
 0x2bc   :  { %1516 = vst.msk [vmem:[#allocation3 + $0x60] sm:$0xff] %vm439_vm4, %v1481_v37 }
 0x2be   :  { %v1671_v60 = vpop.permute.xlu0 %1670 }
 0x2bf   :  { %v1861_v38 = vpop.permute.xlu1 %1860  ;;  %1707 = vst.msk [vmem:[#allocation3 + $0x58] sm:$0xff] %vm633_vm6, %v1671_v60 }
 0x2c0   :  { %1898 = vst.msk [vmem:[#allocation3 + $0x50] sm:$0xff] %vm828_vm8, %v1861_v38 }
 0x2c2   :  { %v1387_v39 = vpop.permute.xlu0 %1386 }
 0x2c3   :  { %v1577_v40 = vpop.permute.xlu1 %1576  ;;  %1421 = vst.msk [vmem:[#allocation3 + $0x68] sm:$0xff] %vm341_vm3, %v1387_v39 }
 0x2c4   :  { %1612 = vst.msk [vmem:[#allocation3 + $0x60] sm:$0xff] %vm536_vm5, %v1577_v40 }
 0x2c6   :  { %v1767_v41 = vpop.permute.xlu0 %1766 }
 0x2c7   :  { %v1957_v13 = vpop.permute.xlu1 %1956  ;;  %1803 = vst.msk [vmem:[#allocation3 + $0x58] sm:$0xff] %vm731_vm7, %v1767_v41 }
 0x2c8   :  { %1994 = vst.msk [vmem:[#allocation3 + $0x50] sm:$0xff] %vm925_vm9, %v1957_v13 }
 0x2ca   :  { %v1483_v42 = vpop.permute.xlu0 %1482 }
 0x2cb   :  { %v1579_v43 = vpop.permute.xlu1 %1578  ;;  %1517 = vst.msk [vmem:[#allocation3 + $0x68] sm:$0xff] %vm439_vm4, %v1483_v42 }
 0x2cc   :  { %1613 = vst.msk [vmem:[#allocation3 + $0x68] sm:$0xff] %vm536_vm5, %v1579_v43 }
 0x2ce   :  { %v1863_v45 = vpop.permute.xlu0 %1862 }
 0x2cf   :  { %v1959_v46 = vpop.permute.xlu1 %1958  ;;  %v2010_v47 = vld [vmem:[#allocation3 + $0x50] sm:$0xff]  ;;  %1899 = vst.msk [vmem:[#allocation3 + $0x58] sm:$0xff] %vm828_vm8, %v1863_v45 }
 0x2d0   :  { %4204 = vmatprep.mubr.msk.f32.mxu1 %vm974_vm10, %v2010_v47  ;;  %1995 = vst.msk [vmem:[#allocation3 + $0x58] sm:$0xff] %vm925_vm9, %v1959_v46  ;;  %v3081_v47 = vld [vmem:[%s6121_s5 + $0x40] sm:$0xff] }
 0x2d1   :  { %4213 = vmatprep.subr.mxu0 %v3081_v47 }
 0x2d2   :  { %v1293_v49 = vpop.permute.xlu0 %1292  ;;  %4214 = vmatpush3.msra.mxu0 %v3081_v47 }
 0x2d3   :  { %v1389_v50 = vpop.permute.xlu1 %1388  ;;  %1326 = vst.msk [vmem:[#allocation3 + $0x70] sm:$0xff] %vm244_vm2, %v1293_v49 }
 0x2d4   :  { %1422 = vst.msk [vmem:[#allocation3 + $0x70] sm:$0xff] %vm341_vm3, %v1389_v50 }
 0x2d6   :  { %v1673_v51 = vpop.permute.xlu0 %1672 }
 0x2d7   :  { %v1769_v52 = vpop.permute.xlu1 %1768  ;;  %1708 = vst.msk [vmem:[#allocation3 + $0x60] sm:$0xff] %vm633_vm6, %v1673_v51  ;;  %v2011_v53 = vld [vmem:[#allocation3 + $0x58] sm:$0xff] }
 0x2d8   :  { %1804 = vst.msk [vmem:[#allocation3 + $0x60] sm:$0xff] %vm731_vm7, %v1769_v52  ;;  %4205 = vmatmul.mubr.msk.f32.gmra.mxu1 %vm974_vm10, %v2011_v53  ;;  %v3080_v51 = vld [vmem:[%s6121_s5 + $0x38] sm:$0xff]  ;;  %v3079_v52 = vld [vmem:[%s6121_s5 + $0x30] sm:$0xff]  ;;  %v3078_v53 = vld [vmem:[%s6121_s5 + $0x28] sm:$0xff] }
 0x2d9   :  { %4215 = vmatprep.subr.mxu0 %v3080_v51 }
 0x2da   :  { %v1295_v55 = vpop.permute.xlu0 %1294  ;;  %4216 = vmatpush3.msra.mxu0 %v3080_v51 }
 0x2db   :  { %v1485_v56 = vpop.permute.xlu1 %1484  ;;  %1327 = vst.msk [vmem:[#allocation3 + $0x78] sm:$0xff] %vm244_vm2, %v1295_v55  ;;  %4217 = vmatprep.subr.mxu0 %v3079_v52 }
 0x2dc   :  { %1518 = vst.msk [vmem:[#allocation3 + $0x70] sm:$0xff] %vm439_vm4, %v1485_v56  ;;  %4218 = vmatpush3.msra.mxu0 %v3079_v52  ;;  %v3077_v56 = vld [vmem:[%s6121_s5 + $0x20] sm:$0xff] }
 0x2dd   :  { %4219 = vmatprep.subr.mxu0 %v3078_v53 }
 0x2de   :  { %v1675_v57 = vpop.permute.xlu0 %1674  ;;  %4220 = vmatpush3.msra.mxu0 %v3078_v53 }
 0x2df   :  { %v1865_v44 = vpop.permute.xlu1 %1864  ;;  %1709 = vst.msk [vmem:[#allocation3 + $0x68] sm:$0xff] %vm633_vm6, %v1675_v57  ;;  %4221 = vmatprep.subr.mxu0 %v3077_v56 }
 0x2e0   :  { %1900 = vst.msk [vmem:[#allocation3 + $0x60] sm:$0xff] %vm828_vm8, %v1865_v44  ;;  %v3076_v44 = vld [vmem:[%s6121_s5 + $0x18] sm:$0xff]  ;;  %4222 = vmatpush3.msra.mxu0 %v3077_v56 }
 0x2e1   :  { %4223 = vmatprep.subr.mxu0 %v3076_v44 }
 0x2e2   :  { %v1391_v58 = vpop.permute.xlu0 %1390  ;;  %4224 = vmatpush3.msra.mxu0 %v3076_v44 }
 0x2e3   :  { %v1581_v61 = vpop.permute.xlu1 %1580  ;;  %1423 = vst.msk [vmem:[#allocation3 + $0x78] sm:$0xff] %vm341_vm3, %v1391_v58  ;;  %v3075_v58 = vld [vmem:[%s6121_s5 + $0x10] sm:$0xff] }
 0x2e4   :  { %1614 = vst.msk [vmem:[#allocation3 + $0x70] sm:$0xff] %vm536_vm5, %v1581_v61  ;;  %4225 = vmatprep.subr.mxu0 %v3075_v58  ;;  %v3074_v61 = vld [vmem:[%s6121_s5 + $0x8] sm:$0xff] }
 0x2e5   :  { %4226 = vmatpush3.msra.mxu0 %v3075_v58 }
 0x2e6   :  { %v1771_v48 = vpop.permute.xlu0 %1770  ;;  %4227 = vmatprep.subr.mxu0 %v3074_v61 }
 0x2e7   :  { %v1961_v63 = vpop.permute.xlu1 %1960  ;;  %1805 = vst.msk [vmem:[#allocation3 + $0x68] sm:$0xff] %vm731_vm7, %v1771_v48  ;;  %v3073_v48 = vld [vmem:[%s6121_s5] sm:$0xff]  ;;  %4228 = vmatpush3.msra.mxu0 %v3074_v61 }
 0x2e8   :  { %1996 = vst.msk [vmem:[#allocation3 + $0x60] sm:$0xff] %vm925_vm9, %v1961_v63  ;;  %4229 = vmatprep.subr.mxu0 %v3073_v48 }
 0x2e9   :  { %4230 = vmatpush3.msra.mxu0 %v3073_v48 }
 0x2ea   :  { %v1487_v0 = vpop.permute.xlu0 %1486 }
 0x2eb   :  { %v1677_v2 = vpop.permute.xlu1 %1676  ;;  %1519 = vst.msk [vmem:[#allocation3 + $0x78] sm:$0xff] %vm439_vm4, %v1487_v0 }
 0x2ec   :  { %1710 = vst.msk [vmem:[#allocation3 + $0x70] sm:$0xff] %vm633_vm6, %v1677_v2 }
 0x2ee   :  { %v1867_v6 = vpop.permute.xlu0 %1866 }
 0x2ef   :  { %v1679_v7 = vpop.permute.xlu1 %1678  ;;  %v2012_v8 = vld [vmem:[#allocation3 + $0x60] sm:$0xff]  ;;  %1901 = vst.msk [vmem:[#allocation3 + $0x68] sm:$0xff] %vm828_vm8, %v1867_v6 }
 0x2f0   :  { %4207 = vmatprep.mubr.msk.f32.mxu1 %vm974_vm10, %v2012_v8 }
 0x2f2   :  { %v1583_v9 = vpop.permute.xlu0 %1582 }
 0x2f3   :  { %v1775_v10 = vpop.permute.xlu1 %1774  ;;  %1615 = vst.msk [vmem:[#allocation3 + $0x78] sm:$0xff] %vm536_vm5, %v1583_v9 }
 0x2f4   :  { %1711 = vst.msk [vmem:[#allocation3 + $0x78] sm:$0xff] %vm633_vm6, %v1679_v7 }
 0x2f5   :  { %1807 = vst.msk [vmem:[#allocation3 + $0x78] sm:$0xff] %vm731_vm7, %v1775_v10 }
 0x2f6   :  { %v1963_v11 = vpop.permute.xlu0 %1962 }
 0x2f7   :  { %v1871_v12 = vpop.permute.xlu1 %1870  ;;  %1997 = vst.msk [vmem:[#allocation3 + $0x68] sm:$0xff] %vm925_vm9, %v1963_v11 }
 0x2f8   :  { %1903 = vst.msk [vmem:[#allocation3 + $0x78] sm:$0xff] %vm828_vm8, %v1871_v12 }
 0x2fa   :  { %v1773_v14 = vpop.permute.xlu0 %1772 }
 0x2fb   :  { %v1967_v15 = vpop.permute.xlu1 %1966  ;;  %1806 = vst.msk [vmem:[#allocation3 + $0x70] sm:$0xff] %vm731_vm7, %v1773_v14 }
 0x2fc   :  { %1999 = vst.msk [vmem:[#allocation3 + $0x78] sm:$0xff] %vm925_vm9, %v1967_v15 }
 0x2fe   :  { %v1869_v16 = vpop.permute.xlu0 %1868  ;;  %v2013_v54 = vld [vmem:[#allocation3 + $0x68] sm:$0xff] }
 0x2ff   :  { %1902 = vst.msk [vmem:[#allocation3 + $0x70] sm:$0xff] %vm828_vm8, %v1869_v16  ;;  %4208 = vmatmul.mubr.msk.f32.gmra.mxu1 %vm974_vm10, %v2013_v54  ;;  %v2434_v23 = vpop.permute.xlu1 %2433 }
 0x302   :  { %v4191_v18 = vpop.f32.mrf.mxu1  ;;  %v1965_v19 = vpop.permute.xlu0 %1964 }
 0x303   :  { %v2152_v4 = vadd.f32 %v4191_v18, %v5421_v17  ;;  %1998 = vst.msk [vmem:[#allocation3 + $0x70] sm:$0xff] %vm925_vm9, %v1965_v19  ;;  %v2015_v24 = vld [vmem:[#allocation3 + $0x78] sm:$0xff] }
 0x304   :  { %v2146_v20 = vpop.f32.mrf.mxu1 }
 0x305   :  { %v2226_v1 = vmax.f32 %v2152_v4, 0.0  ;;  %v2147_v30 = vadd.f32 %v5421_v17, %v2146_v20 }
 0x306   :  { %v2322_v22 = vpop.permute.xlu0 %2321 }
 0x307   :  { %2242 = vst.msk [vmem:[#allocation2 + $0x21] sm:$0xff] %vm90_vm0, %v2226_v1  ;;  %v2225_v21 = vmax.f32 %v2147_v30, 0.0  ;;  %v5534_v1 = vpop.permute.xlu1 %3007 }
 0x308   :  { %2369 = vst.msk [vmem:[#allocation3] sm:$0xff] %vm244_vm2, %v2322_v22 }
 0x309   :  { %2241 = vst.msk [vmem:[#allocation2 + $0x11] sm:$0xff] %vm90_vm0, %v2225_v21 }
 0x30a   :  { %v2014_v25 = vld [vmem:[#allocation3 + $0x70] sm:$0xff]  ;;  %v2418_v26 = vpop.permute.xlu0 %2417 }
 0x30b   :  { %4210 = vmatprep.mubr.msk.f32.mxu1 %vm974_vm10, %v2014_v25  ;;  %2465 = vst.msk [vmem:[#allocation3] sm:$0xff] %vm341_vm3, %v2418_v26 }
 0x30c   :  { %4211 = vmatmul.mubr.msk.f32.gmra.mxu1 %vm974_vm10, %v2015_v24 }
 0x30e   :  { %v2578_v27 = vld [vmem:[#allocation2 + $0x21] sm:$0xff]  ;;  %v2338_v59 = vpop.permute.xlu0 %2337 }
 0x30f   :  { %v2482_v62 = vld [vmem:[#allocation2 + $0x20] sm:$0xff]  ;;  %2611 = vrot.lane.b32.xlu0 %v2578_v27, %s4400_s20  ;;  %2377 = vst.msk [vmem:[#allocation3 + $0x40] sm:$0xff] %vm244_vm2, %v2338_v59 }
 0x310   :  { %2515 = vrot.lane.b32.xlu1 %v2482_v62, %s6134_s26  ;;  %2275 = vst.msk [vmem:[#allocation3 + $0x10] sm:$0xff] %vm90_vm0, %v2482_v62  ;;  %v2481_v28 = vld [vmem:[#allocation2 + $0x10] sm:$0xff]  ;;  %v2674_v31 = vld [vmem:[#allocation2 + $0x22] sm:$0xff] }
 0x311   :  { %2473 = vst.msk [vmem:[#allocation3 + $0x40] sm:$0xff] %vm341_vm3, %v2434_v23  ;;  %v2577_v32 = vld [vmem:[#allocation2 + $0x11] sm:$0xff] }
 0x312   :  { %2274 = vst.msk [vmem:[#allocation3 + $0x8] sm:$0xff] %vm90_vm0, %v2481_v28  ;;  %v2386_v60 = vld [vmem:[#allocation2 + $0x12] sm:$0xff]  ;;  %v5529_v18 = vpop.permute.xlu0 %2815 }
 0x313   :  { %2707 = vrot.lane.b32.xlu0 %v2674_v31, %s4401_s21 }
 0x314   :  { %2325 = vrot.lane.b32.xlu1 %v2578_v27, %s4398_s18 }
 0x316   :  { %v5538_v21 = vpop.permute.xlu0 %2911 }
 0x317   :  { %2513 = vrot.lane.b32.xlu0 %v2481_v28, %s6134_s26 }
 0x318   :  { %2421 = vrot.lane.b32.xlu1 %v2674_v31, %s4397_s17 }
 0x31b   :  { %2609 = vrot.lane.b32.xlu0 %v2577_v32, %s4400_s20 }
 0x31c   :  { %2801 = vrot.lane.b32.xlu1 %v2482_v62, %s4402_s22 }
 0x31e   :  { %v4194_v29 = vpop.f32.mrf.mxu1 }
 0x31f   :  { %v2162_v33 = vadd.f32 %v4194_v29, %v5421_v17 }
 0x320   :  { %2897 = vrot.lane.b32.xlu1 %v2578_v27, %s4403_s24  ;;  %v2156_v34 = vpop.f32.mrf.mxu1 }
 0x321   :  { %v2228_v35 = vmax.f32 %v2162_v33, 0.0  ;;  %v2157_v36 = vadd.f32 %v5421_v17, %v2156_v34 }
 0x323   :  { %2244 = vst.msk [vmem:[#allocation2 + $0x41] sm:$0xff] %vm90_vm0, %v2228_v35  ;;  %v2227_v3 = vmax.f32 %v2157_v36, 0.0 }
 0x324   :  { %2993 = vrot.lane.b32.xlu1 %v2674_v31, %s4404_s25 }
 0x325   :  { %2243 = vst.msk [vmem:[#allocation2 + $0x31] sm:$0xff] %vm90_vm0, %v2227_v3 }
 0x328   :  { %2323 = vrot.lane.b32.xlu1 %v2577_v32, %s4398_s18 }
 0x32a   :  { %v2484_v37 = vld [vmem:[#allocation2 + $0x40] sm:$0xff] }
 0x32b   :  { %2519 = vrot.lane.b32.xlu0 %v2484_v37, %s6134_s26  ;;  %2277 = vst.msk [vmem:[#allocation3 + $0x20] sm:$0xff] %vm90_vm0, %v2484_v37  ;;  %v2293_v39 = vld [vmem:[#allocation2 + $0x41] sm:$0xff] }
 0x32c   :  { %2419 = vrot.lane.b32.xlu1 %v2386_v60, %s4397_s17  ;;  %v2770_v38 = vld [vmem:[#allocation2 + $0x30] sm:$0xff]  ;;  %v2676_v40 = vld [vmem:[#allocation2 + $0x42] sm:$0xff] }
 0x32d   :  { %2276 = vst.msk [vmem:[#allocation3 + $0x18] sm:$0xff] %vm90_vm0, %v2770_v38  ;;  %v2292_v43 = vld [vmem:[#allocation2 + $0x31] sm:$0xff] }
 0x32e   :  { %v2388_v50 = vld [vmem:[#allocation2 + $0x32] sm:$0xff] }
 0x32f   :  { %2329 = vrot.lane.b32.xlu0 %v2293_v39, %s4398_s18 }
 0x330   :  { %2705 = vrot.lane.b32.xlu1 %v2386_v60, %s4401_s21 }
 0x332   :  { %v4197_v41 = vpop.f32.mrf.mxu1 }
 0x333   :  { %2711 = vrot.lane.b32.xlu0 %v2676_v40, %s4401_s21  ;;  %v2172_v13 = vadd.f32 %v4197_v41, %v5421_v17 }
 0x334   :  { %2615 = vrot.lane.b32.xlu1 %v2293_v39, %s4400_s20  ;;  %v2166_v42 = vpop.f32.mrf.mxu1 }
 0x335   :  { %v2230_v45 = vmax.f32 %v2172_v13, 0.0  ;;  %v2167_v46 = vadd.f32 %v5421_v17, %v2166_v42 }
 0x337   :  { %2327 = vrot.lane.b32.xlu0 %v2292_v43, %s4398_s18  ;;  %2246 = vst.msk [vmem:[#allocation2 + $0x61] sm:$0xff] %vm90_vm0, %v2230_v45  ;;  %v2229_v49 = vmax.f32 %v2167_v46, 0.0 }
 0x338   :  { %2425 = vrot.lane.b32.xlu1 %v2676_v40, %s4397_s17 }
 0x339   :  { %2245 = vst.msk [vmem:[#allocation2 + $0x51] sm:$0xff] %vm90_vm0, %v2229_v49 }
 0x33b   :  { %2423 = vrot.lane.b32.xlu0 %v2388_v50, %s4397_s17 }
 0x33c   :  { %2805 = vrot.lane.b32.xlu1 %v2484_v37, %s4402_s22 }
 0x33e   :  { %v2486_v55 = vld [vmem:[#allocation2 + $0x60] sm:$0xff] }
 0x33f   :  { %2803 = vrot.lane.b32.xlu0 %v2770_v38, %s4402_s22  ;;  %2279 = vst.msk [vmem:[#allocation3 + $0x30] sm:$0xff] %vm90_vm0, %v2486_v55  ;;  %v2295_v63 = vld [vmem:[#allocation2 + $0x61] sm:$0xff] }
 0x340   :  { %2901 = vrot.lane.b32.xlu1 %v2293_v39, %s4403_s24  ;;  %v2772_v57 = vld [vmem:[#allocation2 + $0x50] sm:$0xff]  ;;  %v2678_v0 = vld [vmem:[#allocation2 + $0x62] sm:$0xff] }
 0x341   :  { %2278 = vst.msk [vmem:[#allocation3 + $0x28] sm:$0xff] %vm90_vm0, %v2772_v57  ;;  %v2294_v2 = vld [vmem:[#allocation2 + $0x51] sm:$0xff] }
 0x342   :  { %v2390_v6 = vld [vmem:[#allocation2 + $0x52] sm:$0xff] }
 0x343   :  { %2899 = vrot.lane.b32.xlu0 %v2292_v43, %s4403_s24 }
 0x344   :  { %2997 = vrot.lane.b32.xlu1 %v2676_v40, %s4404_s25 }
 0x347   :  { %2709 = vrot.lane.b32.xlu0 %v2388_v50, %s4401_s21 }
 0x348   :  { %2517 = vrot.lane.b32.xlu1 %v2770_v38, %s6134_s26 }
 0x34b   :  { %2523 = vrot.lane.b32.xlu0 %v2486_v55, %s6134_s26 }
 0x34c   :  { %2613 = vrot.lane.b32.xlu1 %v2292_v43, %s4400_s20 }
 0x34f   :  { %2333 = vrot.lane.b32.xlu0 %v2295_v63, %s4398_s18 }
 0x350   :  { %2995 = vrot.lane.b32.xlu1 %v2388_v50, %s4404_s25 }
 0x353   :  { %2715 = vrot.lane.b32.xlu0 %v2678_v0, %s4401_s21 }
 0x354   :  { %2619 = vrot.lane.b32.xlu1 %v2295_v63, %s4400_s20 }
 0x357   :  { %2331 = vrot.lane.b32.xlu0 %v2294_v2, %s4398_s18  ;;  %v4200_v5 = vpop.f32.mrf.mxu1 }
 0x358   :  { %2429 = vrot.lane.b32.xlu1 %v2678_v0, %s4397_s17  ;;  %v2182_v7 = vadd.f32 %v4200_v5, %v5421_v17 }
 0x359   :  { %v2176_v8 = vpop.f32.mrf.mxu1 }
 0x35a   :  { %v2232_v9 = vmax.f32 %v2182_v7, 0.0  ;;  %v2177_v10 = vadd.f32 %v5421_v17, %v2176_v8 }
 0x35b   :  { %2427 = vrot.lane.b32.xlu0 %v2390_v6, %s4397_s17 }
 0x35c   :  { %2809 = vrot.lane.b32.xlu1 %v2486_v55, %s4402_s22  ;;  %2248 = vst.msk [vmem:[#allocation2 + $0x81] sm:$0xff] %vm90_vm0, %v2232_v9  ;;  %v2231_v11 = vmax.f32 %v2177_v10, 0.0 }
 0x35e   :  { %2247 = vst.msk [vmem:[#allocation2 + $0x71] sm:$0xff] %vm90_vm0, %v2231_v11 }
 0x35f   :  { %2807 = vrot.lane.b32.xlu0 %v2772_v57, %s4402_s22 }
 0x360   :  { %2905 = vrot.lane.b32.xlu1 %v2295_v63, %s4403_s24 }
 0x363   :  { %2903 = vrot.lane.b32.xlu0 %v2294_v2, %s4403_s24  ;;  %v2488_v14 = vld [vmem:[#allocation2 + $0x80] sm:$0xff] }
 0x364   :  { %3001 = vrot.lane.b32.xlu1 %v2678_v0, %s4404_s25  ;;  %v2680_v15 = vld [vmem:[#allocation2 + $0x82] sm:$0xff] }
 0x365   :  { %v2774_v12 = vld [vmem:[#allocation2 + $0x70] sm:$0xff]  ;;  %v2584_v54 = vld [vmem:[#allocation2 + $0x81] sm:$0xff] }
 0x366   :  { %2280 = vst.msk [vmem:[#allocation3 + $0x38] sm:$0xff] %vm90_vm0, %v2774_v12  ;;  %v2296_v16 = vld [vmem:[#allocation2 + $0x71] sm:$0xff] }
 0x367   :  { %2713 = vrot.lane.b32.xlu0 %v2390_v6, %s4401_s21  ;;  %v2392_v4 = vld [vmem:[#allocation2 + $0x72] sm:$0xff] }
 0x368   :  { %2521 = vrot.lane.b32.xlu1 %v2772_v57, %s6134_s26 }
 0x36b   :  { %2527 = vrot.lane.b32.xlu0 %v2488_v14, %s6134_s26 }
 0x36c   :  { %2617 = vrot.lane.b32.xlu1 %v2294_v2, %s4400_s20 }
 0x36f   :  { %2719 = vrot.lane.b32.xlu0 %v2680_v15, %s4401_s21 }
 0x370   :  { %2999 = vrot.lane.b32.xlu1 %v2390_v6, %s4404_s25 }
 0x373   :  { %2335 = vrot.lane.b32.xlu0 %v2296_v16, %s4398_s18 }
 0x374   :  { %2623 = vrot.lane.b32.xlu1 %v2584_v54, %s4400_s20 }
 0x377   :  { %2431 = vrot.lane.b32.xlu0 %v2392_v4, %s4397_s17 }
 0x378   :  { %2813 = vrot.lane.b32.xlu1 %v2488_v14, %s4402_s22  ;;  %v4203_v19 = vpop.f32.mrf.mxu1 }
 0x379   :  { %v2192_v20 = vadd.f32 %v4203_v19, %v5421_v17 }
 0x37a   :  { %v2186_v30 = vpop.f32.mrf.mxu1 }
 0x37b   :  { %2811 = vrot.lane.b32.xlu0 %v2774_v12, %s4402_s22  ;;  %v2234_v22 = vmax.f32 %v2192_v20, 0.0  ;;  %v2187_v24 = vadd.f32 %v5421_v17, %v2186_v30 }
 0x37c   :  { %2909 = vrot.lane.b32.xlu1 %v2584_v54, %s4403_s24 }
 0x37d   :  { %2250 = vst.msk [vmem:[#allocation2 + $0xc1] sm:$0xff] %vm90_vm0, %v2234_v22  ;;  %v2233_v25 = vmax.f32 %v2187_v24, 0.0 }
 0x37f   :  { %2907 = vrot.lane.b32.xlu0 %v2296_v16, %s4403_s24  ;;  %2249 = vst.msk [vmem:[#allocation2 + $0xb1] sm:$0xff] %vm90_vm0, %v2233_v25 }
 0x380   :  { %3005 = vrot.lane.b32.xlu1 %v2680_v15, %s4404_s25 }
 0x381   :  { %v2612_v26 = vpop.permute.xlu0 %2611 }
 0x382   :  { %v2516_v27 = vpop.permute.xlu1 %2515 }
 0x383   :  { %2717 = vrot.lane.b32.xlu0 %v2392_v4, %s4401_s21 }
 0x384   :  { %2525 = vrot.lane.b32.xlu1 %v2774_v12, %s6134_s26  ;;  %v2490_v28 = vld [vmem:[#allocation2 + $0xc0] sm:$0xff] }
 0x385   :  { %v2708_v62 = vpop.permute.xlu0 %2707  ;;  %2283 = vst.msk [vmem:[#allocation3 + $0x50] sm:$0xff] %vm90_vm0, %v2490_v28  ;;  %v2299_v29 = vld [vmem:[#allocation2 + $0xc1] sm:$0xff] }
 0x386   :  { %v2326_v59 = vpop.permute.xlu1 %2325  ;;  %v2489_v23 = vld [vmem:[#allocation2 + $0xb0] sm:$0xff]  ;;  %v2682_v35 = vld [vmem:[#allocation2 + $0xc2] sm:$0xff] }
 0x387   :  { %2371 = vst.msk [vmem:[#allocation3 + $0x10] sm:$0xff] %vm244_vm2, %v2326_v59  ;;  %2531 = vrot.lane.b32.xlu0 %v2490_v28, %s6134_s26  ;;  %v2298_v3 = vld [vmem:[#allocation2 + $0xb1] sm:$0xff] }
 0x388   :  { %2621 = vrot.lane.b32.xlu1 %v2296_v16, %s4400_s20  ;;  %2282 = vst.msk [vmem:[#allocation3 + $0x48] sm:$0xff] %vm90_vm0, %v2489_v23  ;;  %v2394_v60 = vld [vmem:[#allocation2 + $0xb2] sm:$0xff] }
 0x389   :  { %v2514_v32 = vpop.permute.xlu0 %2513 }
 0x38a   :  { %v2422_v31 = vpop.permute.xlu1 %2421  ;;  %2561 = vst.msk [vmem:[#allocation3] sm:$0xff] %vm439_vm4, %v2514_v32 }
 0x38b   :  { %2467 = vst.msk [vmem:[#allocation3 + $0x10] sm:$0xff] %vm341_vm3, %v2422_v31  ;;  %2341 = vrot.lane.b32.xlu0 %v2299_v29, %s4398_s18 }
 0x38c   :  { %3003 = vrot.lane.b32.xlu1 %v2392_v4, %s4404_s25 }
 0x38d   :  { %v2610_v34 = vpop.permute.xlu0 %2609 }
 0x38e   :  { %v2802_v33 = vpop.permute.xlu1 %2801  ;;  %2657 = vst.msk [vmem:[#allocation3] sm:$0xff] %vm536_vm5, %v2610_v34 }
 0x38f   :  { %2723 = vrot.lane.b32.xlu0 %v2682_v35, %s4401_s21 }
 0x390   :  { %2627 = vrot.lane.b32.xlu1 %v2299_v29, %s4400_s20 }
 0x392   :  { %v2898_v36 = vpop.permute.xlu1 %2897 }
 0x393   :  { %2339 = vrot.lane.b32.xlu0 %v2298_v3, %s4398_s18 }
 0x394   :  { %2437 = vrot.lane.b32.xlu1 %v2682_v35, %s4397_s17 }
 0x396   :  { %v2994_v37 = vpop.permute.xlu1 %2993 }
 0x397   :  { %2435 = vrot.lane.b32.xlu0 %v2394_v60, %s4397_s17 }
 0x398   :  { %2817 = vrot.lane.b32.xlu1 %v2490_v28, %s4402_s22  ;;  %v4206_v38 = vpop.f32.mrf.mxu1 }
 0x399   :  { %v2202_v40 = vadd.f32 %v4206_v38, %v5421_v17 }
 0x39a   :  { %v2324_v39 = vpop.permute.xlu1 %2323  ;;  %v2196_v41 = vpop.f32.mrf.mxu1 }
 0x39b   :  { %2370 = vst.msk [vmem:[#allocation3 + $0x8] sm:$0xff] %vm244_vm2, %v2324_v39  ;;  %2721 = vrot.lane.b32.xlu0 %v2394_v60, %s4401_s21  ;;  %v2236_v13 = vmax.f32 %v2202_v40, 0.0  ;;  %v2197_v42 = vadd.f32 %v5421_v17, %v2196_v41 }
 0x39c   :  { %2913 = vrot.lane.b32.xlu1 %v2299_v29, %s4403_s24 }
 0x39d   :  { %v2520_v43 = vpop.permute.xlu0 %2519  ;;  %2252 = vst.msk [vmem:[#allocation2 + $0xe1] sm:$0xff] %vm90_vm0, %v2236_v13  ;;  %v2235_v46 = vmax.f32 %v2197_v42, 0.0 }
 0x39e   :  { %v2420_v45 = vpop.permute.xlu1 %2419 }
 0x39f   :  { %2466 = vst.msk [vmem:[#allocation3 + $0x8] sm:$0xff] %vm341_vm3, %v2420_v45 }
 0x3a0   :  { %2562 = vst.msk [vmem:[#allocation3 + $0x8] sm:$0xff] %vm439_vm4, %v2516_v27  ;;  %3009 = vrot.lane.b32.xlu1 %v2682_v35, %s4404_s25 }
 0x3a1   :  { %2251 = vst.msk [vmem:[#allocation2 + $0xd1] sm:$0xff] %vm90_vm0, %v2235_v46  ;;  %v2330_v47 = vpop.permute.xlu0 %2329 }
 0x3a2   :  { %2658 = vst.msk [vmem:[#allocation3 + $0x8] sm:$0xff] %vm536_vm5, %v2612_v26  ;;  %v2706_v49 = vpop.permute.xlu1 %2705 }
 0x3a3   :  { %2754 = vst.msk [vmem:[#allocation3 + $0x8] sm:$0xff] %vm633_vm6, %v2708_v62  ;;  %2753 = vst.msk [vmem:[#allocation3] sm:$0xff] %vm633_vm6, %v2706_v49 }
 0x3a4   :  { %2373 = vst.msk [vmem:[#allocation3 + $0x20] sm:$0xff] %vm244_vm2, %v2330_v47  ;;  %2529 = vrot.lane.b32.xlu1 %v2489_v23, %s6134_s26  ;;  %v2492_v52 = vld [vmem:[#allocation2 + $0xe0] sm:$0xff] }
 0x3a5   :  { %2849 = vst.msk [vmem:[#allocation3] sm:$0xff] %vm731_vm7, %v2802_v33  ;;  %v2712_v50 = vpop.permute.xlu0 %2711  ;;  %2535 = vrot.lane.b32.xlu0 %v2492_v52, %s6134_s26  ;;  %v2301_v57 = vld [vmem:[#allocation2 + $0xe1] sm:$0xff] }
 0x3a6   :  { %2945 = vst.msk [vmem:[#allocation3] sm:$0xff] %vm828_vm8, %v2898_v36  ;;  %v2616_v51 = vpop.permute.xlu1 %2615  ;;  %v5590_v48 = vld [vmem:[#allocation2 + $0xe2] sm:$0xff] }
 0x3a7   :  { %3041 = vst.msk [vmem:[#allocation3] sm:$0xff] %vm925_vm9, %v2994_v37 }
 0x3a8   :  { %2285 = vst.msk [vmem:[#allocation3 + $0x60] sm:$0xff] %vm90_vm0, %v2492_v52  ;;  %2625 = vrot.lane.b32.xlu1 %v2298_v3, %s4400_s20  ;;  %v2778_v53 = vld [vmem:[#allocation2 + $0xd0] sm:$0xff] }
 0x3a9   :  { %2284 = vst.msk [vmem:[#allocation3 + $0x58] sm:$0xff] %vm90_vm0, %v2778_v53  ;;  %v2328_v55 = vpop.permute.xlu0 %2327  ;;  %2345 = vrot.lane.b32.xlu0 %v2301_v57, %s4398_s18  ;;  %v2300_v2 = vld [vmem:[#allocation2 + $0xd1] sm:$0xff] }
 0x3aa   :  { %v2426_v56 = vpop.permute.xlu1 %2425  ;;  %2372 = vst.msk [vmem:[#allocation3 + $0x18] sm:$0xff] %vm244_vm2, %v2328_v55  ;;  %v2396_v7 = vld [vmem:[#allocation2 + $0xd2] sm:$0xff] }
 0x3ab   :  { %2469 = vst.msk [vmem:[#allocation3 + $0x20] sm:$0xff] %vm341_vm3, %v2426_v56 }
 0x3ac   :  { %2631 = vrot.lane.b32.xlu1 %v2301_v57, %s4400_s20 }
 0x3ad   :  { %v2424_v58 = vpop.permute.xlu0 %2423  ;;  %2727 = vrot.lane.b32.xlu0 %v5590_v48, %s4401_s21 }
 0x3ae   :  { %v3057_v44 = vld [vmem:[#allocation3] sm:$0xff]  ;;  %v2806_v61 = vpop.permute.xlu1 %2805  ;;  %2468 = vst.msk [vmem:[#allocation3 + $0x18] sm:$0xff] %vm341_vm3, %v2424_v58 }
 0x3af   :  { %4231 = vmatprep.mubr.msk.f32.mxu0 %vm974_vm10, %v3057_v44  ;;  %2564 = vst.msk [vmem:[#allocation3 + $0x18] sm:$0xff] %vm439_vm4, %v2520_v43 }
 0x3b0   :  { %2441 = vrot.lane.b32.xlu1 %v5590_v48, %s4397_s17  ;;  %2660 = vst.msk [vmem:[#allocation3 + $0x18] sm:$0xff] %vm536_vm5, %v2616_v51 }
 0x3b1   :  { %2756 = vst.msk [vmem:[#allocation3 + $0x18] sm:$0xff] %vm633_vm6, %v2712_v50  ;;  %v2804_v63 = vpop.permute.xlu0 %2803  ;;  %2343 = vrot.lane.b32.xlu0 %v2300_v2, %s4398_s18 }
 0x3b2   :  { %v2902_v0 = vpop.permute.xlu1 %2901  ;;  %2850 = vst.msk [vmem:[#allocation3 + $0x8] sm:$0xff] %vm731_vm7, %v2804_v63 }
 0x3b4   :  { %2821 = vrot.lane.b32.xlu1 %v2492_v52, %s4402_s22 }
 0x3b5   :  { %v2900_v5 = vpop.permute.xlu0 %2899  ;;  %2439 = vrot.lane.b32.xlu0 %v2396_v7, %s4397_s17 }
 0x3b6   :  { %v2998_v6 = vpop.permute.xlu1 %2997  ;;  %2946 = vst.msk [vmem:[#allocation3 + $0x8] sm:$0xff] %vm828_vm8, %v2900_v5 }
 0x3b8   :  { %2917 = vrot.lane.b32.xlu1 %v2301_v57, %s4403_s24 }
 0x3b9   :  { %v2710_v8 = vpop.permute.xlu0 %2709  ;;  %2819 = vrot.lane.b32.xlu0 %v2778_v53, %s4402_s22 }
 0x3ba   :  { %v2518_v9 = vpop.permute.xlu1 %2517 }
 0x3bb   :  { %2563 = vst.msk [vmem:[#allocation3 + $0x10] sm:$0xff] %vm439_vm4, %v2518_v9 }
 0x3bc   :  { %2533 = vrot.lane.b32.xlu1 %v2778_v53, %s6134_s26 }
 0x3bd   :  { %v2524_v10 = vpop.permute.xlu0 %2523  ;;  %2915 = vrot.lane.b32.xlu0 %v2300_v2, %s4403_s24 }
 0x3be   :  { %v2614_v11 = vpop.permute.xlu1 %2613 }
 0x3bf   :  { %2659 = vst.msk [vmem:[#allocation3 + $0x10] sm:$0xff] %vm536_vm5, %v2614_v11  ;;  %v4209_v12 = vpop.f32.mrf.mxu1  ;;  %v2880_v11 = vld [vmem:[#allocation2 + $0x131] sm:$0xff] }
 0x3c0   :  { %2755 = vst.msk [vmem:[#allocation3 + $0x10] sm:$0xff] %vm633_vm6, %v2710_v8  ;;  %2629 = vrot.lane.b32.xlu1 %v2300_v2, %s4400_s20  ;;  %v2212_v14 = vadd.f32 %v4209_v12, %v5421_v17  ;;  %v2784_v8 = vld [vmem:[#allocation2 + $0x130] sm:$0xff] }
 0x3c1   :  { %2851 = vst.msk [vmem:[#allocation3 + $0x10] sm:$0xff] %vm731_vm7, %v2806_v61  ;;  %v2334_v15 = vpop.permute.xlu0 %2333  ;;  %v2206_v54 = vpop.f32.mrf.mxu1  ;;  %2725 = vrot.lane.b32.xlu0 %v2396_v7, %s4401_s21 }
 0x3c2   :  { %2947 = vst.msk [vmem:[#allocation3 + $0x10] sm:$0xff] %vm828_vm8, %v2902_v0  ;;  %v2996_v16 = vpop.permute.xlu1 %2995  ;;  %v2238_v4 = vmax.f32 %v2212_v14, 0.0  ;;  %v2207_v19 = vadd.f32 %v5421_v17, %v2206_v54  ;;  %v2976_v54 = vld [vmem:[#allocation2 + $0x132] sm:$0xff] }
 0x3c3   :  { %3043 = vst.msk [vmem:[#allocation3 + $0x10] sm:$0xff] %vm925_vm9, %v2998_v6  ;;  %3042 = vst.msk [vmem:[#allocation3 + $0x8] sm:$0xff] %vm925_vm9, %v2996_v16 }
 0x3c4   :  { %2375 = vst.msk [vmem:[#allocation3 + $0x30] sm:$0xff] %vm244_vm2, %v2334_v15  ;;  %3011 = vrot.lane.b32.xlu1 %v2396_v7, %s4404_s25  ;;  %v2237_v20 = vmax.f32 %v2207_v19, 0.0 }
 0x3c5   :  { %2254 = vst.msk [vmem:[#allocation2 + $0x101] sm:$0xff] %vm90_vm0, %v2238_v4  ;;  %v2716_v30 = vpop.permute.xlu0 %2715 }
 0x3c6   :  { %v2620_v22 = vpop.permute.xlu1 %2619  ;;  %2253 = vst.msk [vmem:[#allocation2 + $0xf1] sm:$0xff] %vm90_vm0, %v2237_v20 }
 0x3c9   :  { %v2332_v24 = vpop.permute.xlu0 %2331 }
 0x3ca   :  { %v2430_v25 = vpop.permute.xlu1 %2429  ;;  %v3058_v26 = vld [vmem:[#allocation3 + $0x8] sm:$0xff]  ;;  %v3059_v27 = vld [vmem:[#allocation3 + $0x10] sm:$0xff]  ;;  %2374 = vst.msk [vmem:[#allocation3 + $0x28] sm:$0xff] %vm244_vm2, %v2332_v24 }
 0x3cb   :  { %2471 = vst.msk [vmem:[#allocation3 + $0x30] sm:$0xff] %vm341_vm3, %v2430_v25  ;;  %4232 = vmatmul.mubr.msk.f32.vlgmr.msra.gmra.mxu0 %vm974_vm10, %v3058_v26 }
 0x3cc   :  { %4234 = vmatprep.mubr.msk.f32.mxu0 %vm974_vm10, %v3059_v27  ;;  %v2494_v62 = vld [vmem:[#allocation2 + $0x100] sm:$0xff]  ;;  %v4212_v31 = vpop.f32.mrf.mxu1 }
 0x3cd   :  { %2539 = vrot.lane.b32.xlu0 %v2494_v62, %s6134_s26  ;;  %v2428_v59 = vpop.permute.xlu0 %2427  ;;  %2287 = vst.msk [vmem:[#allocation3 + $0x70] sm:$0xff] %vm90_vm0, %v2494_v62  ;;  %v2493_v23 = vld [vmem:[#allocation2 + $0xf0] sm:$0xff]  ;;  %v2222_v32 = vadd.f32 %v4212_v31, %v5421_v17  ;;  %v2590_v41 = vld [vmem:[#allocation2 + $0x101] sm:$0xff] }
 0x3ce   :  { %v2810_v28 = vpop.permute.xlu1 %2809  ;;  %2470 = vst.msk [vmem:[#allocation3 + $0x28] sm:$0xff] %vm341_vm3, %v2428_v59  ;;  %2537 = vrot.lane.b32.xlu1 %v2493_v23, %s6134_s26  ;;  %v2302_v29 = vld [vmem:[#allocation2 + $0xf1] sm:$0xff]  ;;  %v2216_v33 = vpop.f32.mrf.mxu1  ;;  %v2399_v47 = vld [vmem:[#allocation2 + $0x102] sm:$0xff] }
 0x3cf   :  { %2566 = vst.msk [vmem:[#allocation3 + $0x28] sm:$0xff] %vm439_vm4, %v2524_v10  ;;  %v2240_v36 = vmax.f32 %v2222_v32, 0.0  ;;  %v2217_v3 = vadd.f32 %v5421_v17, %v2216_v33  ;;  %v2398_v60 = vld [vmem:[#allocation2 + $0xf2] sm:$0xff] }
 0x3d0   :  { %2286 = vst.msk [vmem:[#allocation3 + $0x68] sm:$0xff] %vm90_vm0, %v2493_v23 }
 0x3d1   :  { %2662 = vst.msk [vmem:[#allocation3 + $0x28] sm:$0xff] %vm536_vm5, %v2620_v22  ;;  %2347 = vrot.lane.b32.xlu0 %v2302_v29, %s4398_s18  ;;  %v2808_v34 = vpop.permute.xlu0 %2807  ;;  %v2239_v37 = vmax.f32 %v2217_v3, 0.0  ;;  %v3298_v22 = vld [vmem:[%s6123_s7] sm:$0xff] }
 0x3d2   :  { %2758 = vst.msk [vmem:[#allocation3 + $0x28] sm:$0xff] %vm633_vm6, %v2716_v30  ;;  %v2906_v35 = vpop.permute.xlu1 %2905  ;;  %2633 = vrot.lane.b32.xlu1 %v2302_v29, %s4400_s20  ;;  %4255 = vmatprep.subr.mxu1 %v3298_v22 }
 0x3d3   :  { %2852 = vst.msk [vmem:[#allocation3 + $0x18] sm:$0xff] %vm731_vm7, %v2808_v34  ;;  %4256 = vmatpush3.msra.mxu1 %v3298_v22 }
 0x3d4   :  { %2256 = vst.msk [vmem:[#allocation2 + $0x121] sm:$0xff] %vm90_vm0, %v2240_v36  ;;  %2255 = vst.msk [vmem:[#allocation2 + $0x111] sm:$0xff] %vm90_vm0, %v2239_v37 }
 0x3d5   :  { %2443 = vrot.lane.b32.xlu0 %v2398_v60, %s4397_s17  ;;  %v2904_v38 = vpop.permute.xlu0 %2903 }
 0x3d6   :  { %v3002_v39 = vpop.permute.xlu1 %3001  ;;  %2948 = vst.msk [vmem:[#allocation3 + $0x18] sm:$0xff] %vm828_vm8, %v2904_v38  ;;  %3013 = vrot.lane.b32.xlu1 %v5590_v48, %s4404_s25 }
 0x3d9   :  { %2823 = vrot.lane.b32.xlu0 %v2493_v23, %s4402_s22  ;;  %v2714_v17 = vpop.permute.xlu0 %2713 }
 0x3da   :  { %v2522_v40 = vpop.permute.xlu1 %2521  ;;  %2635 = vrot.lane.b32.xlu1 %v2590_v41, %s4400_s20 }
 0x3db   :  { %2565 = vst.msk [vmem:[#allocation3 + $0x20] sm:$0xff] %vm439_vm4, %v2522_v40  ;;  %v2495_v13 = vld [vmem:[#allocation2 + $0x110] sm:$0xff]  ;;  %v2688_v6 = vld [vmem:[#allocation2 + $0x122] sm:$0xff] }
 0x3dc   :  { %2288 = vst.msk [vmem:[#allocation3 + $0x78] sm:$0xff] %vm90_vm0, %v2495_v13  ;;  %v2304_v51 = vld [vmem:[#allocation2 + $0x111] sm:$0xff]  ;;  %v2592_v7 = vld [vmem:[#allocation2 + $0x121] sm:$0xff] }
 0x3dd   :  { %2919 = vrot.lane.b32.xlu0 %v2302_v29, %s4403_s24  ;;  %v2528_v42 = vpop.permute.xlu0 %2527  ;;  %v2400_v58 = vld [vmem:[#allocation2 + $0x112] sm:$0xff] }
 0x3de   :  { %v2618_v43 = vpop.permute.xlu1 %2617  ;;  %3015 = vrot.lane.b32.xlu1 %v2398_v60, %s4404_s25 }
 0x3df   :  { %2661 = vst.msk [vmem:[#allocation3 + $0x20] sm:$0xff] %vm536_vm5, %v2618_v43 }
 0x3e0   :  { %2757 = vst.msk [vmem:[#allocation3 + $0x20] sm:$0xff] %vm633_vm6, %v2714_v17 }
 0x3e1   :  { %2853 = vst.msk [vmem:[#allocation3 + $0x20] sm:$0xff] %vm731_vm7, %v2810_v28  ;;  %2349 = vrot.lane.b32.xlu0 %v2590_v41, %s4398_s18  ;;  %v2720_v45 = vpop.permute.xlu0 %2719 }
 0x3e2   :  { %2949 = vst.msk [vmem:[#allocation3 + $0x20] sm:$0xff] %vm828_vm8, %v2906_v35  ;;  %v3000_v46 = vpop.permute.xlu1 %2999  ;;  %2445 = vrot.lane.b32.xlu1 %v2399_v47, %s4397_s17 }
 0x3e3   :  { %3045 = vst.msk [vmem:[#allocation3 + $0x20] sm:$0xff] %vm925_vm9, %v3002_v39  ;;  %3044 = vst.msk [vmem:[#allocation3 + $0x18] sm:$0xff] %vm925_vm9, %v3000_v46 }
 0x3e5   :  { %2729 = vrot.lane.b32.xlu0 %v2398_v60, %s4401_s21  ;;  %v2336_v49 = vpop.permute.xlu0 %2335 }
 0x3e6   :  { %v2624_v50 = vpop.permute.xlu1 %2623  ;;  %2376 = vst.msk [vmem:[#allocation3 + $0x38] sm:$0xff] %vm244_vm2, %v2336_v49  ;;  %2825 = vrot.lane.b32.xlu1 %v2494_v62, %s4402_s22 }
 0x3e9   :  { %2351 = vrot.lane.b32.xlu0 %v2304_v51, %s4398_s18  ;;  %v2432_v52 = vpop.permute.xlu0 %2431 }
 0x3ea   :  { %v2814_v53 = vpop.permute.xlu1 %2813  ;;  %v3060_v55 = vld [vmem:[#allocation3 + $0x18] sm:$0xff]  ;;  %v3061_v56 = vld [vmem:[#allocation3 + $0x20] sm:$0xff]  ;;  %2472 = vst.msk [vmem:[#allocation3 + $0x38] sm:$0xff] %vm341_vm3, %v2432_v52  ;;  %2541 = vrot.lane.b32.xlu1 %v2495_v13, %s6134_s26 }
 0x3eb   :  { %4235 = vmatmul.mubr.msk.f32.gmra.mxu0 %vm974_vm10, %v3060_v55  ;;  %2568 = vst.msk [vmem:[#allocation3 + $0x38] sm:$0xff] %vm439_vm4, %v2528_v42 }
 0x3ec   :  { %4237 = vmatprep.mubr.msk.f32.mxu0 %vm974_vm10, %v3061_v56  ;;  %2664 = vst.msk [vmem:[#allocation3 + $0x38] sm:$0xff] %vm536_vm5, %v2624_v50 }
 0x3ed   :  { %2760 = vst.msk [vmem:[#allocation3 + $0x38] sm:$0xff] %vm633_vm6, %v2720_v45  ;;  %2731 = vrot.lane.b32.xlu0 %v2399_v47, %s4401_s21  ;;  %v2812_v57 = vpop.permute.xlu0 %2811 }
 0x3ee   :  { %v2910_v44 = vpop.permute.xlu1 %2909  ;;  %2856 = vst.msk [vmem:[#allocation3 + $0x38] sm:$0xff] %vm731_vm7, %v5529_v18  ;;  %2854 = vst.msk [vmem:[#allocation3 + $0x28] sm:$0xff] %vm731_vm7, %v2812_v57  ;;  %2921 = vrot.lane.b32.xlu1 %v2590_v41, %s4403_s24 }
 0x3ef   :  { %2952 = vst.msk [vmem:[#allocation3 + $0x38] sm:$0xff] %vm828_vm8, %v5538_v21  ;;  %v2496_v21 = vld [vmem:[#allocation2 + $0x120] sm:$0xff] }
 0x3f0   :  { %3048 = vst.msk [vmem:[#allocation3 + $0x38] sm:$0xff] %vm925_vm9, %v5534_v1 }
 0x3f1   :  { %2447 = vrot.lane.b32.xlu0 %v2400_v58, %s4397_s17  ;;  %v2908_v61 = vpop.permute.xlu0 %2907 }
 0x3f2   :  { %v3006_v48 = vpop.permute.xlu1 %3005  ;;  %2950 = vst.msk [vmem:[#allocation3 + $0x28] sm:$0xff] %vm828_vm8, %v2908_v61  ;;  %2637 = vrot.lane.b32.xlu1 %v2304_v51, %s4400_s20 }
 0x3f5   :  { %2827 = vrot.lane.b32.xlu0 %v2495_v13, %s4402_s22  ;;  %v2718_v18 = vpop.permute.xlu0 %2717 }
 0x3f6   :  { %v2526_v63 = vpop.permute.xlu1 %2525  ;;  %3017 = vrot.lane.b32.xlu1 %v2399_v47, %s4404_s25 }
 0x3f7   :  { %2567 = vst.msk [vmem:[#allocation3 + $0x30] sm:$0xff] %vm439_vm4, %v2526_v63  ;;  %v3064_v20 = vld [vmem:[#allocation3 + $0x38] sm:$0xff] }
 0x3f9   :  { %2543 = vrot.lane.b32.xlu0 %v2496_v21, %s6134_s26  ;;  %v2532_v1 = vpop.permute.xlu0 %2531 }
 0x3fa   :  { %v2622_v0 = vpop.permute.xlu1 %2621  ;;  %2733 = vrot.lane.b32.xlu1 %v2400_v58, %s4401_s21 }
 0x3fb   :  { %2663 = vst.msk [vmem:[#allocation3 + $0x30] sm:$0xff] %vm536_vm5, %v2622_v0 }
 0x3fc   :  { %2759 = vst.msk [vmem:[#allocation3 + $0x30] sm:$0xff] %vm633_vm6, %v2718_v18 }
 0x3fd   :  { %2855 = vst.msk [vmem:[#allocation3 + $0x30] sm:$0xff] %vm731_vm7, %v2814_v53  ;;  %2923 = vrot.lane.b32.xlu0 %v2304_v51, %s4403_s24  ;;  %v2342_v2 = vpop.permute.xlu0 %2341 }
 0x3fe   :  { %2951 = vst.msk [vmem:[#allocation3 + $0x30] sm:$0xff] %vm828_vm8, %v2910_v44  ;;  %v3004_v5 = vpop.permute.xlu1 %3003  ;;  %2735 = vrot.lane.b32.xlu1 %v2688_v6, %s4401_s21 }
 0x3ff   :  { %3047 = vst.msk [vmem:[#allocation3 + $0x30] sm:$0xff] %vm925_vm9, %v3006_v48  ;;  %3046 = vst.msk [vmem:[#allocation3 + $0x28] sm:$0xff] %vm925_vm9, %v3004_v5 }
 0x400   :  { %2379 = vst.msk [vmem:[#allocation3 + $0x50] sm:$0xff] %vm244_vm2, %v2342_v2 }
 0x401   :  { %2639 = vrot.lane.b32.xlu0 %v2592_v7, %s4400_s20  ;;  %v2724_v9 = vpop.permute.xlu0 %2723 }
 0x402   :  { %v2628_v10 = vpop.permute.xlu1 %2627  ;;  %2831 = vrot.lane.b32.xlu1 %v2784_v8, %s4402_s22 }
 0x405   :  { %3019 = vrot.lane.b32.xlu0 %v2400_v58, %s4404_s25  ;;  %v2340_v12 = vpop.permute.xlu0 %2339 }
 0x406   :  { %v2438_v14 = vpop.permute.xlu1 %2437  ;;  %v3062_v15 = vld [vmem:[#allocation3 + $0x28] sm:$0xff]  ;;  %v3063_v16 = vld [vmem:[#allocation3 + $0x30] sm:$0xff]  ;;  %2378 = vst.msk [vmem:[#allocation3 + $0x48] sm:$0xff] %vm244_vm2, %v2340_v12  ;;  %2927 = vrot.lane.b32.xlu1 %v2880_v11, %s4403_s24 }
 0x407   :  { %2475 = vst.msk [vmem:[#allocation3 + $0x50] sm:$0xff] %vm341_vm3, %v2438_v14  ;;  %4238 = vmatmul.mubr.msk.f32.gmra.mxu0 %vm974_vm10, %v3062_v15 }
 0x408   :  { %4240 = vmatprep.mubr.msk.f32.mxu0 %vm974_vm10, %v3063_v16 }
 0x409   :  { %2829 = vrot.lane.b32.xlu0 %v2496_v21, %s4402_s22  ;;  %v2436_v4 = vpop.permute.xlu0 %2435 }
 0x40a   :  { %v2818_v19 = vpop.permute.xlu1 %2817  ;;  %2474 = vst.msk [vmem:[#allocation3 + $0x48] sm:$0xff] %vm341_vm3, %v2436_v4  ;;  %3023 = vrot.lane.b32.xlu1 %v2976_v54, %s4404_s25  ;;  %v5782_v4 = vld [vmem:[%s6122_s6] ss:$0 sm:$0xff] }
 0x40b   :  { %4241 = vmatmul.mubr.msk.f32.gmra.mxu0 %vm974_vm10, %v3064_v20  ;;  %2570 = vst.msk [vmem:[#allocation3 + $0x48] sm:$0xff] %vm439_vm4, %v2532_v1 }
 0x40c   :  { %2666 = vst.msk [vmem:[#allocation3 + $0x48] sm:$0xff] %vm536_vm5, %v2628_v10 }
 0x40d   :  { %2762 = vst.msk [vmem:[#allocation3 + $0x48] sm:$0xff] %vm633_vm6, %v2724_v9  ;;  %2925 = vrot.lane.b32.xlu0 %v2592_v7, %s4403_s24  ;;  %v2722_v25 = vpop.permute.xlu0 %2721 }
 0x40e   :  { %v2914_v30 = vpop.permute.xlu1 %2913 }
 0x411   :  { %3021 = vrot.lane.b32.xlu0 %v2688_v6, %s4404_s25 }
 0x412   :  { %v3010_v24 = vpop.permute.xlu1 %3009 }
 0x416   :  { %v2530_v26 = vpop.permute.xlu1 %2529 }
 0x417   :  { %2569 = vst.msk [vmem:[#allocation3 + $0x40] sm:$0xff] %vm439_vm4, %v2530_v26  ;;  %v2536_v27 = vpop.permute.xlu0 %2535 }
 0x41a   :  { %v2626_v62 = vpop.permute.xlu1 %2625 }
 0x41b   :  { %2665 = vst.msk [vmem:[#allocation3 + $0x40] sm:$0xff] %vm536_vm5, %v2626_v62  ;;  %v2346_v59 = vpop.permute.xlu0 %2345 }
 0x41c   :  { %2761 = vst.msk [vmem:[#allocation3 + $0x40] sm:$0xff] %vm633_vm6, %v2722_v25 }
 0x41d   :  { %2857 = vst.msk [vmem:[#allocation3 + $0x40] sm:$0xff] %vm731_vm7, %v2818_v19 }
 0x41e   :  { %2953 = vst.msk [vmem:[#allocation3 + $0x40] sm:$0xff] %vm828_vm8, %v2914_v30  ;;  %v2632_v28 = vpop.permute.xlu1 %2631 }
 0x41f   :  { %2381 = vst.msk [vmem:[#allocation3 + $0x60] sm:$0xff] %vm244_vm2, %v2346_v59  ;;  %v2728_v23 = vpop.permute.xlu0 %2727 }
 0x420   :  { %3049 = vst.msk [vmem:[#allocation3 + $0x40] sm:$0xff] %vm925_vm9, %v3010_v24 }
 0x422   :  { %v2442_v31 = vpop.permute.xlu1 %2441 }
 0x423   :  { %2477 = vst.msk [vmem:[#allocation3 + $0x60] sm:$0xff] %vm341_vm3, %v2442_v31  ;;  %v2344_v32 = vpop.permute.xlu0 %2343 }
 0x424   :  { %2380 = vst.msk [vmem:[#allocation3 + $0x58] sm:$0xff] %vm244_vm2, %v2344_v32 }
 0x426   :  { %v2822_v29 = vpop.permute.xlu1 %2821 }
 0x427   :  { %v3065_v33 = vld [vmem:[#allocation3 + $0x40] sm:$0xff]  ;;  %v2440_v34 = vpop.permute.xlu0 %2439 }
 0x428   :  { %4243 = vmatprep.mubr.msk.f32.mxu0 %vm974_vm10, %v3065_v33  ;;  %2476 = vst.msk [vmem:[#allocation3 + $0x58] sm:$0xff] %vm341_vm3, %v2440_v34 }
 0x429   :  { %2572 = vst.msk [vmem:[#allocation3 + $0x58] sm:$0xff] %vm439_vm4, %v2536_v27 }
 0x42a   :  { %v2918_v35 = vpop.permute.xlu1 %2917  ;;  %2668 = vst.msk [vmem:[#allocation3 + $0x58] sm:$0xff] %vm536_vm5, %v2632_v28 }
 0x42b   :  { %2764 = vst.msk [vmem:[#allocation3 + $0x58] sm:$0xff] %vm633_vm6, %v2728_v23  ;;  %v2820_v36 = vpop.permute.xlu0 %2819 }
 0x42c   :  { %2858 = vst.msk [vmem:[#allocation3 + $0x48] sm:$0xff] %vm731_vm7, %v2820_v36 }
 0x42e   :  { %v2534_v3 = vpop.permute.xlu1 %2533 }
 0x42f   :  { %2571 = vst.msk [vmem:[#allocation3 + $0x50] sm:$0xff] %vm439_vm4, %v2534_v3  ;;  %v2916_v37 = vpop.permute.xlu0 %2915 }
 0x430   :  { %2954 = vst.msk [vmem:[#allocation3 + $0x48] sm:$0xff] %vm828_vm8, %v2916_v37 }
 0x432   :  { %v2630_v60 = vpop.permute.xlu1 %2629 }
 0x433   :  { %2667 = vst.msk [vmem:[#allocation3 + $0x50] sm:$0xff] %vm536_vm5, %v2630_v60  ;;  %v2726_v38 = vpop.permute.xlu0 %2725 }
 0x434   :  { %2763 = vst.msk [vmem:[#allocation3 + $0x50] sm:$0xff] %vm633_vm6, %v2726_v38 }
 0x435   :  { %2859 = vst.msk [vmem:[#allocation3 + $0x50] sm:$0xff] %vm731_vm7, %v2822_v29 }
 0x436   :  { %v3012_v39 = vpop.permute.xlu1 %3011  ;;  %2955 = vst.msk [vmem:[#allocation3 + $0x50] sm:$0xff] %vm828_vm8, %v2918_v35 }
 0x437   :  { %3050 = vst.msk [vmem:[#allocation3 + $0x48] sm:$0xff] %vm925_vm9, %v3012_v39 }
 0x43e   :  { %v3066_v17 = vld [vmem:[#allocation3 + $0x48] sm:$0xff] }
 0x43f   :  { %4244 = vmatmul.mubr.msk.f32.gmra.mxu0 %vm974_vm10, %v3066_v17  ;;  %v2540_v40 = vpop.permute.xlu0 %2539 }
 0x440   :  { %v2538_v41 = vpop.permute.xlu1 %2537 }
 0x441   :  { %2573 = vst.msk [vmem:[#allocation3 + $0x60] sm:$0xff] %vm439_vm4, %v2538_v41  ;;  %v4405_v41 = vmov 1  }
 0x442   :  { %4332 = vset.pattern.permute.xlu0 %v4405_v41 }
 0x443   :  { %v2348_v13 = vpop.permute.xlu0 %2347 }
 0x444   :  { %2382 = vst.msk [vmem:[#allocation3 + $0x68] sm:$0xff] %vm244_vm2, %v2348_v13  ;;  %v2634_v42 = vpop.permute.xlu1 %2633  ;;  %v4406_v13 = vmov 0  }
 0x445   :  { %2669 = vst.msk [vmem:[#allocation3 + $0x60] sm:$0xff] %vm536_vm5, %v2634_v42  ;;  %4331 = vset.pattern.permute.xlu1 %v4406_v13 }
 0x447   :  { %v2444_v43 = vpop.permute.xlu0 %2443 }
 0x448   :  { %2478 = vst.msk [vmem:[#allocation3 + $0x68] sm:$0xff] %vm341_vm3, %v2444_v43  ;;  %v3014_v45 = vpop.permute.xlu1 %3013 }
 0x449   :  { %2574 = vst.msk [vmem:[#allocation3 + $0x68] sm:$0xff] %vm439_vm4, %v2540_v40 }
 0x44a   :  { %3051 = vst.msk [vmem:[#allocation3 + $0x50] sm:$0xff] %vm925_vm9, %v3014_v45 }
 0x44b   :  { %v2824_v46 = vpop.permute.xlu0 %2823 }
 0x44c   :  { %2860 = vst.msk [vmem:[#allocation3 + $0x58] sm:$0xff] %vm731_vm7, %v2824_v46  ;;  %v2636_v47 = vpop.permute.xlu1 %2635 }
 0x44d   :  { %2670 = vst.msk [vmem:[#allocation3 + $0x68] sm:$0xff] %vm536_vm5, %v2636_v47 }
 0x44f   :  { %v2920_v49 = vpop.permute.xlu0 %2919 }
 0x450   :  { %2956 = vst.msk [vmem:[#allocation3 + $0x58] sm:$0xff] %vm828_vm8, %v2920_v49  ;;  %v3016_v50 = vpop.permute.xlu1 %3015 }
 0x451   :  { %v3067_v51 = vld [vmem:[#allocation3 + $0x50] sm:$0xff]  ;;  %3052 = vst.msk [vmem:[#allocation3 + $0x58] sm:$0xff] %vm925_vm9, %v3016_v50 }
 0x452   :  { %4246 = vmatprep.mubr.msk.f32.mxu0 %vm974_vm10, %v3067_v51 }
 0x453   :  { %v2350_v52 = vpop.permute.xlu0 %2349 }
 0x454   :  { %2383 = vst.msk [vmem:[#allocation3 + $0x70] sm:$0xff] %vm244_vm2, %v2350_v52  ;;  %v2446_v53 = vpop.permute.xlu1 %2445 }
 0x455   :  { %2479 = vst.msk [vmem:[#allocation3 + $0x70] sm:$0xff] %vm341_vm3, %v2446_v53 }
 0x457   :  { %v2730_v55 = vpop.permute.xlu0 %2729 }
 0x458   :  { %2765 = vst.msk [vmem:[#allocation3 + $0x60] sm:$0xff] %vm633_vm6, %v2730_v55  ;;  %v2826_v56 = vpop.permute.xlu1 %2825  ;;  %v3068_v57 = vld [vmem:[#allocation3 + $0x58] sm:$0xff] }
 0x459   :  { %2861 = vst.msk [vmem:[#allocation3 + $0x60] sm:$0xff] %vm731_vm7, %v2826_v56  ;;  %4247 = vmatmul.mubr.msk.f32.gmra.mxu0 %vm974_vm10, %v3068_v57 }
 0x45b   :  { %v2352_v44 = vpop.permute.xlu0 %2351 }
 0x45c   :  { %2384 = vst.msk [vmem:[#allocation3 + $0x78] sm:$0xff] %vm244_vm2, %v2352_v44  ;;  %v2542_v58 = vpop.permute.xlu1 %2541 }
 0x45d   :  { %2575 = vst.msk [vmem:[#allocation3 + $0x70] sm:$0xff] %vm439_vm4, %v2542_v58 }
 0x45f   :  { %v2732_v61 = vpop.permute.xlu0 %2731 }
 0x460   :  { %2766 = vst.msk [vmem:[#allocation3 + $0x68] sm:$0xff] %vm633_vm6, %v2732_v61  ;;  %v2922_v48 = vpop.permute.xlu1 %2921 }
 0x461   :  { %2957 = vst.msk [vmem:[#allocation3 + $0x60] sm:$0xff] %vm828_vm8, %v2922_v48 }
 0x463   :  { %v2448_v18 = vpop.permute.xlu0 %2447 }
 0x464   :  { %2480 = vst.msk [vmem:[#allocation3 + $0x78] sm:$0xff] %vm341_vm3, %v2448_v18  ;;  %v2638_v63 = vpop.permute.xlu1 %2637 }
 0x465   :  { %2671 = vst.msk [vmem:[#allocation3 + $0x70] sm:$0xff] %vm536_vm5, %v2638_v63 }
 0x467   :  { %v2828_v21 = vpop.permute.xlu0 %2827 }
 0x468   :  { %2862 = vst.msk [vmem:[#allocation3 + $0x68] sm:$0xff] %vm731_vm7, %v2828_v21  ;;  %v3018_v1 = vpop.permute.xlu1 %3017 }
 0x469   :  { %3053 = vst.msk [vmem:[#allocation3 + $0x60] sm:$0xff] %vm925_vm9, %v3018_v1 }
 0x46b   :  { %v2544_v0 = vpop.permute.xlu0 %2543 }
 0x46c   :  { %2576 = vst.msk [vmem:[#allocation3 + $0x78] sm:$0xff] %vm439_vm4, %v2544_v0  ;;  %v2734_v2 = vpop.permute.xlu1 %2733 }
 0x46d   :  { %2767 = vst.msk [vmem:[#allocation3 + $0x70] sm:$0xff] %vm633_vm6, %v2734_v2 }
 0x46f   :  { %v2924_v5 = vpop.permute.xlu0 %2923 }
 0x470   :  { %2958 = vst.msk [vmem:[#allocation3 + $0x68] sm:$0xff] %vm828_vm8, %v2924_v5  ;;  %v2736_v6 = vpop.permute.xlu1 %2735  ;;  %v3069_v7 = vld [vmem:[#allocation3 + $0x60] sm:$0xff] }
 0x471   :  { %4249 = vmatprep.mubr.msk.f32.mxu0 %vm974_vm10, %v3069_v7 }
 0x473   :  { %v2640_v8 = vpop.permute.xlu0 %2639 }
 0x474   :  { %2672 = vst.msk [vmem:[#allocation3 + $0x78] sm:$0xff] %vm536_vm5, %v2640_v8  ;;  %v2832_v9 = vpop.permute.xlu1 %2831  ;;  %v5827_v8 = vld [vmem:[%s6124_s8] ss:$0 sm:$0xff] }
 0x475   :  { %2768 = vst.msk [vmem:[#allocation3 + $0x78] sm:$0xff] %vm633_vm6, %v2736_v6 }
 0x476   :  { %2864 = vst.msk [vmem:[#allocation3 + $0x78] sm:$0xff] %vm731_vm7, %v2832_v9 }
 0x477   :  { %v3020_v10 = vpop.permute.xlu0 %3019 }
 0x478   :  { %3054 = vst.msk [vmem:[#allocation3 + $0x68] sm:$0xff] %vm925_vm9, %v3020_v10  ;;  %v2928_v11 = vpop.permute.xlu1 %2927 }
 0x479   :  { %2960 = vst.msk [vmem:[#allocation3 + $0x78] sm:$0xff] %vm828_vm8, %v2928_v11 }
 0x47b   :  { %v2830_v12 = vpop.permute.xlu0 %2829 }
 0x47c   :  { %2863 = vst.msk [vmem:[#allocation3 + $0x70] sm:$0xff] %vm731_vm7, %v2830_v12  ;;  %v3024_v14 = vpop.permute.xlu1 %3023 }
 0x47d   :  { %3056 = vst.msk [vmem:[#allocation3 + $0x78] sm:$0xff] %vm925_vm9, %v3024_v14 }
 0x47f   :  { %v2926_v15 = vpop.permute.xlu0 %2925  ;;  %v3070_v16 = vld [vmem:[#allocation3 + $0x68] sm:$0xff] }
 0x480   :  { %2959 = vst.msk [vmem:[#allocation3 + $0x70] sm:$0xff] %vm828_vm8, %v2926_v15  ;;  %4250 = vmatmul.mubr.msk.f32.gmra.mxu0 %vm974_vm10, %v3070_v16 }
 0x483   :  { %v3022_v54 = vpop.permute.xlu0 %3021 }
 0x484   :  { %3055 = vst.msk [vmem:[#allocation3 + $0x70] sm:$0xff] %vm925_vm9, %v3022_v54  ;;  %v3072_v20 = vld [vmem:[#allocation3 + $0x78] sm:$0xff] }
 0x48b   :  { %v4233_v19 = vpop.f32.mrf.mxu0  ;;  %v3071_v30 = vld [vmem:[#allocation3 + $0x70] sm:$0xff] }
 0x48c   :  { %v3209_v22 = vadd.f32 %v4233_v19, %v5782_v4  ;;  %4252 = vmatprep.mubr.msk.f32.mxu0 %vm974_vm10, %v3071_v30  ;;  %v4407_v19 = vmov 2  }
 0x48d   :  { %v3203_v24 = vpop.f32.mrf.mxu0  ;;  %4253 = vmatmul.mubr.msk.f32.gmra.mxu0 %vm974_vm10, %v3072_v20 }
 0x48e   :  { %v3204_v25 = vadd.f32 %v5782_v4, %v3203_v24  ;;  %v3283_v27 = vmax.f32 %v3209_v22, 0.0 }
 0x490   :  { %v3282_v26 = vmax.f32 %v3204_v25, 0.0 }
 0x492   :  { %4257 = vmatprep.mubr.msk.f32.mxu1 %vm90_vm0, %v3282_v26 }
 0x493   :  { %4258 = vmatmul.mubr.msk.f32.vlgmr.msra.gmra.mxu1 %vm90_vm0, %v3283_v27 }
 0x4ab   :  { %v4236_v62 = vpop.f32.mrf.mxu0 }
 0x4ac   :  { %v3219_v59 = vadd.f32 %v4236_v62, %v5782_v4 }
 0x4ad   :  { %v3213_v28 = vpop.f32.mrf.mxu0 }
 0x4ae   :  { %v3214_v23 = vadd.f32 %v5782_v4, %v3213_v28  ;;  %v3285_v32 = vmax.f32 %v3219_v59, 0.0 }
 0x4b0   :  { %v3284_v31 = vmax.f32 %v3214_v23, 0.0  ;;  %v3614_v23 = vld [vmem:[%s6126_s10 + $0x18] sm:$0xff] }
 0x4b2   :  { %4260 = vmatprep.mubr.msk.f32.mxu1 %vm90_vm0, %v3284_v31  ;;  %v3502_v31 = vld [vmem:[%s6125_s9 + $0x18] sm:$0xff] }
 0x4b3   :  { %4261 = vmatmul.mubr.msk.f32.gmra.mxu1 %vm90_vm0, %v3285_v32 }
 0x4c7   :  { %v4239_v29 = vpop.f32.mrf.mxu0 }
 0x4c8   :  { %v3229_v33 = vadd.f32 %v4239_v29, %v5782_v4 }
 0x4c9   :  { %v3223_v34 = vpop.f32.mrf.mxu0 }
 0x4ca   :  { %v3224_v35 = vadd.f32 %v5782_v4, %v3223_v34  ;;  %v3287_v37 = vmax.f32 %v3229_v33, 0.0 }
 0x4cb   :  { %v4242_v36 = vpop.f32.mrf.mxu0 }
 0x4cc   :  { %v3286_v3 = vmax.f32 %v3224_v35, 0.0  ;;  %v3239_v60 = vadd.f32 %v4242_v36, %v5782_v4 }
 0x4cd   :  { %v3233_v38 = vpop.f32.mrf.mxu0 }
 0x4ce   :  { %v3234_v39 = vadd.f32 %v5782_v4, %v3233_v38  ;;  %4263 = vmatprep.mubr.msk.f32.mxu1 %vm90_vm0, %v3286_v3  ;;  %v3289_v40 = vmax.f32 %v3239_v60, 0.0 }
 0x4cf   :  { %4264 = vmatmul.mubr.msk.f32.gmra.mxu1 %vm90_vm0, %v3287_v37 }
 0x4d0   :  { %v3288_v17 = vmax.f32 %v3234_v39, 0.0  ;;  %v3504_v39 = vld [vmem:[%s6125_s9 + $0x28] sm:$0xff] }
 0x4d2   :  { %4266 = vmatprep.mubr.msk.f32.mxu1 %vm90_vm0, %v3288_v17  ;;  %v3616_v17 = vld [vmem:[%s6126_s10 + $0x28] sm:$0xff] }
 0x4d3   :  { %4267 = vmatmul.mubr.msk.f32.gmra.mxu1 %vm90_vm0, %v3289_v40 }
 0x4ff   :  { %v4245_v42 = vpop.f32.mrf.mxu0 }
 0x500   :  { %v3249_v43 = vadd.f32 %v4245_v42, %v5782_v4 }
 0x501   :  { %v3243_v45 = vpop.f32.mrf.mxu0 }
 0x502   :  { %v3244_v46 = vadd.f32 %v5782_v4, %v3243_v45  ;;  %v3291_v49 = vmax.f32 %v3249_v43, 0.0 }
 0x504   :  { %v3290_v47 = vmax.f32 %v3244_v46, 0.0  ;;  %v3728_v46 = vld [vmem:[%s6127_s11 + $0x28] sm:$0xff] }
 0x506   :  { %4269 = vmatprep.mubr.msk.f32.mxu1 %vm90_vm0, %v3290_v47 }
 0x507   :  { %4270 = vmatmul.mubr.msk.f32.gmra.mxu1 %vm90_vm0, %v3291_v49 }
 0x519   :  { %v4248_v50 = vpop.f32.mrf.mxu0 }
 0x51a   :  { %v3259_v51 = vadd.f32 %v4248_v50, %v5782_v4 }
 0x51b   :  { %v3253_v52 = vpop.f32.mrf.mxu0 }
 0x51c   :  { %v3254_v53 = vadd.f32 %v5782_v4, %v3253_v52  ;;  %v3293_v56 = vmax.f32 %v3259_v51, 0.0 }
 0x51e   :  { %v3292_v55 = vmax.f32 %v3254_v53, 0.0  ;;  %v3615_v53 = vld [vmem:[%s6126_s10 + $0x20] sm:$0xff] }
 0x520   :  { %4272 = vmatprep.mubr.msk.f32.mxu1 %vm90_vm0, %v3292_v55 }
 0x521   :  { %4273 = vmatmul.mubr.msk.f32.gmra.mxu1 %vm90_vm0, %v3293_v56  ;;  %v3503_v56 = vld [vmem:[%s6125_s9 + $0x20] sm:$0xff] }
 0x540   :  { %v4251_v57 = vpop.f32.mrf.mxu0 }
 0x541   :  { %v3269_v44 = vadd.f32 %v4251_v57, %v5782_v4 }
 0x542   :  { %v3263_v58 = vpop.f32.mrf.mxu0 }
 0x543   :  { %v3264_v61 = vadd.f32 %v5782_v4, %v3263_v58  ;;  %v3295_v18 = vmax.f32 %v3269_v44, 0.0 }
 0x545   :  { %v3294_v48 = vmax.f32 %v3264_v61, 0.0 }
 0x547   :  { %4275 = vmatprep.mubr.msk.f32.mxu1 %vm90_vm0, %v3294_v48 }
 0x548   :  { %4276 = vmatmul.mubr.msk.f32.gmra.mxu1 %vm90_vm0, %v3295_v18  ;;  %v4408_v18 = vmov 0.0  }
 0x549   :  { %4281 = vmatprep.subr.mxu0 %v4408_v18  ;;  %4313 = vmatprep.mubr.msk.f32.mxu0 %vm4409_vm11, %v4408_v18 }
 0x54d   :  { %v4254_v63 = vpop.f32.mrf.mxu0 }
 0x54e   :  { %v3279_v21 = vadd.f32 %v4254_v63, %v5782_v4  ;;  %v3506_v63 = vld [vmem:[%s6125_s9 + $0x38] sm:$0xff] }
 0x54f   :  { %v3273_v1 = vpop.f32.mrf.mxu0 }
 0x550   :  { %v3274_v0 = vadd.f32 %v5782_v4, %v3273_v1  ;;  %v3297_v5 = vmax.f32 %v3279_v21, 0.0 }
 0x552   :  { %v3296_v2 = vmax.f32 %v3274_v0, 0.0  ;;  %v3618_v0 = vld [vmem:[%s6126_s10 + $0x38] sm:$0xff] }
 0x553   :  { %v5820_v6 = vpop.f32.mrf.mxu1 }
 0x554   :  { %4278 = vmatprep.mubr.msk.f32.mxu1 %vm90_vm0, %v3296_v2 }
 0x555   :  { %4279 = vmatmul.mubr.msk.f32.gmra.mxu1 %vm90_vm0, %v3297_v5  ;;  %v5822_v7 = vpop.f32.mrf.mxu1 }
 0x573   :  { %v4262_v9 = vpop.f32.mrf.mxu1 }
 0x574   :  { %v5830_v10 = vadd.f32 %v4262_v9, %v5827_v8 }
 0x575   :  { %v5834_v11 = vpop.f32.mrf.mxu1 }
 0x576   :  { %3640 = vperm.xlu0 %4332, %v5830_v10   ;;  %3532 = vperm.xlu1 %4331, %v5830_v10  }
 0x58f   :  { %v4265_v12 = vpop.f32.mrf.mxu1 }
 0x590   :  { %v3446_v14 = vadd.f32 %v4265_v12, %v5827_v8 }
 0x591   :  { %v3440_v15 = vpop.f32.mrf.mxu1 }
 0x592   :  { %v5838_v16 = vadd.f32 %v5827_v8, %v3440_v15  ;;  %3542 = vperm.xlu1 %4331, %v3446_v14   ;;  %v3426_v15 = vadd.f32 %v5820_v6, %v5827_v8  ;;  %v3421_v6 = vadd.f32 %v5827_v8, %v5822_v7 }
 0x593   :  { %v4268_v54 = vpop.f32.mrf.mxu1 }
 0x594   :  { %3644 = vperm.xlu0 %4332, %v5838_v16   ;;  %v3456_v4 = vadd.f32 %v4268_v54, %v5827_v8 }
 0x595   :  { %v3450_v20 = vpop.f32.mrf.mxu1 }
 0x596   :  { %4333 = vset.pattern.permute.xlu1 %v4405_v41  ;;  %v5847_v30 = vadd.f32 %v5827_v8, %v3450_v20 }
 0x597   :  { %3648 = vperm.xlu1 %4333, %v3446_v14  }
 0x598   :  { %4336 = vset.pattern.permute.xlu0 %v4406_v13 }
 0x599   :  { %3552 = vperm.xlu0 %4336, %v3456_v4  }
 0x59b   :  { %4334 = vset.pattern.permute.xlu1 %v4407_v19 }
 0x59c   :  { %3760 = vperm.xlu1 %4334, %v3446_v14   ;;  %v3431_v14 = vadd.f32 %v5827_v8, %v5834_v11 }
 0x59d   :  { %4338 = vset.pattern.permute.xlu0 %v4407_v19 }
 0x59e   :  { %3768 = vperm.xlu0 %4338, %v3456_v4  }
 0x5a0   :  { %4335 = vset.pattern.permute.xlu1 %v4406_v13 }
 0x5a1   :  { %3537 = vperm.xlu1 %4335, %v5838_v16  }
 0x5a2   :  { %3764 = vperm.xlu0 %4338, %v5847_v30  }
 0x5a5   :  { %4337 = vset.pattern.permute.xlu1 %v4405_v41 }
 0x5a6   :  { %3656 = vperm.xlu1 %4337, %v3456_v4   ;;  %4340 = vset.pattern.permute.xlu0 %v4405_v41  ;;  %v3620_v4 = vld [vmem:[%s6126_s10 + $0x48] sm:$0xff] }
 0x5aa   :  { %3652 = vperm.xlu1 %4337, %v5847_v30  }
 0x5ae   :  { %4339 = vset.pattern.permute.xlu1 %v4406_v13 }
 0x5c7   :  { %v4271_v22 = vpop.f32.mrf.mxu1 }
 0x5c8   :  { %v3466_v24 = vadd.f32 %v4271_v22, %v5827_v8 }
 0x5c9   :  { %v3460_v25 = vpop.f32.mrf.mxu1 }
 0x5ca   :  { %3664 = vperm.xlu0 %4340, %v3466_v24   ;;  %3562 = vperm.xlu1 %4339, %v3466_v24   ;;  %v3461_v26 = vadd.f32 %v5827_v8, %v3460_v25 }
 0x5ce   :  { %3660 = vperm.xlu0 %4340, %v3461_v26   ;;  %4341 = vset.pattern.permute.xlu1 %v4407_v19 }
 0x5cf   :  { %3776 = vperm.xlu1 %4341, %v3466_v24  }
 0x5d2   :  { %4344 = vset.pattern.permute.xlu0 %v4406_v13 }
 0x5d3   :  { %4342 = vset.pattern.permute.xlu1 %v4406_v13 }
 0x5d4   :  { %3557 = vperm.xlu1 %4342, %v3461_v26  }
 0x5d8   :  { %4343 = vset.pattern.permute.xlu1 %v4407_v19 }
 0x5d9   :  { %3772 = vperm.xlu1 %4343, %v3461_v26  }
 0x5dd   :  { %4345 = vset.pattern.permute.xlu1 %v4405_v41 }
 0x5e1   :  { %v4274_v27 = vpop.f32.mrf.mxu1 }
 0x5e2   :  { %v3476_v62 = vadd.f32 %v4274_v27, %v5827_v8 }
 0x5e3   :  { %v3470_v59 = vpop.f32.mrf.mxu1 }
 0x5e4   :  { %3572 = vperm.xlu0 %4344, %v3476_v62   ;;  %3672 = vperm.xlu1 %4345, %v3476_v62   ;;  %v3471_v28 = vadd.f32 %v5827_v8, %v3470_v59 }
 0x5e8   :  { %4346 = vset.pattern.permute.xlu0 %v4407_v19  ;;  %4347 = vset.pattern.permute.xlu1 %v4406_v13 }
 0x5e9   :  { %3784 = vperm.xlu0 %4346, %v3476_v62   ;;  %3567 = vperm.xlu1 %4347, %v3471_v28  }
 0x5ed   :  { %4348 = vset.pattern.permute.xlu1 %v4405_v41  ;;  %4351 = vset.pattern.permute.xlu0 %v4405_v41 }
 0x5ee   :  { %3668 = vperm.xlu1 %4348, %v3471_v28  }
 0x5f1   :  { %v3641_v32 = vpop.permute.xlu0 %3640  ;;  %v3533_v29 = vpop.permute.xlu1 %3532 }
 0x5f2   :  { %v3694_v33 = vmul.f32 %v3641_v32, %v3614_v23  ;;  %v3598_v34 = vmul.f32 %v3533_v29, %v3502_v31  ;;  %4349 = vset.pattern.permute.xlu1 %v4407_v19 }
 0x5f3   :  { %3780 = vperm.xlu1 %4349, %v3471_v28  }
 0x5f4   :  { %v5875_v35 = vadd.f32 %v3694_v33, %v3598_v34 }
 0x5f7   :  { %4350 = vset.pattern.permute.xlu1 %v4406_v13 }
 0x608   :  { %v4277_v36 = vpop.f32.mrf.mxu1 }
 0x609   :  { %v3486_v3 = vadd.f32 %v4277_v36, %v5827_v8 }
 0x60a   :  { %v3480_v37 = vpop.f32.mrf.mxu1 }
 0x60b   :  { %3680 = vperm.xlu0 %4351, %v3486_v3   ;;  %3582 = vperm.xlu1 %4350, %v3486_v3   ;;  %v3481_v38 = vadd.f32 %v5827_v8, %v3480_v37 }
 0x60d   :  { %v3543_v60 = vpop.permute.xlu1 %3542 }
 0x60e   :  { %v3600_v42 = vmul.f32 %v3543_v60, %v3504_v39  ;;  %v3626_v60 = vld [vmem:[%s6126_s10 + $0x78] sm:$0xff] }
 0x60f   :  { %4353 = vset.pattern.permute.xlu0 %v4406_v13  ;;  %4352 = vset.pattern.permute.xlu1 %v4407_v19  ;;  %v3645_v52 = vpop.permute.xlu0 %3644 }
 0x610   :  { %3577 = vperm.xlu0 %4353, %v3481_v38   ;;  %3792 = vperm.xlu1 %4352, %v3486_v3   ;;  %v3695_v58 = vmul.f32 %v3645_v52, %v3615_v53  ;;  %v3624_v52 = vld [vmem:[%s6126_s10 + $0x68] sm:$0xff] }
 0x612   :  { %v3649_v40 = vpop.permute.xlu1 %3648 }
 0x613   :  { %v3696_v43 = vmul.f32 %v3649_v40, %v3616_v17 }
 0x614   :  { %4355 = vset.pattern.permute.xlu0 %v4407_v19  ;;  %4354 = vset.pattern.permute.xlu1 %v4405_v41  ;;  %v3553_v21 = vpop.permute.xlu0 %3552 }
 0x615   :  { %v3712_v45 = vadd.f32 %v3696_v43, %v3600_v42  ;;  %v4280_v47 = vpop.f32.mrf.mxu1  ;;  %3788 = vperm.xlu0 %4355, %v3481_v38   ;;  %3676 = vperm.xlu1 %4354, %v3481_v38   ;;  %v3602_v5 = vmul.f32 %v3553_v21, %v3506_v63  ;;  %v3514_v38 = vld [vmem:[%s6125_s9 + $0x78] sm:$0xff]  ;;  %v3737_v63 = vld [vmem:[%s6127_s11 + $0x70] sm:$0xff] }
 0x616   :  { %v3496_v49 = vadd.f32 %v4280_v47, %v5827_v8  ;;  %v3738_v43 = vld [vmem:[%s6127_s11 + $0x78] sm:$0xff] }
 0x617   :  { %v3761_v50 = vpop.permute.xlu1 %3760  ;;  %v3490_v57 = vpop.f32.mrf.mxu1  ;;  %v3510_v21 = vld [vmem:[%s6125_s9 + $0x58] sm:$0xff] }
 0x618   :  { %v3808_v51 = vmul.f32 %v3761_v50, %v3728_v46  ;;  %v3491_v48 = vadd.f32 %v5827_v8, %v3490_v57  ;;  %v3732_v8 = vld [vmem:[%s6127_s11 + $0x48] sm:$0xff]  ;;  %v3623_v57 = vld [vmem:[%s6126_s10 + $0x60] sm:$0xff] }
 0x619   :  { %4356 = vset.pattern.permute.xlu0 %v4406_v13  ;;  %3688 = vperm.xlu1 %4354, %v3496_v49   ;;  %v5931_v11 = vpop.permute.xlu0 %3768 }
 0x61a   :  { %v5898_v55 = vadd.f32 %v3808_v51, %v3712_v45  ;;  %3592 = vperm.xlu0 %4356, %v3496_v49   ;;  %v3513_v51 = vld [vmem:[%s6125_s9 + $0x70] sm:$0xff] }
 0x61c   :  { %v3538_v44 = vpop.permute.xlu1 %3537 }
 0x61d   :  { %v3599_v61 = vmul.f32 %v3538_v44, %v3503_v56  ;;  %4357 = vset.pattern.permute.xlu1 %v4407_v19  ;;  %v3512_v56 = vld [vmem:[%s6125_s9 + $0x68] sm:$0xff]  ;;  %v3625_v44 = vld [vmem:[%s6126_s10 + $0x70] sm:$0xff] }
 0x61e   :  { %4359 = vset.pattern.permute.xlu0 %v4405_v41  ;;  %3800 = vperm.xlu1 %4357, %v3496_v49  }
 0x61f   :  { %v5910_v1 = vadd.f32 %v3695_v58, %v3599_v61  ;;  %3684 = vperm.xlu0 %4359, %v3491_v48   ;;  %v3511_v61 = vld [vmem:[%s6125_s9 + $0x60] sm:$0xff] }
 0x621   :  { %v3657_v2 = vpop.permute.xlu1 %3656 }
 0x622   :  { %v3698_v9 = vmul.f32 %v3657_v2, %v3618_v0  ;;  %4358 = vset.pattern.permute.xlu1 %v4406_v13 }
 0x623   :  { %4360 = vset.pattern.permute.xlu0 %v4406_v13  ;;  %3587 = vperm.xlu1 %4358, %v3491_v48  }
 0x624   :  { %v5917_v12 = vadd.f32 %v3698_v9, %v3602_v5  ;;  %3547 = vperm.xlu0 %4360, %v5847_v30  }
 0x625   :  { %v5939_v54 = vpop.permute.xlu1 %3652 }
 0x627   :  { %4361 = vset.pattern.permute.xlu1 %v4407_v19 }
 0x628   :  { %3796 = vperm.xlu1 %4361, %v3491_v48   ;;  %3527 = vperm.xlu0 %4360, %v3431_v14   ;;  %v3736_v48 = vld [vmem:[%s6127_s11 + $0x68] sm:$0xff] }
 0x62c   :  { %3756 = vperm.xlu1 %4361, %v5838_v16   ;;  %3522 = vperm.xlu0 %4360, %v3426_v15   ;;  %v5937_v16 = vpop.permute.xlu0 %3764 }
 0x630   :  { %4362 = vset.pattern.permute.xlu1 %v4405_v41  ;;  %4365 = vset.pattern.permute.xlu0 %v4407_v19 }
 0x631   :  { %3636 = vperm.xlu1 %4362, %v3431_v14   ;;  %3748 = vperm.xlu0 %4365, %v3431_v14   ;;  %v3622_v14 = vld [vmem:[%s6126_s10 + $0x58] sm:$0xff] }
 0x635   :  { %4363 = vset.pattern.permute.xlu1 %v4407_v19  ;;  %3744 = vperm.xlu0 %4365, %v3426_v15  }
 0x636   :  { %3752 = vperm.xlu1 %4363, %v5830_v10   ;;  %v3508_v10 = vld [vmem:[%s6125_s9 + $0x48] sm:$0xff] }
 0x63a   :  { %4364 = vset.pattern.permute.xlu1 %v4405_v41 }
 0x63b   :  { %3632 = vperm.xlu1 %4364, %v3426_v15  }
 0x63f   :  { %4366 = vset.pattern.permute.xlu1 %v4406_v13 }
 0x640   :  { %3517 = vperm.xlu1 %4366, %v3421_v6  }
 0x644   :  { %4367 = vset.pattern.permute.xlu1 %v4405_v41 }
 0x645   :  { %v3665_v20 = vpop.permute.xlu0 %3664  ;;  %v3563_v30 = vpop.permute.xlu1 %3562  ;;  %3628 = vperm.xlu1 %4367, %v3421_v6  }
 0x646   :  { %v3700_v7 = vmul.f32 %v3665_v20, %v3620_v4  ;;  %v3604_v13 = vmul.f32 %v3563_v30, %v3508_v10 }
 0x648   :  { %v3716_v24 = vadd.f32 %v3700_v7, %v3604_v13  ;;  %v3734_v13 = vld [vmem:[%s6127_s11 + $0x58] sm:$0xff] }
 0x649   :  { %4368 = vset.pattern.permute.xlu1 %v4407_v19  ;;  %v5961_v28 = vpop.permute.xlu0 %3660 }
 0x64a   :  { %v3777_v22 = vpop.permute.xlu1 %3776  ;;  %3740 = vperm.xlu1 %4368, %v3421_v6  }
 0x64b   :  { %v3812_v25 = vmul.f32 %v3777_v22, %v3732_v8  ;;  %v3621_v8 = vld [vmem:[%s6126_s10 + $0x50] sm:$0xff]  ;;  %v3735_v22 = vld [vmem:[%s6127_s11 + $0x60] sm:$0xff] }
 0x64d   :  { %v5953_v26 = vadd.f32 %v3812_v25, %v3716_v24 }
 0x64f   :  { %v5955_v27 = vpop.permute.xlu1 %3557 }
 0x654   :  { %v5957_v41 = vpop.permute.xlu1 %3772 }
 0x65f   :  { %v3673_v62 = vpop.permute.xlu1 %3672  ;;  %v3573_v23 = vpop.permute.xlu0 %3572 }
 0x660   :  { %v3606_v7 = vmul.f32 %v3573_v23, %v3510_v21  ;;  %v3702_v24 = vmul.f32 %v3673_v62, %v3622_v14  ;;  %v3509_v23 = vld [vmem:[%s6125_s9 + $0x50] sm:$0xff]  ;;  %v3507_v62 = vld [vmem:[%s6125_s9 + $0x40] sm:$0xff] }
 0x664   :  { %v5959_v59 = vpop.permute.xlu1 %3567  ;;  %v3785_v19 = vpop.permute.xlu0 %3784 }
 0x669   :  { %v3669_v31 = vpop.permute.xlu1 %3668 }
 0x66e   :  { %v5963_v32 = vpop.permute.xlu1 %3780 }
 0x686   :  { %v3681_v29 = vpop.permute.xlu0 %3680  ;;  %v3583_v33 = vpop.permute.xlu1 %3582 }
 0x687   :  { %v3704_v0 = vmul.f32 %v3681_v29, %v3624_v52  ;;  %v3608_v2 = vmul.f32 %v3583_v33, %v3512_v56 }
 0x689   :  { %v3720_v25 = vadd.f32 %v3704_v0, %v3608_v2  ;;  %v3726_v2 = vld [vmem:[%s6127_s11 + $0x18] sm:$0xff] }
 0x68b   :  { %v3578_v34 = vpop.permute.xlu0 %3577  ;;  %v3793_v36 = vpop.permute.xlu1 %3792 }
 0x68c   :  { %v3607_v4 = vmul.f32 %v3578_v34, %v3511_v61  ;;  %v3816_v10 = vmul.f32 %v3793_v36, %v3736_v48  ;;  %v3733_v34 = vld [vmem:[%s6127_s11 + $0x50] sm:$0xff] }
 0x690   :  { %v3789_v3 = vpop.permute.xlu0 %3788  ;;  %v3677_v37 = vpop.permute.xlu1 %3676 }
 0x691   :  { %v3703_v5 = vmul.f32 %v3677_v37, %v3623_v57  ;;  %v3814_v37 = vmul.f32 %v3785_v19, %v3734_v13  ;;  %v3731_v19 = vld [vmem:[%s6127_s11 + $0x40] sm:$0xff] }
 0x693   :  { %v3719_v29 = vadd.f32 %v3703_v5, %v3607_v4  ;;  %v3612_v5 = vld [vmem:[%s6126_s10 + $0x8] sm:$0xff] }
 0x694   :  { %v3689_v39 = vpop.permute.xlu1 %3688 }
 0x695   :  { %v3593_v17 = vpop.permute.xlu0 %3592  ;;  %v3706_v40 = vmul.f32 %v3689_v39, %v3626_v60  ;;  %v3701_v60 = vmul.f32 %v3669_v31, %v3621_v8  ;;  %v3815_v39 = vmul.f32 %v3789_v3, %v3735_v22  ;;  %v3619_v31 = vld [vmem:[%s6126_s10 + $0x40] sm:$0xff]  ;;  %v3505_v3 = vld [vmem:[%s6125_s9 + $0x30] sm:$0xff]  ;;  %v3724_v8 = vld [vmem:[%s6127_s11 + $0x8] sm:$0xff] }
 0x696   :  { %v3610_v42 = vmul.f32 %v3593_v17, %v3514_v38  ;;  %v3832_v38 = vadd.f32 %v3816_v10, %v3720_v25 }
 0x698   :  { %v3722_v46 = vadd.f32 %v3706_v40, %v3610_v42  ;;  %v3718_v40 = vadd.f32 %v3702_v24, %v3606_v7  ;;  %v3605_v42 = vmul.f32 %v5959_v59, %v3509_v23  ;;  %v3603_v59 = vmul.f32 %v5955_v27, %v3507_v62  ;;  %v3730_v27 = vld [vmem:[%s6127_s11 + $0x38] sm:$0xff] }
 0x699   :  { %v3801_v45 = vpop.permute.xlu1 %3800 }
 0x69a   :  { %v3818_v47 = vmul.f32 %v3801_v45, %v3738_v43  ;;  %v3685_v50 = vpop.permute.xlu0 %3684  ;;  %v3813_v43 = vmul.f32 %v5963_v32, %v3733_v34  ;;  %v3831_v45 = vadd.f32 %v3815_v39, %v3719_v29  ;;  %v3717_v32 = vadd.f32 %v3701_v60, %v3605_v42  ;;  %v3723_v60 = vld [vmem:[%s6127_s11] sm:$0xff] }
 0x69b   :  { %v3705_v9 = vmul.f32 %v3685_v50, %v3625_v44  ;;  %v3699_v50 = vmul.f32 %v5961_v28, %v3619_v31  ;;  %v3729_v28 = vld [vmem:[%s6127_s11 + $0x30] sm:$0xff]  ;;  %v3835_v42 = vld [vmem:[%s6129_s13] sm:$0x3] }
 0x69c   :  { %v3834_v49 = vadd.f32 %v3818_v47, %v3722_v46  ;;  %v3830_v46 = vadd.f32 %v3814_v37, %v3718_v40  ;;  %v3829_v52 = vadd.f32 %v3813_v43, %v3717_v32  ;;  %v3809_v21 = vmul.f32 %v5937_v16, %v3729_v28  ;;  %v4019_v43 = vld [vmem:[%s6128_s12] ss:$0 sm:$0xff]  ;;  %s4411_s12 = smov [#allocation4]  }
 0x69d   :  { %v3715_v44 = vadd.f32 %v3699_v50, %v3603_v59  ;;  %s3939_s24 = sshll.u32 %s4411_s12, 4  ;;  %s3940_s24 = int_to_ptr.vmem [resolvable:$true] %s3939_s24 }
 0x69e   :  { %4282 = vmatpush3.msra.mxu0 %v3834_v49  ;;  %v3588_v53 = vpop.permute.xlu1 %3587  ;;  %v3617_v49 = vld [vmem:[%s6126_s10 + $0x30] sm:$0xff]  ;;  %s4375_s25 = scalar_lea.vmem %s3940_s24, 32  ;;  %p4380_p1 = scmp.lt.s32.totalorder %s3940_s24, %s3940_s24 }
 0x69f   :  { %4283 = vmatprep.subr.mxu0 %v4408_v18  ;;  %v3609_v58 = vmul.f32 %v3588_v53, %v3513_v51  ;;  %v3548_v15 = vpop.permute.xlu0 %3547  ;;  %v3811_v51 = vmul.f32 %v5957_v41, %v3731_v19  ;;  %v3697_v57 = vmul.f32 %v5939_v54, %v3617_v49  ;;  %v3613_v54 = vld [vmem:[%s6126_s10 + $0x10] sm:$0xff]  ;;  %p4376_p0 = scmp.ne.s32.totalorder %s3940_s24, %s4375_s25  ;;  %p4381_p2 = scmp.lt.s32.totalorder %s4375_s25, %s4375_s25 }
 0x6a0   :  { %v3601_v53 = vmul.f32 %v3548_v15, %v3505_v3  ;;  %v3500_v15 = vld [vmem:[%s6125_s9 + $0x8] sm:$0xff] }
 0x6a1   :  { %v3721_v20 = vadd.f32 %v3705_v9, %v3609_v58  ;;  %v3810_v58 = vmul.f32 %v5931_v11, %v3730_v27  ;;  %v3827_v61 = vadd.f32 %v3811_v51, %v3715_v44  ;;  %v3501_v11 = vld [vmem:[%s6125_s9 + $0x10] sm:$0xff]  ;;  %p4382_p3 = por %p4381_p2, %p4380_p1 }
 0x6a2   :  { %v3713_v48 = vadd.f32 %v3697_v57, %v3601_v53 }
 0x6a3   :  { %v3797_v6 = vpop.permute.xlu1 %3796  ;;  %v3528_v17 = vpop.permute.xlu0 %3527  ;;  %v3826_v0 = vadd.f32 %v3810_v58, %v5917_v12  ;;  %p4383_p4 = pnand %p4382_p3, %p4376_p0 }
 0x6a4   :  { %v3817_v30 = vmul.f32 %v3797_v6, %v3737_v63  ;;  %v3727_v63 = vld [vmem:[%s6127_s11 + $0x20] sm:$0xff]  ;;  %v3825_v9 = vadd.f32 %v3809_v21, %v3713_v48  ;;  %v3597_v6 = vmul.f32 %v3528_v17, %v3501_v11 }
 0x6a6   :  { %v3833_v33 = vadd.f32 %v3817_v30, %v3721_v20  ;;  %v3725_v20 = vld [vmem:[%s6127_s11 + $0x10] sm:$0xff]  ;;  %s4410_s11 = smov 126  }
 0x6a7   :  { %v3757_v36 = vpop.permute.xlu1 %3756  ;;  %v3523_v56 = vpop.permute.xlu0 %3522 }
 0x6a8   :  { %4284 = vmatpush3.msra.mxu0 %v3833_v33  ;;  %v3807_v16 = vmul.f32 %v3757_v36, %v3727_v63  ;;  %v3596_v7 = vmul.f32 %v3523_v56, %v3500_v15 }
 0x6a9   :  { %4285 = vmatprep.subr.mxu0 %v4408_v18 }
 0x6aa   :  { %4286 = vmatpush3.msra.mxu0 %v3832_v38  ;;  %v3823_v30 = vadd.f32 %v3807_v16, %v5910_v1 }
 0x6ab   :  { %4287 = vmatprep.subr.mxu0 %v4408_v18 }
 0x6ac   :  { %4288 = vmatpush3.msra.mxu0 %v3831_v45  ;;  %v3637_v47 = vpop.permute.xlu1 %3636 }
 0x6ad   :  { %4289 = vmatprep.subr.mxu0 %v4408_v18  ;;  %v3693_v14 = vmul.f32 %v3637_v47, %v3613_v54 }
 0x6ae   :  { %4290 = vmatpush3.msra.mxu0 %v3830_v46 }
 0x6af   :  { %4291 = vmatprep.subr.mxu0 %v4408_v18  ;;  %v3709_v13 = vadd.f32 %v3693_v14, %v3597_v6 }
 0x6b0   :  { %4292 = vmatpush3.msra.mxu0 %v3829_v52 }
 0x6b1   :  { %4293 = vmatprep.subr.mxu0 %v4408_v18  ;;  %v3753_v41 = vpop.permute.xlu1 %3752 }
 0x6b2   :  { %4294 = vmatpush3.msra.mxu0 %v5953_v26  ;;  %v3749_v26 = vpop.permute.xlu0 %3748  ;;  %v3806_v4 = vmul.f32 %v3753_v41, %v3726_v2 }
 0x6b3   :  { %4295 = vmatprep.subr.mxu0 %v4408_v18  ;;  %v3805_v25 = vmul.f32 %v3749_v26, %v3725_v20 }
 0x6b4   :  { %4296 = vmatpush3.msra.mxu0 %v3827_v61  ;;  %v3822_v29 = vadd.f32 %v3806_v4, %v5875_v35  ;;  %v3499_v35 = vld [vmem:[%s6125_s9] sm:$0xff] }
 0x6b5   :  { %4297 = vmatprep.subr.mxu0 %v4408_v18  ;;  %v3821_v1 = vadd.f32 %v3805_v25, %v3709_v13 }
 0x6b6   :  { %4298 = vmatpush3.msra.mxu0 %v3826_v0  ;;  %v3633_v12 = vpop.permute.xlu1 %3632  ;;  %v3745_v22 = vpop.permute.xlu0 %3744 }
 0x6b7   :  { %4299 = vmatprep.subr.mxu0 %v4408_v18  ;;  %v3692_v10 = vmul.f32 %v3633_v12, %v3612_v5  ;;  %v3804_v23 = vmul.f32 %v3745_v22, %v3724_v8 }
 0x6b8   :  { %4300 = vmatpush3.msra.mxu0 %v3825_v9 }
 0x6b9   :  { %4301 = vmatprep.subr.mxu0 %v4408_v18  ;;  %v3708_v33 = vadd.f32 %v3692_v10, %v3596_v7 }
 0x6ba   :  { %4302 = vmatpush3.msra.mxu0 %v5898_v55  ;;  %v3611_v55 = vld [vmem:[%s6126_s10] sm:$0xff] }
 0x6bb   :  { %4303 = vmatprep.subr.mxu0 %v4408_v18  ;;  %v3518_v24 = vpop.permute.xlu1 %3517  ;;  %v3820_v34 = vadd.f32 %v3804_v23, %v3708_v33 }
 0x6bc   :  { %4304 = vmatpush3.msra.mxu0 %v3823_v30  ;;  %v3595_v38 = vmul.f32 %v3518_v24, %v3499_v35 }
 0x6bd   :  { %4305 = vmatprep.subr.mxu0 %v4408_v18 }
 0x6be   :  { %4306 = vmatpush3.msra.mxu0 %v3822_v29 }
 0x6bf   :  { %4307 = vmatprep.subr.mxu0 %v4408_v18 }
 0x6c0   :  { %4308 = vmatpush3.msra.mxu0 %v3821_v1  ;;  %v3629_v36 = vpop.permute.xlu1 %3628 }
 0x6c1   :  { %4309 = vmatprep.subr.mxu0 %v4408_v18  ;;  %v3691_v37 = vmul.f32 %v3629_v36, %v3611_v55 }
 0x6c2   :  { %4310 = vmatpush3.msra.mxu0 %v3820_v34 }
 0x6c3   :  { %4311 = vmatprep.subr.mxu0 %v4408_v18  ;;  %v3707_v62 = vadd.f32 %v3691_v37, %v3595_v38 }
 0x6c5   :  { %v3741_v39 = vpop.permute.xlu1 %3740 }
 0x6c6   :  { %v3803_v17 = vmul.f32 %v3741_v39, %v3723_v60 }
 0x6c8   :  { %v3819_v40 = vadd.f32 %v3803_v17, %v3707_v62 }
 0x6ca   :  { %4312 = vmatpush3.msra.mxu0 %v3819_v40 }
 0x6cb   :  { %4314 = vmatmul.mubr.f32.vlgmr.msra.gmra.mxu0 %v3835_v42 }
 0x78b   :  { %v3909_v45 = vpop.f32.mrf.mxu0 }
 0x78c   :  { %v3910_v31 = vadd.f32 %v4019_v43, %v3909_v45 }
 0x78d   :  { %v4315_v19 = vpop.f32.mrf.mxu0 }
 0x78e   :  { %v3914_v18 = vsel %vm3913_vm12, %v3910_v31, -inf  ;;  %4369 = vtanh.f32 %v3910_v31 }
 0x78f   :  { %3915 = vmax.xlane.f32.xlu0 %v3914_v18 }
 0x79b   :  { %v4370_v3 = vpop.eup %4369 }
 0x7a5   :  { %3928 = vrot.lane.b32.xlu0 %v4370_v3, %s4410_s11 }
 0x818   :  { %v3916_v59 = vpop.xlane.xlu0 %3915 }
 0x819   :  { %v3917_v46 = vsub.f32 %v3910_v31, %v3916_v59 }
 0x81b   :  { %v3918_v32 = vmul.f32 1.442695, %v3917_v46 }
 0x81c   :  { %v3929_v47 = vpop.permute.xlu0 %3928 }
 0x81d   :  { %4371 = vpow2.f32 %v3918_v32  ;;  %3932 = vst.msk [vmem:[%s6131_s15] sm:$0x3] %vm3931_vm13, %v3929_v47 }
 0x82a   :  { %v4372_v49 = vpop.eup %4371 }
 0x82b   :  { %v3920_v50 = vsel %vm3913_vm12, %v4372_v49, 0.0 }
 0x82c   :  { %3921 = vadd.xlane.f32.xlu1 %v3920_v50 }
 0x8b5   :  { %v3922_v51 = vpop.xlane.xlu1 %3921 }
 0x8b6   :  { %4373 = vrcp.f32 %v3922_v51 }
 0x8c3   :  { %v4374_v52 = vpop.eup %4373 }
 0x8c4   :  { %v3924_v53 = vmul.f32 %v4374_v52, %v4372_v49 }
 0x8c6   :  { %3925 = vst.msk [vmem:[#allocation4] sm:$0x3] %vm3913_vm12, %v3924_v53 }
 0x8c7   :  { %4386 = shalt.err (!%p4383_p4)
}
 0x8c8   :  { %3942 = dma.vmem_to_hbm [thread:$0]  %s3940_s24, 32, %s6130_s14, [#allocation5]  }
 0x8c9   :  { %4395 = dma.done.wait [#allocation5], 32  }
 0x8ca   :  { %4396 = vsyncadd [#allocation5], 4294967264 }
 0x8cb   :  { %3950 = vsyncpa [#allocation5], 1 }

</bundles_post_ra>
